<compile_context>
chip_gen: v6e
topology: v6e:2x2x1
jax: 0.10.0
libtpu: 0.0.40
codegen_flags: <defaults>
</compile_context>

<pallas_src>
from functools import partial

import jax
import jax.numpy as jnp
from jax import lax
from jax.experimental import pallas as pl
from jax.experimental.pallas import tpu as pltpu

KSIZE = 7
PAD = (KSIZE - 1) // 2  # 3


def _spatial_gate_kernel(H, W, native_bf16, x_ref, w_ref, b_ref, col_ref, o_ref):
    """SpatialGate on a lane-dense (TN, C, H*W) slab (TN batch elems per step).

    x_ref  : (TN, C, H*W)  input dtype, VMEM
    w_ref  : (2*7*7,)      f32, SMEM   BN-folded conv weight, flattened as
                                       c*49 + kh*7 + kw; c0 = max, c1 = mean
    b_ref  : (1,)          f32, SMEM   BN-folded bias
    col_ref: (1, H*W)      int32, VMEM flattened col index j of position (i, j)
    o_ref  : (TN, C, H*W)  input dtype, VMEM
    """
    TN, C, HW = x_ref.shape
    f32 = jnp.float32

    # --- ChannelPool: max & mean over channels. ---
    x = x_ref[...]                                   # (TN, C, HW) native dtype
    if native_bf16:
        # max is exact in bf16; compare natively on v6e/v7x, upcast the result.
        p_max = jnp.max(x, axis=1).astype(f32)                       # (TN, HW)
    else:
        p_max = jnp.max(x.astype(f32), axis=1)                       # (TN, HW)
    p_mean = jnp.mean(x.astype(f32), axis=1)                         # (TN, HW)
    # x's live range ends here; it is re-read from VMEM for the final multiply.

    # --- Hoisted boundary masks (computed once, not per tap). ---
    flat = lax.broadcasted_iota(jnp.int32, (1, HW), 1)               # p = i*W+j
    col = col_ref[...]                                               # (1, HW)
    row_ok = []   # row(p)+oh in [0,H)  <=>  -oh*W <= p < HW - oh*W
    col_ok = []   # col(p)+ow in [0,W)
    for d in range(KSIZE):
        o = d - PAD
        row_ok.append(jnp.logical_and(flat >= -o * W, flat < HW - o * W))
        c = col + o
        col_ok.append(jnp.logical_and(c >= 0, c < W))

    # --- 7x7 conv (2 -> 1 channels): shift-and-accumulate with pltpu.roll on
    #     the flattened maps + one logical_and + where per tap.  Stays off the
    #     MXU on purpose (~100*HW MACs don't justify im2col). ---
    acc = jnp.zeros((TN, HW), f32)
    for dh in range(KSIZE):
        oh = dh - PAD
        for dw in range(KSIZE):
            ow = dw - PAD
            # shifted[:, p] == pooled[:, p + oh*W + ow]  (wrapped lanes are
            # garbage but always masked off by `ok`).
            shift = (-(oh * W + ow)) % HW
            s_max = pltpu.roll(p_max, shift=shift, axis=1)
            s_mean = pltpu.roll(p_mean, shift=shift, axis=1)
            w_max = w_ref[dh * KSIZE + dw]                      # in-channel 0
            w_mean = w_ref[KSIZE * KSIZE + dh * KSIZE + dw]     # in-channel 1
            ok = jnp.logical_and(row_ok[dh], col_ok[dw])        # (1, HW)
            tap = w_max * s_max + w_mean * s_mean               # (TN, HW)
            acc = acc + jnp.where(ok, tap, 0.0)

    # --- folded BatchNorm bias + sigmoid gate, then rescale x (re-read). ---
    scale = jax.nn.sigmoid(acc + b_ref[0])                      # (TN, HW) f32
    if native_bf16:
        # single bf16 vmul per packed vreg on v6e/v7x (no f32 round-trip).
        o_ref[...] = x_ref[...] * scale.astype(o_ref.dtype)[:, None, :]
    else:
        o_ref[...] = (x_ref[...].astype(f32) * scale[:, None, :]).astype(o_ref.dtype)


def _vmem_budget_bytes():
    """Per-generation scoped-VMEM limit (leave double-buffering headroom)."""
    try:
        cap = int(pltpu.get_tpu_info().vmem_capacity_bytes)
    except Exception:
        cap = 64 << 20                       # conservative default (v7x-sized)
    return max(32 << 20, min(cap - (8 << 20), 120 << 20))


def _native_bf16_supported():
    """bf16 VPU path exists on v6e/v7x; not on v5e and earlier."""
    try:
        kind = jax.devices()[0].device_kind.lower()
    except Exception:
        return False
    return not any(t in kind for t in ("v2", "v3", "v4", "v5"))


def spatial_gate(x, conv_w, bn_gamma, bn_beta, bn_mean, bn_var, eps=1e-5):
    """x: (N, C, H, W) float (f32 or bf16); conv_w: (1, 2, 7, 7).

    Returns (N, C, H, W) in x.dtype (matches PyTorch dtype behaviour).
    """
    N, C, H, W = x.shape
    HW = H * W
    out_dtype = x.dtype
    itemsize = jnp.dtype(out_dtype).itemsize

    # Fold eval-mode BatchNorm (single output channel) into conv weight + bias.
    a = (bn_gamma.astype(jnp.float32) /
         jnp.sqrt(bn_var.astype(jnp.float32) + eps))                   # scalar
    w_eff = (conv_w[0].astype(jnp.float32) * a).reshape(2 * KSIZE * KSIZE)
    b_eff = (bn_beta.astype(jnp.float32)
             - bn_mean.astype(jnp.float32) * a).reshape(1)

    # Lane-dense layout: flatten spatial dims (free, contiguous reshape).
    x_flat = x.reshape(N, C, HW)

    # Flattened col index (avoids an in-kernel % W); row test is a flat-index
    # range test done from an in-kernel iota, so no row_ids input is needed.
    col_ids = (jnp.arange(HW, dtype=jnp.int32) % W).reshape(1, HW)

    # --- VMEM budgeting + batch packing (amortize per-step overhead). ---
    vmem_limit = _vmem_budget_bytes()
    # in + out double-buffered + f32 working set (pooled maps, masks, acc).
    per_sample = 4 * C * HW * itemsize + (C + 24) * HW * 4
    tn = max(1, min(N, (vmem_limit // 2) // max(per_sample, 1)))
    while N % tn:                      # largest divisor of N (uniform blocks)
        tn -= 1

    native_bf16 = (out_dtype == jnp.bfloat16) and _native_bf16_supported()
    kernel = partial(_spatial_gate_kernel, H, W, native_bf16)

    out_flat = pl.pallas_call(
        kernel,
        out_shape=jax.ShapeDtypeStruct((N, C, HW), out_dtype),
        grid=(N // tn,),
        in_specs=[
            pl.BlockSpec((tn, C, HW), lambda n: (n, 0, 0)),
            pl.BlockSpec(memory_space=pltpu.MemorySpace.SMEM),
            pl.BlockSpec(memory_space=pltpu.MemorySpace.SMEM),
            pl.BlockSpec((1, HW), lambda n: (0, 0)),   # constant block
        ],
        out_specs=pl.BlockSpec((tn, C, HW), lambda n: (n, 0, 0)),
        compiler_params=pltpu.CompilerParams(
            dimension_semantics=("parallel",),
            vmem_limit_bytes=vmem_limit),
    )(x_flat, w_eff, b_eff, col_ids)

    return out_flat.reshape(N, C, H, W)


def spatial_gate_ref(x, conv_w, bn_gamma, bn_beta, bn_mean, bn_var, eps=1e-5):
    """Pure-JAX f32 reference (lax conv) for correctness checking."""
    pooled = jnp.concatenate(
        [jnp.max(x, axis=1, keepdims=True), jnp.mean(x, axis=1, keepdims=True)],
        axis=1)                                               # (N, 2, H, W)
    conv = lax.conv_general_dilated(
        pooled, conv_w, window_strides=(1, 1),
        padding=((PAD, PAD), (PAD, PAD)),
        dimension_numbers=("NCHW", "OIHW", "NCHW"))           # (N, 1, H, W)
    bn = (conv - bn_mean) / jnp.sqrt(bn_var + eps) * bn_gamma + bn_beta
    return x * jax.nn.sigmoid(bn)


if __name__ == "__main__":
    key = jax.random.PRNGKey(0)
    k_x, k_w, k_g, k_b, k_m, k_v = jax.random.split(key, 6)

    N, C, H, W = 2, 4, 16, 16
    x = jax.random.normal(k_x, (N, C, H, W), jnp.float32)

    # Deterministic synthetic params: Conv2d(2,1,7,bias=False) + BatchNorm2d(1).
    conv_w = jax.random.normal(k_w, (1, 2, KSIZE, KSIZE), jnp.float32) * 0.1
    bn_gamma = 1.0 + 0.1 * jax.random.normal(k_g, (), jnp.float32)
    bn_beta = 0.1 * jax.random.normal(k_b, (), jnp.float32)
    bn_mean = 0.1 * jax.random.normal(k_m, (), jnp.float32)   # running stats
    bn_var = 0.5 + jnp.abs(jax.random.normal(k_v, (), jnp.float32))

    # --- f32 run ---
    out = jax.block_until_ready(
        spatial_gate(x, conv_w, bn_gamma, bn_beta, bn_mean, bn_var))
    ref = spatial_gate_ref(x, conv_w, bn_gamma, bn_beta, bn_mean, bn_var)
    assert out.shape == (N, C, H, W) and out.dtype == x.dtype
    assert jnp.allclose(out, ref, rtol=1e-4, atol=1e-4), (
        f"f32 max abs err = {jnp.max(jnp.abs(out - ref))}")

    # --- bf16 run: I/O stays bf16; gate multiply is bf16-native on v6e/v7x ---
    x_bf = x.astype(jnp.bfloat16)
    out_bf = jax.block_until_ready(
        spatial_gate(x_bf, conv_w, bn_gamma, bn_beta, bn_mean, bn_var))
    ref_bf = spatial_gate_ref(x_bf.astype(jnp.float32), conv_w, bn_gamma,
                              bn_beta, bn_mean, bn_var)
    assert out_bf.dtype == jnp.bfloat16
    assert jnp.allclose(out_bf.astype(jnp.float32), ref_bf, rtol=1e-2, atol=1e-2), (
        f"bf16 max abs err = {jnp.max(jnp.abs(out_bf.astype(jnp.float32) - ref_bf))}")

    print("KERNEL_OK")
</pallas_src>

<mosaic_0001>
module attributes {stable_mosaic.version = 11 : i64} {
  func.func @_spatial_gate_kernel(%arg0: i32, %arg1: memref<2x4x256xf32, #tpu.memory_space<vmem>>, %arg2: memref<98xf32, #tpu.memory_space<smem>>, %arg3: memref<1xf32, #tpu.memory_space<smem>>, %arg4: memref<1x256xi32, #tpu.memory_space<vmem>>, %arg5: memref<2x4x256xf32, #tpu.memory_space<vmem>>) attributes {dimension_semantics = [#tpu.dimension_semantics<parallel>], iteration_bounds = array<i64: 1>, scalar_prefetch = 0 : i64, scratch_operands = 0 : i64, tpu.core_type = #tpu.core_type<tc>, window_params = [{transform_indices = @transform_0, window_bounds = array<i64: 2, 4, 256>}, {transform_indices = @transform_1, window_bounds = array<i64: 98>}, {transform_indices = @transform_2, window_bounds = array<i64: 1>}, {pipeline_mode = #tpu.pipeline_mode<synchronous>, transform_indices = @transform_3, window_bounds = array<i64: 1, 256>}, {transform_indices = @transform_4, window_bounds = array<i64: 2, 4, 256>}]} {
    %c0 = arith.constant 0 : index
    %c0_0 = arith.constant 0 : index
    %c0_1 = arith.constant 0 : index
    %0 = vector.load %arg1[%c0, %c0_0, %c0_1] : memref<2x4x256xf32, #tpu.memory_space<vmem>>, vector<2x4x256xf32>
    %cst = arith.constant dense<0xFF800000> : vector<2x256xf32>
    %1 = vector.multi_reduction <maximumf>, %0, %cst [1] : vector<2x4x256xf32> to vector<2x256xf32>
    %cst_2 = arith.constant dense<0.000000e+00> : vector<2x256xf32>
    %2 = vector.multi_reduction <add>, %0, %cst_2 [1] : vector<2x4x256xf32> to vector<2x256xf32>
    %cst_3 = arith.constant 4.000000e+00 : f32
    %3 = vector.broadcast %cst_3 : f32 to vector<2x256xf32>
    %4 = arith.divf %2, %3 : vector<2x256xf32>
    %5 = tpu.iota {dimensions = array<i32: 1>} : vector<1x256xi32>
    %c0_4 = arith.constant 0 : index
    %c0_5 = arith.constant 0 : index
    %6 = vector.load %arg4[%c0_4, %c0_5] : memref<1x256xi32, #tpu.memory_space<vmem>>, vector<1x256xi32>
    %c48_i32 = arith.constant 48 : i32
    %7 = vector.broadcast %c48_i32 : i32 to vector<1x256xi32>
    %8 = arith.cmpi sge, %5, %7 : vector<1x256xi32>
    %c304_i32 = arith.constant 304 : i32
    %9 = vector.broadcast %c304_i32 : i32 to vector<1x256xi32>
    %10 = arith.cmpi slt, %5, %9 : vector<1x256xi32>
    %11 = arith.andi %8, %10 : vector<1x256xi1>
    %c-3_i32 = arith.constant -3 : i32
    %12 = vector.broadcast %c-3_i32 : i32 to vector<1x256xi32>
    %13 = arith.addi %6, %12 : vector<1x256xi32>
    %c0_i32 = arith.constant 0 : i32
    %14 = vector.broadcast %c0_i32 : i32 to vector<1x256xi32>
    %15 = arith.cmpi sge, %13, %14 : vector<1x256xi32>
    %c16_i32 = arith.constant 16 : i32
    %16 = vector.broadcast %c16_i32 : i32 to vector<1x256xi32>
    %17 = arith.cmpi slt, %13, %16 : vector<1x256xi32>
    %18 = arith.andi %15, %17 : vector<1x256xi1>
    %c32_i32 = arith.constant 32 : i32
    %19 = vector.broadcast %c32_i32 : i32 to vector<1x256xi32>
    %20 = arith.cmpi sge, %5, %19 : vector<1x256xi32>
    %c288_i32 = arith.constant 288 : i32
    %21 = vector.broadcast %c288_i32 : i32 to vector<1x256xi32>
    %22 = arith.cmpi slt, %5, %21 : vector<1x256xi32>
    %23 = arith.andi %20, %22 : vector<1x256xi1>
    %c-2_i32 = arith.constant -2 : i32
    %24 = vector.broadcast %c-2_i32 : i32 to vector<1x256xi32>
    %25 = arith.addi %6, %24 : vector<1x256xi32>
    %c0_i32_6 = arith.constant 0 : i32
    %26 = vector.broadcast %c0_i32_6 : i32 to vector<1x256xi32>
    %27 = arith.cmpi sge, %25, %26 : vector<1x256xi32>
    %c16_i32_7 = arith.constant 16 : i32
    %28 = vector.broadcast %c16_i32_7 : i32 to vector<1x256xi32>
    %29 = arith.cmpi slt, %25, %28 : vector<1x256xi32>
    %30 = arith.andi %27, %29 : vector<1x256xi1>
    %c16_i32_8 = arith.constant 16 : i32
    %31 = vector.broadcast %c16_i32_8 : i32 to vector<1x256xi32>
    %32 = arith.cmpi sge, %5, %31 : vector<1x256xi32>
    %c272_i32 = arith.constant 272 : i32
    %33 = vector.broadcast %c272_i32 : i32 to vector<1x256xi32>
    %34 = arith.cmpi slt, %5, %33 : vector<1x256xi32>
    %35 = arith.andi %32, %34 : vector<1x256xi1>
    %c-1_i32 = arith.constant -1 : i32
    %36 = vector.broadcast %c-1_i32 : i32 to vector<1x256xi32>
    %37 = arith.addi %6, %36 : vector<1x256xi32>
    %c0_i32_9 = arith.constant 0 : i32
    %38 = vector.broadcast %c0_i32_9 : i32 to vector<1x256xi32>
    %39 = arith.cmpi sge, %37, %38 : vector<1x256xi32>
    %c16_i32_10 = arith.constant 16 : i32
    %40 = vector.broadcast %c16_i32_10 : i32 to vector<1x256xi32>
    %41 = arith.cmpi slt, %37, %40 : vector<1x256xi32>
    %42 = arith.andi %39, %41 : vector<1x256xi1>
    %c0_i32_11 = arith.constant 0 : i32
    %43 = vector.broadcast %c0_i32_11 : i32 to vector<1x256xi32>
    %44 = arith.cmpi sge, %5, %43 : vector<1x256xi32>
    %c256_i32 = arith.constant 256 : i32
    %45 = vector.broadcast %c256_i32 : i32 to vector<1x256xi32>
    %46 = arith.cmpi slt, %5, %45 : vector<1x256xi32>
    %47 = arith.andi %44, %46 : vector<1x256xi1>
    %c0_i32_12 = arith.constant 0 : i32
    %48 = vector.broadcast %c0_i32_12 : i32 to vector<1x256xi32>
    %49 = arith.addi %6, %48 : vector<1x256xi32>
    %c0_i32_13 = arith.constant 0 : i32
    %50 = vector.broadcast %c0_i32_13 : i32 to vector<1x256xi32>
    %51 = arith.cmpi sge, %49, %50 : vector<1x256xi32>
    %c16_i32_14 = arith.constant 16 : i32
    %52 = vector.broadcast %c16_i32_14 : i32 to vector<1x256xi32>
    %53 = arith.cmpi slt, %49, %52 : vector<1x256xi32>
    %54 = arith.andi %51, %53 : vector<1x256xi1>
    %c-16_i32 = arith.constant -16 : i32
    %55 = vector.broadcast %c-16_i32 : i32 to vector<1x256xi32>
    %56 = arith.cmpi sge, %5, %55 : vector<1x256xi32>
    %c240_i32 = arith.constant 240 : i32
    %57 = vector.broadcast %c240_i32 : i32 to vector<1x256xi32>
    %58 = arith.cmpi slt, %5, %57 : vector<1x256xi32>
    %59 = arith.andi %56, %58 : vector<1x256xi1>
    %c1_i32 = arith.constant 1 : i32
    %60 = vector.broadcast %c1_i32 : i32 to vector<1x256xi32>
    %61 = arith.addi %6, %60 : vector<1x256xi32>
    %c0_i32_15 = arith.constant 0 : i32
    %62 = vector.broadcast %c0_i32_15 : i32 to vector<1x256xi32>
    %63 = arith.cmpi sge, %61, %62 : vector<1x256xi32>
    %c16_i32_16 = arith.constant 16 : i32
    %64 = vector.broadcast %c16_i32_16 : i32 to vector<1x256xi32>
    %65 = arith.cmpi slt, %61, %64 : vector<1x256xi32>
    %66 = arith.andi %63, %65 : vector<1x256xi1>
    %c-32_i32 = arith.constant -32 : i32
    %67 = vector.broadcast %c-32_i32 : i32 to vector<1x256xi32>
    %68 = arith.cmpi sge, %5, %67 : vector<1x256xi32>
    %c224_i32 = arith.constant 224 : i32
    %69 = vector.broadcast %c224_i32 : i32 to vector<1x256xi32>
    %70 = arith.cmpi slt, %5, %69 : vector<1x256xi32>
    %71 = arith.andi %68, %70 : vector<1x256xi1>
    %c2_i32 = arith.constant 2 : i32
    %72 = vector.broadcast %c2_i32 : i32 to vector<1x256xi32>
    %73 = arith.addi %6, %72 : vector<1x256xi32>
    %c0_i32_17 = arith.constant 0 : i32
    %74 = vector.broadcast %c0_i32_17 : i32 to vector<1x256xi32>
    %75 = arith.cmpi sge, %73, %74 : vector<1x256xi32>
    %c16_i32_18 = arith.constant 16 : i32
    %76 = vector.broadcast %c16_i32_18 : i32 to vector<1x256xi32>
    %77 = arith.cmpi slt, %73, %76 : vector<1x256xi32>
    %78 = arith.andi %75, %77 : vector<1x256xi1>
    %c-48_i32 = arith.constant -48 : i32
    %79 = vector.broadcast %c-48_i32 : i32 to vector<1x256xi32>
    %80 = arith.cmpi sge, %5, %79 : vector<1x256xi32>
    %c208_i32 = arith.constant 208 : i32
    %81 = vector.broadcast %c208_i32 : i32 to vector<1x256xi32>
    %82 = arith.cmpi slt, %5, %81 : vector<1x256xi32>
    %83 = arith.andi %80, %82 : vector<1x256xi1>
    %c3_i32 = arith.constant 3 : i32
    %84 = vector.broadcast %c3_i32 : i32 to vector<1x256xi32>
    %85 = arith.addi %6, %84 : vector<1x256xi32>
    %c0_i32_19 = arith.constant 0 : i32
    %86 = vector.broadcast %c0_i32_19 : i32 to vector<1x256xi32>
    %87 = arith.cmpi sge, %85, %86 : vector<1x256xi32>
    %c16_i32_20 = arith.constant 16 : i32
    %88 = vector.broadcast %c16_i32_20 : i32 to vector<1x256xi32>
    %89 = arith.cmpi slt, %85, %88 : vector<1x256xi32>
    %90 = arith.andi %87, %89 : vector<1x256xi1>
    %cst_21 = arith.constant 0.000000e+00 : f32
    %91 = vector.broadcast %cst_21 : f32 to vector<2x256xf32>
    %c51_i32 = arith.constant 51 : i32
    %92 = tpu.dynamic_rotate %1 by %c51_i32 dim 1 : vector<2x256xf32>, i32 -> vector<2x256xf32>
    %c51_i32_22 = arith.constant 51 : i32
    %93 = tpu.dynamic_rotate %4 by %c51_i32_22 dim 1 : vector<2x256xf32>, i32 -> vector<2x256xf32>
    %c0_23 = arith.constant 0 : index
    %94 = memref.load %arg2[%c0_23] : memref<98xf32, #tpu.memory_space<smem>>
    %c49 = arith.constant 49 : index
    %95 = memref.load %arg2[%c49] : memref<98xf32, #tpu.memory_space<smem>>
    %96 = arith.andi %11, %18 : vector<1x256xi1>
    %97 = vector.broadcast %94 : f32 to vector<2x256xf32>
    %98 = arith.mulf %97, %92 : vector<2x256xf32>
    %99 = vector.broadcast %95 : f32 to vector<2x256xf32>
    %100 = arith.mulf %99, %93 : vector<2x256xf32>
    %101 = arith.addf %98, %100 : vector<2x256xf32>
    %cst_24 = arith.constant 0.000000e+00 : f32
    %102 = vector.shape_cast %96 : vector<1x256xi1> to vector<1x256xi1>
    %103 = vector.broadcast %102 : vector<1x256xi1> to vector<2x256xi1>
    %104 = vector.broadcast %cst_24 : f32 to vector<2x256xf32>
    %105 = arith.select %103, %101, %104 : vector<2x256xi1>, vector<2x256xf32>
    %106 = arith.addf %91, %105 : vector<2x256xf32>
    %c50_i32 = arith.constant 50 : i32
    %107 = tpu.dynamic_rotate %1 by %c50_i32 dim 1 : vector<2x256xf32>, i32 -> vector<2x256xf32>
    %c50_i32_25 = arith.constant 50 : i32
    %108 = tpu.dynamic_rotate %4 by %c50_i32_25 dim 1 : vector<2x256xf32>, i32 -> vector<2x256xf32>
    %c1 = arith.constant 1 : index
    %109 = memref.load %arg2[%c1] : memref<98xf32, #tpu.memory_space<smem>>
    %c50 = arith.constant 50 : index
    %110 = memref.load %arg2[%c50] : memref<98xf32, #tpu.memory_space<smem>>
    %111 = arith.andi %11, %30 : vector<1x256xi1>
    %112 = vector.broadcast %109 : f32 to vector<2x256xf32>
    %113 = arith.mulf %112, %107 : vector<2x256xf32>
    %114 = vector.broadcast %110 : f32 to vector<2x256xf32>
    %115 = arith.mulf %114, %108 : vector<2x256xf32>
    %116 = arith.addf %113, %115 : vector<2x256xf32>
    %cst_26 = arith.constant 0.000000e+00 : f32
    %117 = vector.shape_cast %111 : vector<1x256xi1> to vector<1x256xi1>
    %118 = vector.broadcast %117 : vector<1x256xi1> to vector<2x256xi1>
    %119 = vector.broadcast %cst_26 : f32 to vector<2x256xf32>
    %120 = arith.select %118, %116, %119 : vector<2x256xi1>, vector<2x256xf32>
    %121 = arith.addf %106, %120 : vector<2x256xf32>
    %c49_i32 = arith.constant 49 : i32
    %122 = tpu.dynamic_rotate %1 by %c49_i32 dim 1 : vector<2x256xf32>, i32 -> vector<2x256xf32>
    %c49_i32_27 = arith.constant 49 : i32
    %123 = tpu.dynamic_rotate %4 by %c49_i32_27 dim 1 : vector<2x256xf32>, i32 -> vector<2x256xf32>
    %c2 = arith.constant 2 : index
    %124 = memref.load %arg2[%c2] : memref<98xf32, #tpu.memory_space<smem>>
    %c51 = arith.constant 51 : index
    %125 = memref.load %arg2[%c51] : memref<98xf32, #tpu.memory_space<smem>>
    %126 = arith.andi %11, %42 : vector<1x256xi1>
    %127 = vector.broadcast %124 : f32 to vector<2x256xf32>
    %128 = arith.mulf %127, %122 : vector<2x256xf32>
    %129 = vector.broadcast %125 : f32 to vector<2x256xf32>
    %130 = arith.mulf %129, %123 : vector<2x256xf32>
    %131 = arith.addf %128, %130 : vector<2x256xf32>
    %cst_28 = arith.constant 0.000000e+00 : f32
    %132 = vector.shape_cast %126 : vector<1x256xi1> to vector<1x256xi1>
    %133 = vector.broadcast %132 : vector<1x256xi1> to vector<2x256xi1>
    %134 = vector.broadcast %cst_28 : f32 to vector<2x256xf32>
    %135 = arith.select %133, %131, %134 : vector<2x256xi1>, vector<2x256xf32>
    %136 = arith.addf %121, %135 : vector<2x256xf32>
    %c48_i32_29 = arith.constant 48 : i32
    %137 = tpu.dynamic_rotate %1 by %c48_i32_29 dim 1 : vector<2x256xf32>, i32 -> vector<2x256xf32>
    %c48_i32_30 = arith.constant 48 : i32
    %138 = tpu.dynamic_rotate %4 by %c48_i32_30 dim 1 : vector<2x256xf32>, i32 -> vector<2x256xf32>
    %c3 = arith.constant 3 : index
    %139 = memref.load %arg2[%c3] : memref<98xf32, #tpu.memory_space<smem>>
    %c52 = arith.constant 52 : index
    %140 = memref.load %arg2[%c52] : memref<98xf32, #tpu.memory_space<smem>>
    %141 = arith.andi %11, %54 : vector<1x256xi1>
    %142 = vector.broadcast %139 : f32 to vector<2x256xf32>
    %143 = arith.mulf %142, %137 : vector<2x256xf32>
    %144 = vector.broadcast %140 : f32 to vector<2x256xf32>
    %145 = arith.mulf %144, %138 : vector<2x256xf32>
    %146 = arith.addf %143, %145 : vector<2x256xf32>
    %cst_31 = arith.constant 0.000000e+00 : f32
    %147 = vector.shape_cast %141 : vector<1x256xi1> to vector<1x256xi1>
    %148 = vector.broadcast %147 : vector<1x256xi1> to vector<2x256xi1>
    %149 = vector.broadcast %cst_31 : f32 to vector<2x256xf32>
    %150 = arith.select %148, %146, %149 : vector<2x256xi1>, vector<2x256xf32>
    %151 = arith.addf %136, %150 : vector<2x256xf32>
    %c47_i32 = arith.constant 47 : i32
    %152 = tpu.dynamic_rotate %1 by %c47_i32 dim 1 : vector<2x256xf32>, i32 -> vector<2x256xf32>
    %c47_i32_32 = arith.constant 47 : i32
    %153 = tpu.dynamic_rotate %4 by %c47_i32_32 dim 1 : vector<2x256xf32>, i32 -> vector<2x256xf32>
    %c4 = arith.constant 4 : index
    %154 = memref.load %arg2[%c4] : memref<98xf32, #tpu.memory_space<smem>>
    %c53 = arith.constant 53 : index
    %155 = memref.load %arg2[%c53] : memref<98xf32, #tpu.memory_space<smem>>
    %156 = arith.andi %11, %66 : vector<1x256xi1>
    %157 = vector.broadcast %154 : f32 to vector<2x256xf32>
    %158 = arith.mulf %157, %152 : vector<2x256xf32>
    %159 = vector.broadcast %155 : f32 to vector<2x256xf32>
    %160 = arith.mulf %159, %153 : vector<2x256xf32>
    %161 = arith.addf %158, %160 : vector<2x256xf32>
    %cst_33 = arith.constant 0.000000e+00 : f32
    %162 = vector.shape_cast %156 : vector<1x256xi1> to vector<1x256xi1>
    %163 = vector.broadcast %162 : vector<1x256xi1> to vector<2x256xi1>
    %164 = vector.broadcast %cst_33 : f32 to vector<2x256xf32>
    %165 = arith.select %163, %161, %164 : vector<2x256xi1>, vector<2x256xf32>
    %166 = arith.addf %151, %165 : vector<2x256xf32>
    %c46_i32 = arith.constant 46 : i32
    %167 = tpu.dynamic_rotate %1 by %c46_i32 dim 1 : vector<2x256xf32>, i32 -> vector<2x256xf32>
    %c46_i32_34 = arith.constant 46 : i32
    %168 = tpu.dynamic_rotate %4 by %c46_i32_34 dim 1 : vector<2x256xf32>, i32 -> vector<2x256xf32>
    %c5 = arith.constant 5 : index
    %169 = memref.load %arg2[%c5] : memref<98xf32, #tpu.memory_space<smem>>
    %c54 = arith.constant 54 : index
    %170 = memref.load %arg2[%c54] : memref<98xf32, #tpu.memory_space<smem>>
    %171 = arith.andi %11, %78 : vector<1x256xi1>
    %172 = vector.broadcast %169 : f32 to vector<2x256xf32>
    %173 = arith.mulf %172, %167 : vector<2x256xf32>
    %174 = vector.broadcast %170 : f32 to vector<2x256xf32>
    %175 = arith.mulf %174, %168 : vector<2x256xf32>
    %176 = arith.addf %173, %175 : vector<2x256xf32>
    %cst_35 = arith.constant 0.000000e+00 : f32
    %177 = vector.shape_cast %171 : vector<1x256xi1> to vector<1x256xi1>
    %178 = vector.broadcast %177 : vector<1x256xi1> to vector<2x256xi1>
    %179 = vector.broadcast %cst_35 : f32 to vector<2x256xf32>
    %180 = arith.select %178, %176, %179 : vector<2x256xi1>, vector<2x256xf32>
    %181 = arith.addf %166, %180 : vector<2x256xf32>
    %c45_i32 = arith.constant 45 : i32
    %182 = tpu.dynamic_rotate %1 by %c45_i32 dim 1 : vector<2x256xf32>, i32 -> vector<2x256xf32>
    %c45_i32_36 = arith.constant 45 : i32
    %183 = tpu.dynamic_rotate %4 by %c45_i32_36 dim 1 : vector<2x256xf32>, i32 -> vector<2x256xf32>
    %c6 = arith.constant 6 : index
    %184 = memref.load %arg2[%c6] : memref<98xf32, #tpu.memory_space<smem>>
    %c55 = arith.constant 55 : index
    %185 = memref.load %arg2[%c55] : memref<98xf32, #tpu.memory_space<smem>>
    %186 = arith.andi %11, %90 : vector<1x256xi1>
    %187 = vector.broadcast %184 : f32 to vector<2x256xf32>
    %188 = arith.mulf %187, %182 : vector<2x256xf32>
    %189 = vector.broadcast %185 : f32 to vector<2x256xf32>
    %190 = arith.mulf %189, %183 : vector<2x256xf32>
    %191 = arith.addf %188, %190 : vector<2x256xf32>
    %cst_37 = arith.constant 0.000000e+00 : f32
    %192 = vector.shape_cast %186 : vector<1x256xi1> to vector<1x256xi1>
    %193 = vector.broadcast %192 : vector<1x256xi1> to vector<2x256xi1>
    %194 = vector.broadcast %cst_37 : f32 to vector<2x256xf32>
    %195 = arith.select %193, %191, %194 : vector<2x256xi1>, vector<2x256xf32>
    %196 = arith.addf %181, %195 : vector<2x256xf32>
    %c35_i32 = arith.constant 35 : i32
    %197 = tpu.dynamic_rotate %1 by %c35_i32 dim 1 : vector<2x256xf32>, i32 -> vector<2x256xf32>
    %c35_i32_38 = arith.constant 35 : i32
    %198 = tpu.dynamic_rotate %4 by %c35_i32_38 dim 1 : vector<2x256xf32>, i32 -> vector<2x256xf32>
    %c7 = arith.constant 7 : index
    %199 = memref.load %arg2[%c7] : memref<98xf32, #tpu.memory_space<smem>>
    %c56 = arith.constant 56 : index
    %200 = memref.load %arg2[%c56] : memref<98xf32, #tpu.memory_space<smem>>
    %201 = arith.andi %23, %18 : vector<1x256xi1>
    %202 = vector.broadcast %199 : f32 to vector<2x256xf32>
    %203 = arith.mulf %202, %197 : vector<2x256xf32>
    %204 = vector.broadcast %200 : f32 to vector<2x256xf32>
    %205 = arith.mulf %204, %198 : vector<2x256xf32>
    %206 = arith.addf %203, %205 : vector<2x256xf32>
    %cst_39 = arith.constant 0.000000e+00 : f32
    %207 = vector.shape_cast %201 : vector<1x256xi1> to vector<1x256xi1>
    %208 = vector.broadcast %207 : vector<1x256xi1> to vector<2x256xi1>
    %209 = vector.broadcast %cst_39 : f32 to vector<2x256xf32>
    %210 = arith.select %208, %206, %209 : vector<2x256xi1>, vector<2x256xf32>
    %211 = arith.addf %196, %210 : vector<2x256xf32>
    %c34_i32 = arith.constant 34 : i32
    %212 = tpu.dynamic_rotate %1 by %c34_i32 dim 1 : vector<2x256xf32>, i32 -> vector<2x256xf32>
    %c34_i32_40 = arith.constant 34 : i32
    %213 = tpu.dynamic_rotate %4 by %c34_i32_40 dim 1 : vector<2x256xf32>, i32 -> vector<2x256xf32>
    %c8 = arith.constant 8 : index
    %214 = memref.load %arg2[%c8] : memref<98xf32, #tpu.memory_space<smem>>
    %c57 = arith.constant 57 : index
    %215 = memref.load %arg2[%c57] : memref<98xf32, #tpu.memory_space<smem>>
    %216 = arith.andi %23, %30 : vector<1x256xi1>
    %217 = vector.broadcast %214 : f32 to vector<2x256xf32>
    %218 = arith.mulf %217, %212 : vector<2x256xf32>
    %219 = vector.broadcast %215 : f32 to vector<2x256xf32>
    %220 = arith.mulf %219, %213 : vector<2x256xf32>
    %221 = arith.addf %218, %220 : vector<2x256xf32>
    %cst_41 = arith.constant 0.000000e+00 : f32
    %222 = vector.shape_cast %216 : vector<1x256xi1> to vector<1x256xi1>
    %223 = vector.broadcast %222 : vector<1x256xi1> to vector<2x256xi1>
    %224 = vector.broadcast %cst_41 : f32 to vector<2x256xf32>
    %225 = arith.select %223, %221, %224 : vector<2x256xi1>, vector<2x256xf32>
    %226 = arith.addf %211, %225 : vector<2x256xf32>
    %c33_i32 = arith.constant 33 : i32
    %227 = tpu.dynamic_rotate %1 by %c33_i32 dim 1 : vector<2x256xf32>, i32 -> vector<2x256xf32>
    %c33_i32_42 = arith.constant 33 : i32
    %228 = tpu.dynamic_rotate %4 by %c33_i32_42 dim 1 : vector<2x256xf32>, i32 -> vector<2x256xf32>
    %c9 = arith.constant 9 : index
    %229 = memref.load %arg2[%c9] : memref<98xf32, #tpu.memory_space<smem>>
    %c58 = arith.constant 58 : index
    %230 = memref.load %arg2[%c58] : memref<98xf32, #tpu.memory_space<smem>>
    %231 = arith.andi %23, %42 : vector<1x256xi1>
    %232 = vector.broadcast %229 : f32 to vector<2x256xf32>
    %233 = arith.mulf %232, %227 : vector<2x256xf32>
    %234 = vector.broadcast %230 : f32 to vector<2x256xf32>
    %235 = arith.mulf %234, %228 : vector<2x256xf32>
    %236 = arith.addf %233, %235 : vector<2x256xf32>
    %cst_43 = arith.constant 0.000000e+00 : f32
    %237 = vector.shape_cast %231 : vector<1x256xi1> to vector<1x256xi1>
    %238 = vector.broadcast %237 : vector<1x256xi1> to vector<2x256xi1>
    %239 = vector.broadcast %cst_43 : f32 to vector<2x256xf32>
    %240 = arith.select %238, %236, %239 : vector<2x256xi1>, vector<2x256xf32>
    %241 = arith.addf %226, %240 : vector<2x256xf32>
    %c32_i32_44 = arith.constant 32 : i32
    %242 = tpu.dynamic_rotate %1 by %c32_i32_44 dim 1 : vector<2x256xf32>, i32 -> vector<2x256xf32>
    %c32_i32_45 = arith.constant 32 : i32
    %243 = tpu.dynamic_rotate %4 by %c32_i32_45 dim 1 : vector<2x256xf32>, i32 -> vector<2x256xf32>
    %c10 = arith.constant 10 : index
    %244 = memref.load %arg2[%c10] : memref<98xf32, #tpu.memory_space<smem>>
    %c59 = arith.constant 59 : index
    %245 = memref.load %arg2[%c59] : memref<98xf32, #tpu.memory_space<smem>>
    %246 = arith.andi %23, %54 : vector<1x256xi1>
    %247 = vector.broadcast %244 : f32 to vector<2x256xf32>
    %248 = arith.mulf %247, %242 : vector<2x256xf32>
    %249 = vector.broadcast %245 : f32 to vector<2x256xf32>
    %250 = arith.mulf %249, %243 : vector<2x256xf32>
    %251 = arith.addf %248, %250 : vector<2x256xf32>
    %cst_46 = arith.constant 0.000000e+00 : f32
    %252 = vector.shape_cast %246 : vector<1x256xi1> to vector<1x256xi1>
    %253 = vector.broadcast %252 : vector<1x256xi1> to vector<2x256xi1>
    %254 = vector.broadcast %cst_46 : f32 to vector<2x256xf32>
    %255 = arith.select %253, %251, %254 : vector<2x256xi1>, vector<2x256xf32>
    %256 = arith.addf %241, %255 : vector<2x256xf32>
    %c31_i32 = arith.constant 31 : i32
    %257 = tpu.dynamic_rotate %1 by %c31_i32 dim 1 : vector<2x256xf32>, i32 -> vector<2x256xf32>
    %c31_i32_47 = arith.constant 31 : i32
    %258 = tpu.dynamic_rotate %4 by %c31_i32_47 dim 1 : vector<2x256xf32>, i32 -> vector<2x256xf32>
    %c11 = arith.constant 11 : index
    %259 = memref.load %arg2[%c11] : memref<98xf32, #tpu.memory_space<smem>>
    %c60 = arith.constant 60 : index
    %260 = memref.load %arg2[%c60] : memref<98xf32, #tpu.memory_space<smem>>
    %261 = arith.andi %23, %66 : vector<1x256xi1>
    %262 = vector.broadcast %259 : f32 to vector<2x256xf32>
    %263 = arith.mulf %262, %257 : vector<2x256xf32>
    %264 = vector.broadcast %260 : f32 to vector<2x256xf32>
    %265 = arith.mulf %264, %258 : vector<2x256xf32>
    %266 = arith.addf %263, %265 : vector<2x256xf32>
    %cst_48 = arith.constant 0.000000e+00 : f32
    %267 = vector.shape_cast %261 : vector<1x256xi1> to vector<1x256xi1>
    %268 = vector.broadcast %267 : vector<1x256xi1> to vector<2x256xi1>
    %269 = vector.broadcast %cst_48 : f32 to vector<2x256xf32>
    %270 = arith.select %268, %266, %269 : vector<2x256xi1>, vector<2x256xf32>
    %271 = arith.addf %256, %270 : vector<2x256xf32>
    %c30_i32 = arith.constant 30 : i32
    %272 = tpu.dynamic_rotate %1 by %c30_i32 dim 1 : vector<2x256xf32>, i32 -> vector<2x256xf32>
    %c30_i32_49 = arith.constant 30 : i32
    %273 = tpu.dynamic_rotate %4 by %c30_i32_49 dim 1 : vector<2x256xf32>, i32 -> vector<2x256xf32>
    %c12 = arith.constant 12 : index
    %274 = memref.load %arg2[%c12] : memref<98xf32, #tpu.memory_space<smem>>
    %c61 = arith.constant 61 : index
    %275 = memref.load %arg2[%c61] : memref<98xf32, #tpu.memory_space<smem>>
    %276 = arith.andi %23, %78 : vector<1x256xi1>
    %277 = vector.broadcast %274 : f32 to vector<2x256xf32>
    %278 = arith.mulf %277, %272 : vector<2x256xf32>
    %279 = vector.broadcast %275 : f32 to vector<2x256xf32>
    %280 = arith.mulf %279, %273 : vector<2x256xf32>
    %281 = arith.addf %278, %280 : vector<2x256xf32>
    %cst_50 = arith.constant 0.000000e+00 : f32
    %282 = vector.shape_cast %276 : vector<1x256xi1> to vector<1x256xi1>
    %283 = vector.broadcast %282 : vector<1x256xi1> to vector<2x256xi1>
    %284 = vector.broadcast %cst_50 : f32 to vector<2x256xf32>
    %285 = arith.select %283, %281, %284 : vector<2x256xi1>, vector<2x256xf32>
    %286 = arith.addf %271, %285 : vector<2x256xf32>
    %c29_i32 = arith.constant 29 : i32
    %287 = tpu.dynamic_rotate %1 by %c29_i32 dim 1 : vector<2x256xf32>, i32 -> vector<2x256xf32>
    %c29_i32_51 = arith.constant 29 : i32
    %288 = tpu.dynamic_rotate %4 by %c29_i32_51 dim 1 : vector<2x256xf32>, i32 -> vector<2x256xf32>
    %c13 = arith.constant 13 : index
    %289 = memref.load %arg2[%c13] : memref<98xf32, #tpu.memory_space<smem>>
    %c62 = arith.constant 62 : index
    %290 = memref.load %arg2[%c62] : memref<98xf32, #tpu.memory_space<smem>>
    %291 = arith.andi %23, %90 : vector<1x256xi1>
    %292 = vector.broadcast %289 : f32 to vector<2x256xf32>
    %293 = arith.mulf %292, %287 : vector<2x256xf32>
    %294 = vector.broadcast %290 : f32 to vector<2x256xf32>
    %295 = arith.mulf %294, %288 : vector<2x256xf32>
    %296 = arith.addf %293, %295 : vector<2x256xf32>
    %cst_52 = arith.constant 0.000000e+00 : f32
    %297 = vector.shape_cast %291 : vector<1x256xi1> to vector<1x256xi1>
    %298 = vector.broadcast %297 : vector<1x256xi1> to vector<2x256xi1>
    %299 = vector.broadcast %cst_52 : f32 to vector<2x256xf32>
    %300 = arith.select %298, %296, %299 : vector<2x256xi1>, vector<2x256xf32>
    %301 = arith.addf %286, %300 : vector<2x256xf32>
    %c19_i32 = arith.constant 19 : i32
    %302 = tpu.dynamic_rotate %1 by %c19_i32 dim 1 : vector<2x256xf32>, i32 -> vector<2x256xf32>
    %c19_i32_53 = arith.constant 19 : i32
    %303 = tpu.dynamic_rotate %4 by %c19_i32_53 dim 1 : vector<2x256xf32>, i32 -> vector<2x256xf32>
    %c14 = arith.constant 14 : index
    %304 = memref.load %arg2[%c14] : memref<98xf32, #tpu.memory_space<smem>>
    %c63 = arith.constant 63 : index
    %305 = memref.load %arg2[%c63] : memref<98xf32, #tpu.memory_space<smem>>
    %306 = arith.andi %35, %18 : vector<1x256xi1>
    %307 = vector.broadcast %304 : f32 to vector<2x256xf32>
    %308 = arith.mulf %307, %302 : vector<2x256xf32>
    %309 = vector.broadcast %305 : f32 to vector<2x256xf32>
    %310 = arith.mulf %309, %303 : vector<2x256xf32>
    %311 = arith.addf %308, %310 : vector<2x256xf32>
    %cst_54 = arith.constant 0.000000e+00 : f32
    %312 = vector.shape_cast %306 : vector<1x256xi1> to vector<1x256xi1>
    %313 = vector.broadcast %312 : vector<1x256xi1> to vector<2x256xi1>
    %314 = vector.broadcast %cst_54 : f32 to vector<2x256xf32>
    %315 = arith.select %313, %311, %314 : vector<2x256xi1>, vector<2x256xf32>
    %316 = arith.addf %301, %315 : vector<2x256xf32>
    %c18_i32 = arith.constant 18 : i32
    %317 = tpu.dynamic_rotate %1 by %c18_i32 dim 1 : vector<2x256xf32>, i32 -> vector<2x256xf32>
    %c18_i32_55 = arith.constant 18 : i32
    %318 = tpu.dynamic_rotate %4 by %c18_i32_55 dim 1 : vector<2x256xf32>, i32 -> vector<2x256xf32>
    %c15 = arith.constant 15 : index
    %319 = memref.load %arg2[%c15] : memref<98xf32, #tpu.memory_space<smem>>
    %c64 = arith.constant 64 : index
    %320 = memref.load %arg2[%c64] : memref<98xf32, #tpu.memory_space<smem>>
    %321 = arith.andi %35, %30 : vector<1x256xi1>
    %322 = vector.broadcast %319 : f32 to vector<2x256xf32>
    %323 = arith.mulf %322, %317 : vector<2x256xf32>
    %324 = vector.broadcast %320 : f32 to vector<2x256xf32>
    %325 = arith.mulf %324, %318 : vector<2x256xf32>
    %326 = arith.addf %323, %325 : vector<2x256xf32>
    %cst_56 = arith.constant 0.000000e+00 : f32
    %327 = vector.shape_cast %321 : vector<1x256xi1> to vector<1x256xi1>
    %328 = vector.broadcast %327 : vector<1x256xi1> to vector<2x256xi1>
    %329 = vector.broadcast %cst_56 : f32 to vector<2x256xf32>
    %330 = arith.select %328, %326, %329 : vector<2x256xi1>, vector<2x256xf32>
    %331 = arith.addf %316, %330 : vector<2x256xf32>
    %c17_i32 = arith.constant 17 : i32
    %332 = tpu.dynamic_rotate %1 by %c17_i32 dim 1 : vector<2x256xf32>, i32 -> vector<2x256xf32>
    %c17_i32_57 = arith.constant 17 : i32
    %333 = tpu.dynamic_rotate %4 by %c17_i32_57 dim 1 : vector<2x256xf32>, i32 -> vector<2x256xf32>
    %c16 = arith.constant 16 : index
    %334 = memref.load %arg2[%c16] : memref<98xf32, #tpu.memory_space<smem>>
    %c65 = arith.constant 65 : index
    %335 = memref.load %arg2[%c65] : memref<98xf32, #tpu.memory_space<smem>>
    %336 = arith.andi %35, %42 : vector<1x256xi1>
    %337 = vector.broadcast %334 : f32 to vector<2x256xf32>
    %338 = arith.mulf %337, %332 : vector<2x256xf32>
    %339 = vector.broadcast %335 : f32 to vector<2x256xf32>
    %340 = arith.mulf %339, %333 : vector<2x256xf32>
    %341 = arith.addf %338, %340 : vector<2x256xf32>
    %cst_58 = arith.constant 0.000000e+00 : f32
    %342 = vector.shape_cast %336 : vector<1x256xi1> to vector<1x256xi1>
    %343 = vector.broadcast %342 : vector<1x256xi1> to vector<2x256xi1>
    %344 = vector.broadcast %cst_58 : f32 to vector<2x256xf32>
    %345 = arith.select %343, %341, %344 : vector<2x256xi1>, vector<2x256xf32>
    %346 = arith.addf %331, %345 : vector<2x256xf32>
    %c16_i32_59 = arith.constant 16 : i32
    %347 = tpu.dynamic_rotate %1 by %c16_i32_59 dim 1 : vector<2x256xf32>, i32 -> vector<2x256xf32>
    %c16_i32_60 = arith.constant 16 : i32
    %348 = tpu.dynamic_rotate %4 by %c16_i32_60 dim 1 : vector<2x256xf32>, i32 -> vector<2x256xf32>
    %c17 = arith.constant 17 : index
    %349 = memref.load %arg2[%c17] : memref<98xf32, #tpu.memory_space<smem>>
    %c66 = arith.constant 66 : index
    %350 = memref.load %arg2[%c66] : memref<98xf32, #tpu.memory_space<smem>>
    %351 = arith.andi %35, %54 : vector<1x256xi1>
    %352 = vector.broadcast %349 : f32 to vector<2x256xf32>
    %353 = arith.mulf %352, %347 : vector<2x256xf32>
    %354 = vector.broadcast %350 : f32 to vector<2x256xf32>
    %355 = arith.mulf %354, %348 : vector<2x256xf32>
    %356 = arith.addf %353, %355 : vector<2x256xf32>
    %cst_61 = arith.constant 0.000000e+00 : f32
    %357 = vector.shape_cast %351 : vector<1x256xi1> to vector<1x256xi1>
    %358 = vector.broadcast %357 : vector<1x256xi1> to vector<2x256xi1>
    %359 = vector.broadcast %cst_61 : f32 to vector<2x256xf32>
    %360 = arith.select %358, %356, %359 : vector<2x256xi1>, vector<2x256xf32>
    %361 = arith.addf %346, %360 : vector<2x256xf32>
    %c15_i32 = arith.constant 15 : i32
    %362 = tpu.dynamic_rotate %1 by %c15_i32 dim 1 : vector<2x256xf32>, i32 -> vector<2x256xf32>
    %c15_i32_62 = arith.constant 15 : i32
    %363 = tpu.dynamic_rotate %4 by %c15_i32_62 dim 1 : vector<2x256xf32>, i32 -> vector<2x256xf32>
    %c18 = arith.constant 18 : index
    %364 = memref.load %arg2[%c18] : memref<98xf32, #tpu.memory_space<smem>>
    %c67 = arith.constant 67 : index
    %365 = memref.load %arg2[%c67] : memref<98xf32, #tpu.memory_space<smem>>
    %366 = arith.andi %35, %66 : vector<1x256xi1>
    %367 = vector.broadcast %364 : f32 to vector<2x256xf32>
    %368 = arith.mulf %367, %362 : vector<2x256xf32>
    %369 = vector.broadcast %365 : f32 to vector<2x256xf32>
    %370 = arith.mulf %369, %363 : vector<2x256xf32>
    %371 = arith.addf %368, %370 : vector<2x256xf32>
    %cst_63 = arith.constant 0.000000e+00 : f32
    %372 = vector.shape_cast %366 : vector<1x256xi1> to vector<1x256xi1>
    %373 = vector.broadcast %372 : vector<1x256xi1> to vector<2x256xi1>
    %374 = vector.broadcast %cst_63 : f32 to vector<2x256xf32>
    %375 = arith.select %373, %371, %374 : vector<2x256xi1>, vector<2x256xf32>
    %376 = arith.addf %361, %375 : vector<2x256xf32>
    %c14_i32 = arith.constant 14 : i32
    %377 = tpu.dynamic_rotate %1 by %c14_i32 dim 1 : vector<2x256xf32>, i32 -> vector<2x256xf32>
    %c14_i32_64 = arith.constant 14 : i32
    %378 = tpu.dynamic_rotate %4 by %c14_i32_64 dim 1 : vector<2x256xf32>, i32 -> vector<2x256xf32>
    %c19 = arith.constant 19 : index
    %379 = memref.load %arg2[%c19] : memref<98xf32, #tpu.memory_space<smem>>
    %c68 = arith.constant 68 : index
    %380 = memref.load %arg2[%c68] : memref<98xf32, #tpu.memory_space<smem>>
    %381 = arith.andi %35, %78 : vector<1x256xi1>
    %382 = vector.broadcast %379 : f32 to vector<2x256xf32>
    %383 = arith.mulf %382, %377 : vector<2x256xf32>
    %384 = vector.broadcast %380 : f32 to vector<2x256xf32>
    %385 = arith.mulf %384, %378 : vector<2x256xf32>
    %386 = arith.addf %383, %385 : vector<2x256xf32>
    %cst_65 = arith.constant 0.000000e+00 : f32
    %387 = vector.shape_cast %381 : vector<1x256xi1> to vector<1x256xi1>
    %388 = vector.broadcast %387 : vector<1x256xi1> to vector<2x256xi1>
    %389 = vector.broadcast %cst_65 : f32 to vector<2x256xf32>
    %390 = arith.select %388, %386, %389 : vector<2x256xi1>, vector<2x256xf32>
    %391 = arith.addf %376, %390 : vector<2x256xf32>
    %c13_i32 = arith.constant 13 : i32
    %392 = tpu.dynamic_rotate %1 by %c13_i32 dim 1 : vector<2x256xf32>, i32 -> vector<2x256xf32>
    %c13_i32_66 = arith.constant 13 : i32
    %393 = tpu.dynamic_rotate %4 by %c13_i32_66 dim 1 : vector<2x256xf32>, i32 -> vector<2x256xf32>
    %c20 = arith.constant 20 : index
    %394 = memref.load %arg2[%c20] : memref<98xf32, #tpu.memory_space<smem>>
    %c69 = arith.constant 69 : index
    %395 = memref.load %arg2[%c69] : memref<98xf32, #tpu.memory_space<smem>>
    %396 = arith.andi %35, %90 : vector<1x256xi1>
    %397 = vector.broadcast %394 : f32 to vector<2x256xf32>
    %398 = arith.mulf %397, %392 : vector<2x256xf32>
    %399 = vector.broadcast %395 : f32 to vector<2x256xf32>
    %400 = arith.mulf %399, %393 : vector<2x256xf32>
    %401 = arith.addf %398, %400 : vector<2x256xf32>
    %cst_67 = arith.constant 0.000000e+00 : f32
    %402 = vector.shape_cast %396 : vector<1x256xi1> to vector<1x256xi1>
    %403 = vector.broadcast %402 : vector<1x256xi1> to vector<2x256xi1>
    %404 = vector.broadcast %cst_67 : f32 to vector<2x256xf32>
    %405 = arith.select %403, %401, %404 : vector<2x256xi1>, vector<2x256xf32>
    %406 = arith.addf %391, %405 : vector<2x256xf32>
    %c3_i32_68 = arith.constant 3 : i32
    %407 = tpu.dynamic_rotate %1 by %c3_i32_68 dim 1 : vector<2x256xf32>, i32 -> vector<2x256xf32>
    %c3_i32_69 = arith.constant 3 : i32
    %408 = tpu.dynamic_rotate %4 by %c3_i32_69 dim 1 : vector<2x256xf32>, i32 -> vector<2x256xf32>
    %c21 = arith.constant 21 : index
    %409 = memref.load %arg2[%c21] : memref<98xf32, #tpu.memory_space<smem>>
    %c70 = arith.constant 70 : index
    %410 = memref.load %arg2[%c70] : memref<98xf32, #tpu.memory_space<smem>>
    %411 = arith.andi %47, %18 : vector<1x256xi1>
    %412 = vector.broadcast %409 : f32 to vector<2x256xf32>
    %413 = arith.mulf %412, %407 : vector<2x256xf32>
    %414 = vector.broadcast %410 : f32 to vector<2x256xf32>
    %415 = arith.mulf %414, %408 : vector<2x256xf32>
    %416 = arith.addf %413, %415 : vector<2x256xf32>
    %cst_70 = arith.constant 0.000000e+00 : f32
    %417 = vector.shape_cast %411 : vector<1x256xi1> to vector<1x256xi1>
    %418 = vector.broadcast %417 : vector<1x256xi1> to vector<2x256xi1>
    %419 = vector.broadcast %cst_70 : f32 to vector<2x256xf32>
    %420 = arith.select %418, %416, %419 : vector<2x256xi1>, vector<2x256xf32>
    %421 = arith.addf %406, %420 : vector<2x256xf32>
    %c2_i32_71 = arith.constant 2 : i32
    %422 = tpu.dynamic_rotate %1 by %c2_i32_71 dim 1 : vector<2x256xf32>, i32 -> vector<2x256xf32>
    %c2_i32_72 = arith.constant 2 : i32
    %423 = tpu.dynamic_rotate %4 by %c2_i32_72 dim 1 : vector<2x256xf32>, i32 -> vector<2x256xf32>
    %c22 = arith.constant 22 : index
    %424 = memref.load %arg2[%c22] : memref<98xf32, #tpu.memory_space<smem>>
    %c71 = arith.constant 71 : index
    %425 = memref.load %arg2[%c71] : memref<98xf32, #tpu.memory_space<smem>>
    %426 = arith.andi %47, %30 : vector<1x256xi1>
    %427 = vector.broadcast %424 : f32 to vector<2x256xf32>
    %428 = arith.mulf %427, %422 : vector<2x256xf32>
    %429 = vector.broadcast %425 : f32 to vector<2x256xf32>
    %430 = arith.mulf %429, %423 : vector<2x256xf32>
    %431 = arith.addf %428, %430 : vector<2x256xf32>
    %cst_73 = arith.constant 0.000000e+00 : f32
    %432 = vector.shape_cast %426 : vector<1x256xi1> to vector<1x256xi1>
    %433 = vector.broadcast %432 : vector<1x256xi1> to vector<2x256xi1>
    %434 = vector.broadcast %cst_73 : f32 to vector<2x256xf32>
    %435 = arith.select %433, %431, %434 : vector<2x256xi1>, vector<2x256xf32>
    %436 = arith.addf %421, %435 : vector<2x256xf32>
    %c1_i32_74 = arith.constant 1 : i32
    %437 = tpu.dynamic_rotate %1 by %c1_i32_74 dim 1 : vector<2x256xf32>, i32 -> vector<2x256xf32>
    %c1_i32_75 = arith.constant 1 : i32
    %438 = tpu.dynamic_rotate %4 by %c1_i32_75 dim 1 : vector<2x256xf32>, i32 -> vector<2x256xf32>
    %c23 = arith.constant 23 : index
    %439 = memref.load %arg2[%c23] : memref<98xf32, #tpu.memory_space<smem>>
    %c72 = arith.constant 72 : index
    %440 = memref.load %arg2[%c72] : memref<98xf32, #tpu.memory_space<smem>>
    %441 = arith.andi %47, %42 : vector<1x256xi1>
    %442 = vector.broadcast %439 : f32 to vector<2x256xf32>
    %443 = arith.mulf %442, %437 : vector<2x256xf32>
    %444 = vector.broadcast %440 : f32 to vector<2x256xf32>
    %445 = arith.mulf %444, %438 : vector<2x256xf32>
    %446 = arith.addf %443, %445 : vector<2x256xf32>
    %cst_76 = arith.constant 0.000000e+00 : f32
    %447 = vector.shape_cast %441 : vector<1x256xi1> to vector<1x256xi1>
    %448 = vector.broadcast %447 : vector<1x256xi1> to vector<2x256xi1>
    %449 = vector.broadcast %cst_76 : f32 to vector<2x256xf32>
    %450 = arith.select %448, %446, %449 : vector<2x256xi1>, vector<2x256xf32>
    %451 = arith.addf %436, %450 : vector<2x256xf32>
    %c0_i32_77 = arith.constant 0 : i32
    %452 = tpu.dynamic_rotate %1 by %c0_i32_77 dim 1 : vector<2x256xf32>, i32 -> vector<2x256xf32>
    %c0_i32_78 = arith.constant 0 : i32
    %453 = tpu.dynamic_rotate %4 by %c0_i32_78 dim 1 : vector<2x256xf32>, i32 -> vector<2x256xf32>
    %c24 = arith.constant 24 : index
    %454 = memref.load %arg2[%c24] : memref<98xf32, #tpu.memory_space<smem>>
    %c73 = arith.constant 73 : index
    %455 = memref.load %arg2[%c73] : memref<98xf32, #tpu.memory_space<smem>>
    %456 = arith.andi %47, %54 : vector<1x256xi1>
    %457 = vector.broadcast %454 : f32 to vector<2x256xf32>
    %458 = arith.mulf %457, %452 : vector<2x256xf32>
    %459 = vector.broadcast %455 : f32 to vector<2x256xf32>
    %460 = arith.mulf %459, %453 : vector<2x256xf32>
    %461 = arith.addf %458, %460 : vector<2x256xf32>
    %cst_79 = arith.constant 0.000000e+00 : f32
    %462 = vector.shape_cast %456 : vector<1x256xi1> to vector<1x256xi1>
    %463 = vector.broadcast %462 : vector<1x256xi1> to vector<2x256xi1>
    %464 = vector.broadcast %cst_79 : f32 to vector<2x256xf32>
    %465 = arith.select %463, %461, %464 : vector<2x256xi1>, vector<2x256xf32>
    %466 = arith.addf %451, %465 : vector<2x256xf32>
    %c255_i32 = arith.constant 255 : i32
    %467 = tpu.dynamic_rotate %1 by %c255_i32 dim 1 : vector<2x256xf32>, i32 -> vector<2x256xf32>
    %c255_i32_80 = arith.constant 255 : i32
    %468 = tpu.dynamic_rotate %4 by %c255_i32_80 dim 1 : vector<2x256xf32>, i32 -> vector<2x256xf32>
    %c25 = arith.constant 25 : index
    %469 = memref.load %arg2[%c25] : memref<98xf32, #tpu.memory_space<smem>>
    %c74 = arith.constant 74 : index
    %470 = memref.load %arg2[%c74] : memref<98xf32, #tpu.memory_space<smem>>
    %471 = arith.andi %47, %66 : vector<1x256xi1>
    %472 = vector.broadcast %469 : f32 to vector<2x256xf32>
    %473 = arith.mulf %472, %467 : vector<2x256xf32>
    %474 = vector.broadcast %470 : f32 to vector<2x256xf32>
    %475 = arith.mulf %474, %468 : vector<2x256xf32>
    %476 = arith.addf %473, %475 : vector<2x256xf32>
    %cst_81 = arith.constant 0.000000e+00 : f32
    %477 = vector.shape_cast %471 : vector<1x256xi1> to vector<1x256xi1>
    %478 = vector.broadcast %477 : vector<1x256xi1> to vector<2x256xi1>
    %479 = vector.broadcast %cst_81 : f32 to vector<2x256xf32>
    %480 = arith.select %478, %476, %479 : vector<2x256xi1>, vector<2x256xf32>
    %481 = arith.addf %466, %480 : vector<2x256xf32>
    %c254_i32 = arith.constant 254 : i32
    %482 = tpu.dynamic_rotate %1 by %c254_i32 dim 1 : vector<2x256xf32>, i32 -> vector<2x256xf32>
    %c254_i32_82 = arith.constant 254 : i32
    %483 = tpu.dynamic_rotate %4 by %c254_i32_82 dim 1 : vector<2x256xf32>, i32 -> vector<2x256xf32>
    %c26 = arith.constant 26 : index
    %484 = memref.load %arg2[%c26] : memref<98xf32, #tpu.memory_space<smem>>
    %c75 = arith.constant 75 : index
    %485 = memref.load %arg2[%c75] : memref<98xf32, #tpu.memory_space<smem>>
    %486 = arith.andi %47, %78 : vector<1x256xi1>
    %487 = vector.broadcast %484 : f32 to vector<2x256xf32>
    %488 = arith.mulf %487, %482 : vector<2x256xf32>
    %489 = vector.broadcast %485 : f32 to vector<2x256xf32>
    %490 = arith.mulf %489, %483 : vector<2x256xf32>
    %491 = arith.addf %488, %490 : vector<2x256xf32>
    %cst_83 = arith.constant 0.000000e+00 : f32
    %492 = vector.shape_cast %486 : vector<1x256xi1> to vector<1x256xi1>
    %493 = vector.broadcast %492 : vector<1x256xi1> to vector<2x256xi1>
    %494 = vector.broadcast %cst_83 : f32 to vector<2x256xf32>
    %495 = arith.select %493, %491, %494 : vector<2x256xi1>, vector<2x256xf32>
    %496 = arith.addf %481, %495 : vector<2x256xf32>
    %c253_i32 = arith.constant 253 : i32
    %497 = tpu.dynamic_rotate %1 by %c253_i32 dim 1 : vector<2x256xf32>, i32 -> vector<2x256xf32>
    %c253_i32_84 = arith.constant 253 : i32
    %498 = tpu.dynamic_rotate %4 by %c253_i32_84 dim 1 : vector<2x256xf32>, i32 -> vector<2x256xf32>
    %c27 = arith.constant 27 : index
    %499 = memref.load %arg2[%c27] : memref<98xf32, #tpu.memory_space<smem>>
    %c76 = arith.constant 76 : index
    %500 = memref.load %arg2[%c76] : memref<98xf32, #tpu.memory_space<smem>>
    %501 = arith.andi %47, %90 : vector<1x256xi1>
    %502 = vector.broadcast %499 : f32 to vector<2x256xf32>
    %503 = arith.mulf %502, %497 : vector<2x256xf32>
    %504 = vector.broadcast %500 : f32 to vector<2x256xf32>
    %505 = arith.mulf %504, %498 : vector<2x256xf32>
    %506 = arith.addf %503, %505 : vector<2x256xf32>
    %cst_85 = arith.constant 0.000000e+00 : f32
    %507 = vector.shape_cast %501 : vector<1x256xi1> to vector<1x256xi1>
    %508 = vector.broadcast %507 : vector<1x256xi1> to vector<2x256xi1>
    %509 = vector.broadcast %cst_85 : f32 to vector<2x256xf32>
    %510 = arith.select %508, %506, %509 : vector<2x256xi1>, vector<2x256xf32>
    %511 = arith.addf %496, %510 : vector<2x256xf32>
    %c243_i32 = arith.constant 243 : i32
    %512 = tpu.dynamic_rotate %1 by %c243_i32 dim 1 : vector<2x256xf32>, i32 -> vector<2x256xf32>
    %c243_i32_86 = arith.constant 243 : i32
    %513 = tpu.dynamic_rotate %4 by %c243_i32_86 dim 1 : vector<2x256xf32>, i32 -> vector<2x256xf32>
    %c28 = arith.constant 28 : index
    %514 = memref.load %arg2[%c28] : memref<98xf32, #tpu.memory_space<smem>>
    %c77 = arith.constant 77 : index
    %515 = memref.load %arg2[%c77] : memref<98xf32, #tpu.memory_space<smem>>
    %516 = arith.andi %59, %18 : vector<1x256xi1>
    %517 = vector.broadcast %514 : f32 to vector<2x256xf32>
    %518 = arith.mulf %517, %512 : vector<2x256xf32>
    %519 = vector.broadcast %515 : f32 to vector<2x256xf32>
    %520 = arith.mulf %519, %513 : vector<2x256xf32>
    %521 = arith.addf %518, %520 : vector<2x256xf32>
    %cst_87 = arith.constant 0.000000e+00 : f32
    %522 = vector.shape_cast %516 : vector<1x256xi1> to vector<1x256xi1>
    %523 = vector.broadcast %522 : vector<1x256xi1> to vector<2x256xi1>
    %524 = vector.broadcast %cst_87 : f32 to vector<2x256xf32>
    %525 = arith.select %523, %521, %524 : vector<2x256xi1>, vector<2x256xf32>
    %526 = arith.addf %511, %525 : vector<2x256xf32>
    %c242_i32 = arith.constant 242 : i32
    %527 = tpu.dynamic_rotate %1 by %c242_i32 dim 1 : vector<2x256xf32>, i32 -> vector<2x256xf32>
    %c242_i32_88 = arith.constant 242 : i32
    %528 = tpu.dynamic_rotate %4 by %c242_i32_88 dim 1 : vector<2x256xf32>, i32 -> vector<2x256xf32>
    %c29 = arith.constant 29 : index
    %529 = memref.load %arg2[%c29] : memref<98xf32, #tpu.memory_space<smem>>
    %c78 = arith.constant 78 : index
    %530 = memref.load %arg2[%c78] : memref<98xf32, #tpu.memory_space<smem>>
    %531 = arith.andi %59, %30 : vector<1x256xi1>
    %532 = vector.broadcast %529 : f32 to vector<2x256xf32>
    %533 = arith.mulf %532, %527 : vector<2x256xf32>
    %534 = vector.broadcast %530 : f32 to vector<2x256xf32>
    %535 = arith.mulf %534, %528 : vector<2x256xf32>
    %536 = arith.addf %533, %535 : vector<2x256xf32>
    %cst_89 = arith.constant 0.000000e+00 : f32
    %537 = vector.shape_cast %531 : vector<1x256xi1> to vector<1x256xi1>
    %538 = vector.broadcast %537 : vector<1x256xi1> to vector<2x256xi1>
    %539 = vector.broadcast %cst_89 : f32 to vector<2x256xf32>
    %540 = arith.select %538, %536, %539 : vector<2x256xi1>, vector<2x256xf32>
    %541 = arith.addf %526, %540 : vector<2x256xf32>
    %c241_i32 = arith.constant 241 : i32
    %542 = tpu.dynamic_rotate %1 by %c241_i32 dim 1 : vector<2x256xf32>, i32 -> vector<2x256xf32>
    %c241_i32_90 = arith.constant 241 : i32
    %543 = tpu.dynamic_rotate %4 by %c241_i32_90 dim 1 : vector<2x256xf32>, i32 -> vector<2x256xf32>
    %c30 = arith.constant 30 : index
    %544 = memref.load %arg2[%c30] : memref<98xf32, #tpu.memory_space<smem>>
    %c79 = arith.constant 79 : index
    %545 = memref.load %arg2[%c79] : memref<98xf32, #tpu.memory_space<smem>>
    %546 = arith.andi %59, %42 : vector<1x256xi1>
    %547 = vector.broadcast %544 : f32 to vector<2x256xf32>
    %548 = arith.mulf %547, %542 : vector<2x256xf32>
    %549 = vector.broadcast %545 : f32 to vector<2x256xf32>
    %550 = arith.mulf %549, %543 : vector<2x256xf32>
    %551 = arith.addf %548, %550 : vector<2x256xf32>
    %cst_91 = arith.constant 0.000000e+00 : f32
    %552 = vector.shape_cast %546 : vector<1x256xi1> to vector<1x256xi1>
    %553 = vector.broadcast %552 : vector<1x256xi1> to vector<2x256xi1>
    %554 = vector.broadcast %cst_91 : f32 to vector<2x256xf32>
    %555 = arith.select %553, %551, %554 : vector<2x256xi1>, vector<2x256xf32>
    %556 = arith.addf %541, %555 : vector<2x256xf32>
    %c240_i32_92 = arith.constant 240 : i32
    %557 = tpu.dynamic_rotate %1 by %c240_i32_92 dim 1 : vector<2x256xf32>, i32 -> vector<2x256xf32>
    %c240_i32_93 = arith.constant 240 : i32
    %558 = tpu.dynamic_rotate %4 by %c240_i32_93 dim 1 : vector<2x256xf32>, i32 -> vector<2x256xf32>
    %c31 = arith.constant 31 : index
    %559 = memref.load %arg2[%c31] : memref<98xf32, #tpu.memory_space<smem>>
    %c80 = arith.constant 80 : index
    %560 = memref.load %arg2[%c80] : memref<98xf32, #tpu.memory_space<smem>>
    %561 = arith.andi %59, %54 : vector<1x256xi1>
    %562 = vector.broadcast %559 : f32 to vector<2x256xf32>
    %563 = arith.mulf %562, %557 : vector<2x256xf32>
    %564 = vector.broadcast %560 : f32 to vector<2x256xf32>
    %565 = arith.mulf %564, %558 : vector<2x256xf32>
    %566 = arith.addf %563, %565 : vector<2x256xf32>
    %cst_94 = arith.constant 0.000000e+00 : f32
    %567 = vector.shape_cast %561 : vector<1x256xi1> to vector<1x256xi1>
    %568 = vector.broadcast %567 : vector<1x256xi1> to vector<2x256xi1>
    %569 = vector.broadcast %cst_94 : f32 to vector<2x256xf32>
    %570 = arith.select %568, %566, %569 : vector<2x256xi1>, vector<2x256xf32>
    %571 = arith.addf %556, %570 : vector<2x256xf32>
    %c239_i32 = arith.constant 239 : i32
    %572 = tpu.dynamic_rotate %1 by %c239_i32 dim 1 : vector<2x256xf32>, i32 -> vector<2x256xf32>
    %c239_i32_95 = arith.constant 239 : i32
    %573 = tpu.dynamic_rotate %4 by %c239_i32_95 dim 1 : vector<2x256xf32>, i32 -> vector<2x256xf32>
    %c32 = arith.constant 32 : index
    %574 = memref.load %arg2[%c32] : memref<98xf32, #tpu.memory_space<smem>>
    %c81 = arith.constant 81 : index
    %575 = memref.load %arg2[%c81] : memref<98xf32, #tpu.memory_space<smem>>
    %576 = arith.andi %59, %66 : vector<1x256xi1>
    %577 = vector.broadcast %574 : f32 to vector<2x256xf32>
    %578 = arith.mulf %577, %572 : vector<2x256xf32>
    %579 = vector.broadcast %575 : f32 to vector<2x256xf32>
    %580 = arith.mulf %579, %573 : vector<2x256xf32>
    %581 = arith.addf %578, %580 : vector<2x256xf32>
    %cst_96 = arith.constant 0.000000e+00 : f32
    %582 = vector.shape_cast %576 : vector<1x256xi1> to vector<1x256xi1>
    %583 = vector.broadcast %582 : vector<1x256xi1> to vector<2x256xi1>
    %584 = vector.broadcast %cst_96 : f32 to vector<2x256xf32>
    %585 = arith.select %583, %581, %584 : vector<2x256xi1>, vector<2x256xf32>
    %586 = arith.addf %571, %585 : vector<2x256xf32>
    %c238_i32 = arith.constant 238 : i32
    %587 = tpu.dynamic_rotate %1 by %c238_i32 dim 1 : vector<2x256xf32>, i32 -> vector<2x256xf32>
    %c238_i32_97 = arith.constant 238 : i32
    %588 = tpu.dynamic_rotate %4 by %c238_i32_97 dim 1 : vector<2x256xf32>, i32 -> vector<2x256xf32>
    %c33 = arith.constant 33 : index
    %589 = memref.load %arg2[%c33] : memref<98xf32, #tpu.memory_space<smem>>
    %c82 = arith.constant 82 : index
    %590 = memref.load %arg2[%c82] : memref<98xf32, #tpu.memory_space<smem>>
    %591 = arith.andi %59, %78 : vector<1x256xi1>
    %592 = vector.broadcast %589 : f32 to vector<2x256xf32>
    %593 = arith.mulf %592, %587 : vector<2x256xf32>
    %594 = vector.broadcast %590 : f32 to vector<2x256xf32>
    %595 = arith.mulf %594, %588 : vector<2x256xf32>
    %596 = arith.addf %593, %595 : vector<2x256xf32>
    %cst_98 = arith.constant 0.000000e+00 : f32
    %597 = vector.shape_cast %591 : vector<1x256xi1> to vector<1x256xi1>
    %598 = vector.broadcast %597 : vector<1x256xi1> to vector<2x256xi1>
    %599 = vector.broadcast %cst_98 : f32 to vector<2x256xf32>
    %600 = arith.select %598, %596, %599 : vector<2x256xi1>, vector<2x256xf32>
    %601 = arith.addf %586, %600 : vector<2x256xf32>
    %c237_i32 = arith.constant 237 : i32
    %602 = tpu.dynamic_rotate %1 by %c237_i32 dim 1 : vector<2x256xf32>, i32 -> vector<2x256xf32>
    %c237_i32_99 = arith.constant 237 : i32
    %603 = tpu.dynamic_rotate %4 by %c237_i32_99 dim 1 : vector<2x256xf32>, i32 -> vector<2x256xf32>
    %c34 = arith.constant 34 : index
    %604 = memref.load %arg2[%c34] : memref<98xf32, #tpu.memory_space<smem>>
    %c83 = arith.constant 83 : index
    %605 = memref.load %arg2[%c83] : memref<98xf32, #tpu.memory_space<smem>>
    %606 = arith.andi %59, %90 : vector<1x256xi1>
    %607 = vector.broadcast %604 : f32 to vector<2x256xf32>
    %608 = arith.mulf %607, %602 : vector<2x256xf32>
    %609 = vector.broadcast %605 : f32 to vector<2x256xf32>
    %610 = arith.mulf %609, %603 : vector<2x256xf32>
    %611 = arith.addf %608, %610 : vector<2x256xf32>
    %cst_100 = arith.constant 0.000000e+00 : f32
    %612 = vector.shape_cast %606 : vector<1x256xi1> to vector<1x256xi1>
    %613 = vector.broadcast %612 : vector<1x256xi1> to vector<2x256xi1>
    %614 = vector.broadcast %cst_100 : f32 to vector<2x256xf32>
    %615 = arith.select %613, %611, %614 : vector<2x256xi1>, vector<2x256xf32>
    %616 = arith.addf %601, %615 : vector<2x256xf32>
    %c227_i32 = arith.constant 227 : i32
    %617 = tpu.dynamic_rotate %1 by %c227_i32 dim 1 : vector<2x256xf32>, i32 -> vector<2x256xf32>
    %c227_i32_101 = arith.constant 227 : i32
    %618 = tpu.dynamic_rotate %4 by %c227_i32_101 dim 1 : vector<2x256xf32>, i32 -> vector<2x256xf32>
    %c35 = arith.constant 35 : index
    %619 = memref.load %arg2[%c35] : memref<98xf32, #tpu.memory_space<smem>>
    %c84 = arith.constant 84 : index
    %620 = memref.load %arg2[%c84] : memref<98xf32, #tpu.memory_space<smem>>
    %621 = arith.andi %71, %18 : vector<1x256xi1>
    %622 = vector.broadcast %619 : f32 to vector<2x256xf32>
    %623 = arith.mulf %622, %617 : vector<2x256xf32>
    %624 = vector.broadcast %620 : f32 to vector<2x256xf32>
    %625 = arith.mulf %624, %618 : vector<2x256xf32>
    %626 = arith.addf %623, %625 : vector<2x256xf32>
    %cst_102 = arith.constant 0.000000e+00 : f32
    %627 = vector.shape_cast %621 : vector<1x256xi1> to vector<1x256xi1>
    %628 = vector.broadcast %627 : vector<1x256xi1> to vector<2x256xi1>
    %629 = vector.broadcast %cst_102 : f32 to vector<2x256xf32>
    %630 = arith.select %628, %626, %629 : vector<2x256xi1>, vector<2x256xf32>
    %631 = arith.addf %616, %630 : vector<2x256xf32>
    %c226_i32 = arith.constant 226 : i32
    %632 = tpu.dynamic_rotate %1 by %c226_i32 dim 1 : vector<2x256xf32>, i32 -> vector<2x256xf32>
    %c226_i32_103 = arith.constant 226 : i32
    %633 = tpu.dynamic_rotate %4 by %c226_i32_103 dim 1 : vector<2x256xf32>, i32 -> vector<2x256xf32>
    %c36 = arith.constant 36 : index
    %634 = memref.load %arg2[%c36] : memref<98xf32, #tpu.memory_space<smem>>
    %c85 = arith.constant 85 : index
    %635 = memref.load %arg2[%c85] : memref<98xf32, #tpu.memory_space<smem>>
    %636 = arith.andi %71, %30 : vector<1x256xi1>
    %637 = vector.broadcast %634 : f32 to vector<2x256xf32>
    %638 = arith.mulf %637, %632 : vector<2x256xf32>
    %639 = vector.broadcast %635 : f32 to vector<2x256xf32>
    %640 = arith.mulf %639, %633 : vector<2x256xf32>
    %641 = arith.addf %638, %640 : vector<2x256xf32>
    %cst_104 = arith.constant 0.000000e+00 : f32
    %642 = vector.shape_cast %636 : vector<1x256xi1> to vector<1x256xi1>
    %643 = vector.broadcast %642 : vector<1x256xi1> to vector<2x256xi1>
    %644 = vector.broadcast %cst_104 : f32 to vector<2x256xf32>
    %645 = arith.select %643, %641, %644 : vector<2x256xi1>, vector<2x256xf32>
    %646 = arith.addf %631, %645 : vector<2x256xf32>
    %c225_i32 = arith.constant 225 : i32
    %647 = tpu.dynamic_rotate %1 by %c225_i32 dim 1 : vector<2x256xf32>, i32 -> vector<2x256xf32>
    %c225_i32_105 = arith.constant 225 : i32
    %648 = tpu.dynamic_rotate %4 by %c225_i32_105 dim 1 : vector<2x256xf32>, i32 -> vector<2x256xf32>
    %c37 = arith.constant 37 : index
    %649 = memref.load %arg2[%c37] : memref<98xf32, #tpu.memory_space<smem>>
    %c86 = arith.constant 86 : index
    %650 = memref.load %arg2[%c86] : memref<98xf32, #tpu.memory_space<smem>>
    %651 = arith.andi %71, %42 : vector<1x256xi1>
    %652 = vector.broadcast %649 : f32 to vector<2x256xf32>
    %653 = arith.mulf %652, %647 : vector<2x256xf32>
    %654 = vector.broadcast %650 : f32 to vector<2x256xf32>
    %655 = arith.mulf %654, %648 : vector<2x256xf32>
    %656 = arith.addf %653, %655 : vector<2x256xf32>
    %cst_106 = arith.constant 0.000000e+00 : f32
    %657 = vector.shape_cast %651 : vector<1x256xi1> to vector<1x256xi1>
    %658 = vector.broadcast %657 : vector<1x256xi1> to vector<2x256xi1>
    %659 = vector.broadcast %cst_106 : f32 to vector<2x256xf32>
    %660 = arith.select %658, %656, %659 : vector<2x256xi1>, vector<2x256xf32>
    %661 = arith.addf %646, %660 : vector<2x256xf32>
    %c224_i32_107 = arith.constant 224 : i32
    %662 = tpu.dynamic_rotate %1 by %c224_i32_107 dim 1 : vector<2x256xf32>, i32 -> vector<2x256xf32>
    %c224_i32_108 = arith.constant 224 : i32
    %663 = tpu.dynamic_rotate %4 by %c224_i32_108 dim 1 : vector<2x256xf32>, i32 -> vector<2x256xf32>
    %c38 = arith.constant 38 : index
    %664 = memref.load %arg2[%c38] : memref<98xf32, #tpu.memory_space<smem>>
    %c87 = arith.constant 87 : index
    %665 = memref.load %arg2[%c87] : memref<98xf32, #tpu.memory_space<smem>>
    %666 = arith.andi %71, %54 : vector<1x256xi1>
    %667 = vector.broadcast %664 : f32 to vector<2x256xf32>
    %668 = arith.mulf %667, %662 : vector<2x256xf32>
    %669 = vector.broadcast %665 : f32 to vector<2x256xf32>
    %670 = arith.mulf %669, %663 : vector<2x256xf32>
    %671 = arith.addf %668, %670 : vector<2x256xf32>
    %cst_109 = arith.constant 0.000000e+00 : f32
    %672 = vector.shape_cast %666 : vector<1x256xi1> to vector<1x256xi1>
    %673 = vector.broadcast %672 : vector<1x256xi1> to vector<2x256xi1>
    %674 = vector.broadcast %cst_109 : f32 to vector<2x256xf32>
    %675 = arith.select %673, %671, %674 : vector<2x256xi1>, vector<2x256xf32>
    %676 = arith.addf %661, %675 : vector<2x256xf32>
    %c223_i32 = arith.constant 223 : i32
    %677 = tpu.dynamic_rotate %1 by %c223_i32 dim 1 : vector<2x256xf32>, i32 -> vector<2x256xf32>
    %c223_i32_110 = arith.constant 223 : i32
    %678 = tpu.dynamic_rotate %4 by %c223_i32_110 dim 1 : vector<2x256xf32>, i32 -> vector<2x256xf32>
    %c39 = arith.constant 39 : index
    %679 = memref.load %arg2[%c39] : memref<98xf32, #tpu.memory_space<smem>>
    %c88 = arith.constant 88 : index
    %680 = memref.load %arg2[%c88] : memref<98xf32, #tpu.memory_space<smem>>
    %681 = arith.andi %71, %66 : vector<1x256xi1>
    %682 = vector.broadcast %679 : f32 to vector<2x256xf32>
    %683 = arith.mulf %682, %677 : vector<2x256xf32>
    %684 = vector.broadcast %680 : f32 to vector<2x256xf32>
    %685 = arith.mulf %684, %678 : vector<2x256xf32>
    %686 = arith.addf %683, %685 : vector<2x256xf32>
    %cst_111 = arith.constant 0.000000e+00 : f32
    %687 = vector.shape_cast %681 : vector<1x256xi1> to vector<1x256xi1>
    %688 = vector.broadcast %687 : vector<1x256xi1> to vector<2x256xi1>
    %689 = vector.broadcast %cst_111 : f32 to vector<2x256xf32>
    %690 = arith.select %688, %686, %689 : vector<2x256xi1>, vector<2x256xf32>
    %691 = arith.addf %676, %690 : vector<2x256xf32>
    %c222_i32 = arith.constant 222 : i32
    %692 = tpu.dynamic_rotate %1 by %c222_i32 dim 1 : vector<2x256xf32>, i32 -> vector<2x256xf32>
    %c222_i32_112 = arith.constant 222 : i32
    %693 = tpu.dynamic_rotate %4 by %c222_i32_112 dim 1 : vector<2x256xf32>, i32 -> vector<2x256xf32>
    %c40 = arith.constant 40 : index
    %694 = memref.load %arg2[%c40] : memref<98xf32, #tpu.memory_space<smem>>
    %c89 = arith.constant 89 : index
    %695 = memref.load %arg2[%c89] : memref<98xf32, #tpu.memory_space<smem>>
    %696 = arith.andi %71, %78 : vector<1x256xi1>
    %697 = vector.broadcast %694 : f32 to vector<2x256xf32>
    %698 = arith.mulf %697, %692 : vector<2x256xf32>
    %699 = vector.broadcast %695 : f32 to vector<2x256xf32>
    %700 = arith.mulf %699, %693 : vector<2x256xf32>
    %701 = arith.addf %698, %700 : vector<2x256xf32>
    %cst_113 = arith.constant 0.000000e+00 : f32
    %702 = vector.shape_cast %696 : vector<1x256xi1> to vector<1x256xi1>
    %703 = vector.broadcast %702 : vector<1x256xi1> to vector<2x256xi1>
    %704 = vector.broadcast %cst_113 : f32 to vector<2x256xf32>
    %705 = arith.select %703, %701, %704 : vector<2x256xi1>, vector<2x256xf32>
    %706 = arith.addf %691, %705 : vector<2x256xf32>
    %c221_i32 = arith.constant 221 : i32
    %707 = tpu.dynamic_rotate %1 by %c221_i32 dim 1 : vector<2x256xf32>, i32 -> vector<2x256xf32>
    %c221_i32_114 = arith.constant 221 : i32
    %708 = tpu.dynamic_rotate %4 by %c221_i32_114 dim 1 : vector<2x256xf32>, i32 -> vector<2x256xf32>
    %c41 = arith.constant 41 : index
    %709 = memref.load %arg2[%c41] : memref<98xf32, #tpu.memory_space<smem>>
    %c90 = arith.constant 90 : index
    %710 = memref.load %arg2[%c90] : memref<98xf32, #tpu.memory_space<smem>>
    %711 = arith.andi %71, %90 : vector<1x256xi1>
    %712 = vector.broadcast %709 : f32 to vector<2x256xf32>
    %713 = arith.mulf %712, %707 : vector<2x256xf32>
    %714 = vector.broadcast %710 : f32 to vector<2x256xf32>
    %715 = arith.mulf %714, %708 : vector<2x256xf32>
    %716 = arith.addf %713, %715 : vector<2x256xf32>
    %cst_115 = arith.constant 0.000000e+00 : f32
    %717 = vector.shape_cast %711 : vector<1x256xi1> to vector<1x256xi1>
    %718 = vector.broadcast %717 : vector<1x256xi1> to vector<2x256xi1>
    %719 = vector.broadcast %cst_115 : f32 to vector<2x256xf32>
    %720 = arith.select %718, %716, %719 : vector<2x256xi1>, vector<2x256xf32>
    %721 = arith.addf %706, %720 : vector<2x256xf32>
    %c211_i32 = arith.constant 211 : i32
    %722 = tpu.dynamic_rotate %1 by %c211_i32 dim 1 : vector<2x256xf32>, i32 -> vector<2x256xf32>
    %c211_i32_116 = arith.constant 211 : i32
    %723 = tpu.dynamic_rotate %4 by %c211_i32_116 dim 1 : vector<2x256xf32>, i32 -> vector<2x256xf32>
    %c42 = arith.constant 42 : index
    %724 = memref.load %arg2[%c42] : memref<98xf32, #tpu.memory_space<smem>>
    %c91 = arith.constant 91 : index
    %725 = memref.load %arg2[%c91] : memref<98xf32, #tpu.memory_space<smem>>
    %726 = arith.andi %83, %18 : vector<1x256xi1>
    %727 = vector.broadcast %724 : f32 to vector<2x256xf32>
    %728 = arith.mulf %727, %722 : vector<2x256xf32>
    %729 = vector.broadcast %725 : f32 to vector<2x256xf32>
    %730 = arith.mulf %729, %723 : vector<2x256xf32>
    %731 = arith.addf %728, %730 : vector<2x256xf32>
    %cst_117 = arith.constant 0.000000e+00 : f32
    %732 = vector.shape_cast %726 : vector<1x256xi1> to vector<1x256xi1>
    %733 = vector.broadcast %732 : vector<1x256xi1> to vector<2x256xi1>
    %734 = vector.broadcast %cst_117 : f32 to vector<2x256xf32>
    %735 = arith.select %733, %731, %734 : vector<2x256xi1>, vector<2x256xf32>
    %736 = arith.addf %721, %735 : vector<2x256xf32>
    %c210_i32 = arith.constant 210 : i32
    %737 = tpu.dynamic_rotate %1 by %c210_i32 dim 1 : vector<2x256xf32>, i32 -> vector<2x256xf32>
    %c210_i32_118 = arith.constant 210 : i32
    %738 = tpu.dynamic_rotate %4 by %c210_i32_118 dim 1 : vector<2x256xf32>, i32 -> vector<2x256xf32>
    %c43 = arith.constant 43 : index
    %739 = memref.load %arg2[%c43] : memref<98xf32, #tpu.memory_space<smem>>
    %c92 = arith.constant 92 : index
    %740 = memref.load %arg2[%c92] : memref<98xf32, #tpu.memory_space<smem>>
    %741 = arith.andi %83, %30 : vector<1x256xi1>
    %742 = vector.broadcast %739 : f32 to vector<2x256xf32>
    %743 = arith.mulf %742, %737 : vector<2x256xf32>
    %744 = vector.broadcast %740 : f32 to vector<2x256xf32>
    %745 = arith.mulf %744, %738 : vector<2x256xf32>
    %746 = arith.addf %743, %745 : vector<2x256xf32>
    %cst_119 = arith.constant 0.000000e+00 : f32
    %747 = vector.shape_cast %741 : vector<1x256xi1> to vector<1x256xi1>
    %748 = vector.broadcast %747 : vector<1x256xi1> to vector<2x256xi1>
    %749 = vector.broadcast %cst_119 : f32 to vector<2x256xf32>
    %750 = arith.select %748, %746, %749 : vector<2x256xi1>, vector<2x256xf32>
    %751 = arith.addf %736, %750 : vector<2x256xf32>
    %c209_i32 = arith.constant 209 : i32
    %752 = tpu.dynamic_rotate %1 by %c209_i32 dim 1 : vector<2x256xf32>, i32 -> vector<2x256xf32>
    %c209_i32_120 = arith.constant 209 : i32
    %753 = tpu.dynamic_rotate %4 by %c209_i32_120 dim 1 : vector<2x256xf32>, i32 -> vector<2x256xf32>
    %c44 = arith.constant 44 : index
    %754 = memref.load %arg2[%c44] : memref<98xf32, #tpu.memory_space<smem>>
    %c93 = arith.constant 93 : index
    %755 = memref.load %arg2[%c93] : memref<98xf32, #tpu.memory_space<smem>>
    %756 = arith.andi %83, %42 : vector<1x256xi1>
    %757 = vector.broadcast %754 : f32 to vector<2x256xf32>
    %758 = arith.mulf %757, %752 : vector<2x256xf32>
    %759 = vector.broadcast %755 : f32 to vector<2x256xf32>
    %760 = arith.mulf %759, %753 : vector<2x256xf32>
    %761 = arith.addf %758, %760 : vector<2x256xf32>
    %cst_121 = arith.constant 0.000000e+00 : f32
    %762 = vector.shape_cast %756 : vector<1x256xi1> to vector<1x256xi1>
    %763 = vector.broadcast %762 : vector<1x256xi1> to vector<2x256xi1>
    %764 = vector.broadcast %cst_121 : f32 to vector<2x256xf32>
    %765 = arith.select %763, %761, %764 : vector<2x256xi1>, vector<2x256xf32>
    %766 = arith.addf %751, %765 : vector<2x256xf32>
    %c208_i32_122 = arith.constant 208 : i32
    %767 = tpu.dynamic_rotate %1 by %c208_i32_122 dim 1 : vector<2x256xf32>, i32 -> vector<2x256xf32>
    %c208_i32_123 = arith.constant 208 : i32
    %768 = tpu.dynamic_rotate %4 by %c208_i32_123 dim 1 : vector<2x256xf32>, i32 -> vector<2x256xf32>
    %c45 = arith.constant 45 : index
    %769 = memref.load %arg2[%c45] : memref<98xf32, #tpu.memory_space<smem>>
    %c94 = arith.constant 94 : index
    %770 = memref.load %arg2[%c94] : memref<98xf32, #tpu.memory_space<smem>>
    %771 = arith.andi %83, %54 : vector<1x256xi1>
    %772 = vector.broadcast %769 : f32 to vector<2x256xf32>
    %773 = arith.mulf %772, %767 : vector<2x256xf32>
    %774 = vector.broadcast %770 : f32 to vector<2x256xf32>
    %775 = arith.mulf %774, %768 : vector<2x256xf32>
    %776 = arith.addf %773, %775 : vector<2x256xf32>
    %cst_124 = arith.constant 0.000000e+00 : f32
    %777 = vector.shape_cast %771 : vector<1x256xi1> to vector<1x256xi1>
    %778 = vector.broadcast %777 : vector<1x256xi1> to vector<2x256xi1>
    %779 = vector.broadcast %cst_124 : f32 to vector<2x256xf32>
    %780 = arith.select %778, %776, %779 : vector<2x256xi1>, vector<2x256xf32>
    %781 = arith.addf %766, %780 : vector<2x256xf32>
    %c207_i32 = arith.constant 207 : i32
    %782 = tpu.dynamic_rotate %1 by %c207_i32 dim 1 : vector<2x256xf32>, i32 -> vector<2x256xf32>
    %c207_i32_125 = arith.constant 207 : i32
    %783 = tpu.dynamic_rotate %4 by %c207_i32_125 dim 1 : vector<2x256xf32>, i32 -> vector<2x256xf32>
    %c46 = arith.constant 46 : index
    %784 = memref.load %arg2[%c46] : memref<98xf32, #tpu.memory_space<smem>>
    %c95 = arith.constant 95 : index
    %785 = memref.load %arg2[%c95] : memref<98xf32, #tpu.memory_space<smem>>
    %786 = arith.andi %83, %66 : vector<1x256xi1>
    %787 = vector.broadcast %784 : f32 to vector<2x256xf32>
    %788 = arith.mulf %787, %782 : vector<2x256xf32>
    %789 = vector.broadcast %785 : f32 to vector<2x256xf32>
    %790 = arith.mulf %789, %783 : vector<2x256xf32>
    %791 = arith.addf %788, %790 : vector<2x256xf32>
    %cst_126 = arith.constant 0.000000e+00 : f32
    %792 = vector.shape_cast %786 : vector<1x256xi1> to vector<1x256xi1>
    %793 = vector.broadcast %792 : vector<1x256xi1> to vector<2x256xi1>
    %794 = vector.broadcast %cst_126 : f32 to vector<2x256xf32>
    %795 = arith.select %793, %791, %794 : vector<2x256xi1>, vector<2x256xf32>
    %796 = arith.addf %781, %795 : vector<2x256xf32>
    %c206_i32 = arith.constant 206 : i32
    %797 = tpu.dynamic_rotate %1 by %c206_i32 dim 1 : vector<2x256xf32>, i32 -> vector<2x256xf32>
    %c206_i32_127 = arith.constant 206 : i32
    %798 = tpu.dynamic_rotate %4 by %c206_i32_127 dim 1 : vector<2x256xf32>, i32 -> vector<2x256xf32>
    %c47 = arith.constant 47 : index
    %799 = memref.load %arg2[%c47] : memref<98xf32, #tpu.memory_space<smem>>
    %c96 = arith.constant 96 : index
    %800 = memref.load %arg2[%c96] : memref<98xf32, #tpu.memory_space<smem>>
    %801 = arith.andi %83, %78 : vector<1x256xi1>
    %802 = vector.broadcast %799 : f32 to vector<2x256xf32>
    %803 = arith.mulf %802, %797 : vector<2x256xf32>
    %804 = vector.broadcast %800 : f32 to vector<2x256xf32>
    %805 = arith.mulf %804, %798 : vector<2x256xf32>
    %806 = arith.addf %803, %805 : vector<2x256xf32>
    %cst_128 = arith.constant 0.000000e+00 : f32
    %807 = vector.shape_cast %801 : vector<1x256xi1> to vector<1x256xi1>
    %808 = vector.broadcast %807 : vector<1x256xi1> to vector<2x256xi1>
    %809 = vector.broadcast %cst_128 : f32 to vector<2x256xf32>
    %810 = arith.select %808, %806, %809 : vector<2x256xi1>, vector<2x256xf32>
    %811 = arith.addf %796, %810 : vector<2x256xf32>
    %c205_i32 = arith.constant 205 : i32
    %812 = tpu.dynamic_rotate %1 by %c205_i32 dim 1 : vector<2x256xf32>, i32 -> vector<2x256xf32>
    %c205_i32_129 = arith.constant 205 : i32
    %813 = tpu.dynamic_rotate %4 by %c205_i32_129 dim 1 : vector<2x256xf32>, i32 -> vector<2x256xf32>
    %c48 = arith.constant 48 : index
    %814 = memref.load %arg2[%c48] : memref<98xf32, #tpu.memory_space<smem>>
    %c97 = arith.constant 97 : index
    %815 = memref.load %arg2[%c97] : memref<98xf32, #tpu.memory_space<smem>>
    %816 = arith.andi %83, %90 : vector<1x256xi1>
    %817 = vector.broadcast %814 : f32 to vector<2x256xf32>
    %818 = arith.mulf %817, %812 : vector<2x256xf32>
    %819 = vector.broadcast %815 : f32 to vector<2x256xf32>
    %820 = arith.mulf %819, %813 : vector<2x256xf32>
    %821 = arith.addf %818, %820 : vector<2x256xf32>
    %cst_130 = arith.constant 0.000000e+00 : f32
    %822 = vector.shape_cast %816 : vector<1x256xi1> to vector<1x256xi1>
    %823 = vector.broadcast %822 : vector<1x256xi1> to vector<2x256xi1>
    %824 = vector.broadcast %cst_130 : f32 to vector<2x256xf32>
    %825 = arith.select %823, %821, %824 : vector<2x256xi1>, vector<2x256xf32>
    %826 = arith.addf %811, %825 : vector<2x256xf32>
    %c0_131 = arith.constant 0 : index
    %827 = memref.load %arg3[%c0_131] : memref<1xf32, #tpu.memory_space<smem>>
    %828 = vector.broadcast %827 : f32 to vector<2x256xf32>
    %829 = arith.addf %826, %828 : vector<2x256xf32>
    %830 = arith.negf %829 : vector<2x256xf32>
    %831 = math.exp %830 : vector<2x256xf32>
    %cst_132 = arith.constant 1.000000e+00 : f32
    %832 = vector.broadcast %cst_132 : f32 to vector<2x256xf32>
    %833 = arith.addf %832, %831 : vector<2x256xf32>
    %834 = arith.divf %832, %833 : vector<2x256xf32>
    %c0_133 = arith.constant 0 : index
    %c0_134 = arith.constant 0 : index
    %c0_135 = arith.constant 0 : index
    %835 = vector.load %arg1[%c0_133, %c0_134, %c0_135] : memref<2x4x256xf32, #tpu.memory_space<vmem>>, vector<2x4x256xf32>
    %836 = vector.shape_cast %834 : vector<2x256xf32> to vector<2x1x256xf32>
    %837 = vector.broadcast %836 : vector<2x1x256xf32> to vector<2x4x256xf32>
    %838 = arith.mulf %835, %837 : vector<2x4x256xf32>
    %c0_136 = arith.constant 0 : index
    %c0_137 = arith.constant 0 : index
    %c0_138 = arith.constant 0 : index
    %839 = vector.load %arg5[%c0_136, %c0_137, %c0_138] : memref<2x4x256xf32, #tpu.memory_space<vmem>>, vector<2x4x256xf32>
    tpu.vector_store %arg5[%c0_136, %c0_137, %c0_138], %838 {strides = array<i32>} : memref<2x4x256xf32, #tpu.memory_space<vmem>>, vector<2x4x256xf32>,
    return
  }
  func.func @transform_0(%arg0: i32) -> (i32, i32, i32) {
    %c0_i32 = arith.constant 0 : i32
    %c0_i32_0 = arith.constant 0 : i32
    %c0_i32_1 = arith.constant 0 : i32
    return %arg0, %c0_i32, %c0_i32_0 : i32, i32, i32
  }
  func.func @transform_1(%arg0: i32) -> i32 {
    %c0_i32 = arith.constant 0 : i32
    %c0_i32_0 = arith.constant 0 : i32
    return %c0_i32 : i32
  }
  func.func @transform_2(%arg0: i32) -> i32 {
    %c0_i32 = arith.constant 0 : i32
    %c0_i32_0 = arith.constant 0 : i32
    return %c0_i32 : i32
  }
  func.func @transform_3(%arg0: i32) -> (i32, i32) {
    %c0_i32 = arith.constant 0 : i32
    %c0_i32_0 = arith.constant 0 : i32
    %c0_i32_1 = arith.constant 0 : i32
    return %c0_i32, %c0_i32_0 : i32, i32
  }
  func.func @transform_4(%arg0: i32) -> (i32, i32, i32) {
    %c0_i32 = arith.constant 0 : i32
    %c0_i32_0 = arith.constant 0 : i32
    %c0_i32_1 = arith.constant 0 : i32
    return %arg0, %c0_i32, %c0_i32_0 : i32, i32, i32
  }
}

</mosaic_0001>

<bundles_post_ra>
// kernel: tpu_custom_call.1
= control target key start
LH: loop header
LB: loop body
LE: loop exit
PB: predicated region body
PF: predicated region fallthrough
CT: control target
= control target key end

     0   :  { %s5581_s0 = inlined_call_operand.hbm [shape: f32[2,4,256], index: 0, kind: input, shape index: {}]   ;;  %s5582_s1 = inlined_call_operand.vmem [shape: f32[98], index: 1, kind: input, shape index: {}]   ;;  %s5583_s2 = inlined_call_operand.<no memory space> [shape: f32[1], index: 2, kind: input, shape index: {}]   ;;  %s5584_s3 = inlined_call_operand.vmem [shape: s32[1,256], index: 3, kind: input, shape index: {}]   ;;  %s5585_s4 = inlined_call_operand.hbm [shape: f32[2,4,256], index: 4, kind: output, shape index: {}]  }
   0x1   :  { %5712 = sst [smem:[#allocation77_spill]] %s5583_s2 }
   0x2   :  { %5713 = sst [smem:[#allocation78_spill]] %s5585_s4 }
   0x3   :  { %10 = vsyncpa [#allocation4], 0 }
   0x4   :  { %11 = vsyncpa [#allocation6], 0 }
   0x5   :  { %12 = vsyncpa [#allocation5], 0  ;;  %s2586_s15 = smov [#allocation3]   ;;  %s31_s19 = sshll.u32 %s5582_s1, 4  ;;  %s32_s19 = int_to_ptr.vmem [resolvable:$true] %s31_s19 }
   0x6   :  { %s18_s16 = sshll.u32 %s2586_s15, 4  ;;  %s19_s16 = int_to_ptr.vmem [resolvable:$true] %s18_s16 }
   0x7   :  { %s2536_s20 = scalar_lea.vmem %s19_s16, 256  ;;  %p2541_p1 = scmp.lt.s32.totalorder %s19_s16, %s19_s16 }
   0x8   :  { %p2537_p0 = scmp.ne.s32.totalorder %s19_s16, %s2536_s20  ;;  %p2542_p2 = scmp.lt.s32.totalorder %s2536_s20, %s2536_s20 }
   0xa   :  { %p2543_p3 = por %p2542_p2, %p2541_p1 }
   0xc   :  { %p2544_p4 = pnand %p2543_p3, %p2537_p0 }
   0xe   :  { %2547 = shalt.err (!%p2544_p4)
}
   0xf   :  { %s5622_s21 = smov 128   ;;  %s5627_s22 = smov 8  }
  0x10   :  { %24 = dma.hbm_to_vmem [thread:$0]  %s5581_s0, 256, %s19_s16, [#allocation4], %s5622_s21, %s5622_s21, %s5627_s22  }
  0x11   :  { %s2548_s25 = scalar_lea.vmem %s32_s19, 16  ;;  %p2553_p6 = scmp.lt.s32.totalorder %s32_s19, %s32_s19 }
  0x12   :  { %p2549_p5 = scmp.ne.s32.totalorder %s32_s19, %s2548_s25  ;;  %p2554_p7 = scmp.lt.s32.totalorder %s2548_s25, %s2548_s25 }
  0x14   :  { %p2555_p8 = por %p2554_p7, %p2553_p6 }
  0x16   :  { %p2556_p9 = pnand %p2555_p8, %p2549_p5 }
  0x18   :  { %2559 = shalt.err (!%p2556_p9)
}
  0x19   :  { %s2589_s1 = smov [#allocation7]  }
  0x1a   :  { %34 = dma.vmem_to_smem %s32_s19, 16, %s2589_s1, [#allocation6]  }
  0x1b   :  { %2580 = dma.done.wait [#allocation4], 256  }
  0x1c   :  { %2581 = vsyncadd [#allocation4], 4294967040 }
  0x1d   :  { %2582 = dma.done.wait [#allocation6], 16  }
  0x1e   :  { %2583 = vsyncadd [#allocation6], 4294967280 }
  0x1f   :  { %45 = sfence }
  0x20   :  { %v46_v0 = vld [vmem:[#allocation3] sm:$0xff]  ;;  %v47_v1 = vld [vmem:[#allocation3 + $0x8] sm:$0xff]  ;;  %vm54_vm0 = vcmask 1043456   ;;  %vm193_vm1 = vcmask 1041409   ;;  %s2590_s0 = smov 51   ;;  %s2591_s26 = smov 50  }
  0x21   :  { %v55_v2 = vsel %vm54_vm0, %v46_v0, -inf  ;;  %v69_v3 = vsel %vm54_vm0, %v47_v1, -inf  ;;  %v83_v4 = vsel %vm54_vm0, %v46_v0, 0.0  ;;  %v97_v5 = vsel %vm54_vm0, %v47_v1, 0.0  ;;  %s2592_s27 = smov 49   ;;  %s2593_s28 = smov 48  }
  0x22   :  { %v56_v6 = vrot.slane %v55_v2, 4  ;;  %v70_v7 = vrot.slane %v69_v3, 4  ;;  %v84_v8 = vrot.slane %v83_v4, 4  ;;  %v98_v9 = vrot.slane %v97_v5, 4  ;;  %s2594_s29 = smov 47   ;;  %s2595_s30 = smov 46  }
  0x23   :  { %v50_v10 = vcombine.high %v46_v0, %v46_v0  ;;  %v51_v11 = vcombine.high %v47_v1, %v47_v1  ;;  %s2596_s5 = smov 45   ;;  %s2597_s6 = smov 35  }
  0x24   :  { %v57_v12 = vmax.f32 %v55_v2, %v56_v6  ;;  %v71_v13 = vmax.f32 %v69_v3, %v70_v7  ;;  %v85_v14 = vadd.f32 %v84_v8, %v83_v4  ;;  %v99_v15 = vadd.f32 %v98_v9, %v97_v5  ;;  %s2598_s7 = smov 34   ;;  %s2599_s8 = smov 33  }
  0x25   :  { %v62_v16 = vsel %vm54_vm0, %v50_v10, -inf  ;;  %v76_v17 = vsel %vm54_vm0, %v51_v11, -inf  ;;  %v90_v18 = vsel %vm54_vm0, %v50_v10, 0.0  ;;  %v104_v19 = vsel %vm54_vm0, %v51_v11, 0.0  ;;  %s2600_s9 = smov 32   ;;  %s2601_s10 = smov 31  }
  0x26   :  { %v58_v20 = vrot.slane %v57_v12, 2  ;;  %v72_v21 = vrot.slane %v71_v13, 2  ;;  %v86_v22 = vrot.slane %v85_v14, 2  ;;  %v100_v23 = vrot.slane %v99_v15, 2  ;;  %s2602_s11 = smov 30   ;;  %s2603_s12 = smov 29  }
  0x27   :  { %v63_v24 = vrot.slane %v62_v16, 4  ;;  %v77_v25 = vrot.slane %v76_v17, 4  ;;  %v91_v26 = vrot.slane %v90_v18, 4  ;;  %v105_v27 = vrot.slane %v104_v19, 4  ;;  %s2604_s13 = smov 19   ;;  %s2605_s14 = smov 18  }
  0x28   :  { %v59_v28 = vmax.f32 %v57_v12, %v58_v20  ;;  %v73_v29 = vmax.f32 %v71_v13, %v72_v21  ;;  %v87_v30 = vadd.f32 %v86_v22, %v85_v14  ;;  %v101_v31 = vadd.f32 %v100_v23, %v99_v15  ;;  %s2606_s15 = smov 17   ;;  %s2607_s16 = smov 16  }
  0x29   :  { %v64_v32 = vmax.f32 %v62_v16, %v63_v24  ;;  %v78_v33 = vmax.f32 %v76_v17, %v77_v25  ;;  %v92_v34 = vadd.f32 %v91_v26, %v90_v18  ;;  %v106_v35 = vadd.f32 %v105_v27, %v104_v19  ;;  %s2608_s17 = smov 15   ;;  %s2609_s18 = smov 14  }
  0x2a   :  { %v60_v36 = vrot.slane %v59_v28, 1  ;;  %v74_v37 = vrot.slane %v73_v29, 1  ;;  %v88_v38 = vrot.slane %v87_v30, 1  ;;  %v102_v39 = vrot.slane %v101_v31, 1  ;;  %s2610_s19 = smov 13   ;;  %s2611_s20 = smov 3  }
  0x2b   :  { %v65_v40 = vrot.slane %v64_v32, 2  ;;  %v79_v41 = vrot.slane %v78_v33, 2  ;;  %v93_v42 = vrot.slane %v92_v34, 2  ;;  %v107_v43 = vrot.slane %v106_v35, 2  ;;  %s2848_s25 = sld [smem:[#allocation7 + $0x1]]  ;;  %s5634_s24 = smov 126  }
  0x2c   :  { %v61_v44 = vmax.f32 %v59_v28, %v60_v36  ;;  %v75_v45 = vmax.f32 %v73_v29, %v74_v37  ;;  %v89_v46 = vadd.f32 %v88_v38, %v87_v30  ;;  %v103_v47 = vadd.f32 %v102_v39, %v101_v31  ;;  %s2853_s1 = sld [smem:[#allocation7 + $0x2]]  ;;  %s5821_s4 = smov 126  }
  0x2d   :  { %v66_v48 = vmax.f32 %v64_v32, %v65_v40  ;;  %v80_v49 = vmax.f32 %v78_v33, %v79_v41  ;;  %v94_v50 = vadd.f32 %v93_v42, %v92_v34  ;;  %v108_v51 = vadd.f32 %v107_v43, %v106_v35  ;;  %v119_v32 = vld [vmem:[%s5584_s3] sm:$0x3]  ;;  %s2612_s3 = smov 2   ;;  %s3135_s23 = sld [smem:[#allocation7 + $0xb]] }
  0x2e   :  { %v2684_v52 = vsel %vm193_vm1, %v75_v45, %v61_v44  ;;  %v112_v53 = vmul.f32 0.25, %v89_v46  ;;  %v114_v54 = vmul.f32 0.25, %v103_v47  ;;  %v126_v34 = vadd.s32 4294967293, %v119_v32  ;;  %s3234_s21 = sld [smem:[#allocation7 + $0xd]] }
  0x2f   :  { %198 = vrot.lane.b32.xlu0 %v2684_v52, %s2590_s0  ;;  %v67_v55 = vrot.slane %v66_v48, 1  ;;  %v81_v56 = vrot.slane %v80_v49, 1  ;;  %v95_v57 = vrot.slane %v94_v50, 1  ;;  %v109_v58 = vrot.slane %v108_v51, 1  ;;  %s3261_s22 = sld [smem:[#allocation7 + $0x3e]] }
  0x30   :  { %v2688_v59 = vsel %vm193_vm1, %v114_v54, %v112_v53  ;;  %v136_v36 = vadd.s32 4294967294, %v119_v32  ;;  %v116_v38 = vlaneseq  ;;  %v146_v39 = vadd.s32 4294967295, %v119_v32  ;;  %s3305_s2 = sld [smem:[#allocation7 + $0x3f]] }
  0x31   :  { %213 = vrot.lane.b32.xlu1 %v2688_v59, %s2590_s0  ;;  %v68_v60 = vmax.f32 %v66_v48, %v67_v55  ;;  %v82_v61 = vmax.f32 %v80_v49, %v81_v56  ;;  %v96_v62 = vadd.f32 %v95_v57, %v94_v50  ;;  %v110_v63 = vadd.f32 %v109_v58, %v108_v51 }
  0x32   :  { %vm127_vm2 = vcmp.ge.s32.totalorder %v126_v34, 0  ;;  %vm128_vm3 = vcmp.lt.s32.totalorder %v126_v34, 16  ;;  %v2855_v41 = vshrl.u32 %v116_v38, 7  ;;  %vm137_vm4 = vcmp.ge.s32.totalorder %v136_v36, 0 }
  0x33   :  { %258 = vrot.lane.b32.xlu0 %v2684_v52, %s2591_s26  ;;  %v2693_v0 = vsel %vm193_vm1, %v82_v61, %v68_v60  ;;  %v113_v1 = vmul.f32 0.25, %v96_v62  ;;  %v115_v2 = vmul.f32 0.25, %v110_v63  ;;  %vm138_vm5 = vcmp.lt.s32.totalorder %v136_v36, 16  ;;  %vm129_vm6 = vmand %vm127_vm2, %vm128_vm3  ;;  %5792 = sst [smem:[#allocation47_spill]] %s3135_s23 }
  0x34   :  { %5722 = vst [vmem:[#allocation20_spill] sm:$0xff] %v2855_v41  ;;  %vm147_vm7 = vcmp.ge.s32.totalorder %v146_v39, 0  ;;  %vm148_vm8 = vcmp.lt.s32.totalorder %v146_v39, 16  ;;  %v165_v43 = vadd.s32 1, %v119_v32  ;;  %v175_v44 = vadd.s32 2, %v119_v32  ;;  %vm139_vm9 = vmand %vm137_vm4, %vm138_vm5  ;;  %s3419_s23 = sld [smem:[#allocation7 + $0x41]] }
  0x35   :  { %260 = vrot.lane.b32.xlu1 %v2693_v0, %s2591_s26  ;;  %v2699_v3 = vsel %vm193_vm1, %v115_v2, %v113_v1  ;;  %v2870_v46 = vsub.s32 0, %v2855_v41  ;;  %vm156_vm10 = vcmp.ge.s32.totalorder %v119_v32, 0  ;;  %vm157_vm11 = vcmp.lt.s32.totalorder %v119_v32, 16  ;;  %vm2873_vm12 = vmand %vm147_vm7, %vm148_vm8 }
  0x36   :  { %v185_v47 = vadd.s32 3, %v119_v32  ;;  %v5586_v48 = vmov 0   ;;  %vm166_vm13 = vcmp.ge.s32.totalorder %v165_v43, 0  ;;  %vm167_vm14 = vcmp.lt.s32.totalorder %v165_v43, 16  ;;  %vm2888_vm15 = vmand %vm156_vm10, %vm157_vm11 }
  0x37   :  { %310 = vrot.lane.b32.xlu0 %v2684_v52, %s2592_s27  ;;  %v221_v49 = vsel %vm129_vm6, 1, %v5586_v48  ;;  %v2885_v53 = vsub.s32 1, %v2855_v41  ;;  %v273_v54 = vsel %vm139_vm9, 1, %v5586_v48  ;;  %vm176_vm0 = vcmp.ge.s32.totalorder %v175_v44, 0  ;;  %vm2907_vm4 = vmand %vm166_vm13, %vm167_vm14 }
  0x38   :  { %vm177_vm1 = vcmp.lt.s32.totalorder %v175_v44, 16  ;;  %v225_v57 = vrot.slane %v221_v49, %v2870_v46  ;;  %v2901_v58 = vsel %vm2873_vm12, 1, %v5586_v48  ;;  %vm186_vm2 = vcmp.ge.s32.totalorder %v185_v47, 0 }
  0x39   :  { %312 = vrot.lane.b32.xlu1 %v2693_v0, %s2592_s27  ;;  %5728 = vst [vmem:[#allocation24_spill] sm:$0xff] %v2885_v53  ;;  %vm187_vm3 = vcmp.lt.s32.totalorder %v185_v47, 16  ;;  %v2916_v62 = vand.u32 127, %v116_v38  ;;  %v277_v63 = vrot.slane %v273_v54, %v2870_v46  ;;  %v377_v1 = vsel %vm2888_vm15, 1, %v5586_v48  ;;  %vm178_vm5 = vmand %vm176_vm0, %vm177_vm1 }
  0x3a   :  { %v229_v2 = vrot.slane %v221_v49, %v2885_v53  ;;  %v329_v32 = vrot.slane %v2901_v58, %v2870_v46  ;;  %vm2931_vm6 = vmand %vm186_vm2, %vm187_vm3  ;;  %vm2939_vm8 = vcmp.ne.s32.totalorder %v225_v57, 0  ;;  %v5738_v38 = vmov 0 }
  0x3b   :  { %200 = vrot.lane.b32.xlu0 %v2693_v0, %s2590_s0  ;;  %vm5604_vm7 = vcmp.ge.s32.totalorder %v2916_v62, 48  ;;  %v5739_v38 = vsel %vm2939_vm8, 4294967295, %v5738_v38  ;;  %v281_v39 = vrot.slane %v273_v54, %v2885_v53  ;;  %v429_v43 = vsel %vm2907_vm4, 1, %v5586_v48 }
  0x3c   :  { %5740 = vst [vmem:[#allocation28_spill] sm:$0xff] %v5739_v38  ;;  %v381_v44 = vrot.slane %v377_v1, %v2870_v46  ;;  %v2951_v47 = vsel %vm178_vm5, 1, %v5586_v48  ;;  %vm2960_vm9 = vcmp.ne.s32.totalorder %v277_v63, 0  ;;  %v5743_v55 = vmov 0  ;;  %vm2979_vm11 = vmand %vm5604_vm7, %vm2939_vm8 }
  0x3d   :  { %215 = vrot.lane.b32.xlu1 %v2699_v3, %s2590_s0  ;;  %s2857_s0 = sld [smem:[#allocation7]]  ;;  %v5744_v55 = vsel %vm2960_vm9, 4294967295, %v5743_v55  ;;  %v2967_v57 = vsel %vm2931_vm6, 1, %v5586_v48  ;;  %vm2971_vm10 = vcmp.ne.s32.totalorder %v229_v2, 0  ;;  %v5747_v60 = vmov 0  ;;  %vm3011_vm14 = vmand %vm5604_vm7, %vm2960_vm9 }
  0x3e   :  { %5745 = vst [vmem:[#allocation31_spill] sm:$0xff] %v5744_v55  ;;  %v5748_v60 = vsel %vm2971_vm10, 4294967295, %v5747_v60  ;;  %v333_v34 = vrot.slane %v2901_v58, %v2885_v53  ;;  %vm2985_vm12 = vcmp.ne.s32.totalorder %v329_v32, 0  ;;  %v5752_v54 = vmov 0 }
  0x3f   :  { %265 = vrot.lane.b32.xlu0 %v2688_v59, %s2591_s26  ;;  %5749 = vst [vmem:[#allocation33_spill] sm:$0xff] %v5748_v60  ;;  %v5753_v54 = vsel %vm2985_vm12, 4294967295, %v5752_v54  ;;  %v433_v2 = vrot.slane %v429_v43, %v2870_v46  ;;  %vm2997_vm13 = vcmp.ne.s32.totalorder %v281_v39, 0  ;;  %v5755_v41 = vmov 0  ;;  %vm3043_vm0 = vmand %vm5604_vm7, %vm2985_vm12 }
  0x40   :  { %v5756_v41 = vsel %vm2997_vm13, 4294967295, %v5755_v41  ;;  %v385_v58 = vrot.slane %v377_v1, %v2885_v53  ;;  %v485_v32 = vrot.slane %v2951_v47, %v2870_v46  ;;  %vm3015_vm15 = vcmp.ne.s32.totalorder %v381_v44, 0 }
  0x41   :  { %267 = vrot.lane.b32.xlu1 %v2699_v3, %s2591_s26  ;;  %s2862_s26 = sld [smem:[#allocation7 + $0x31]]  ;;  %5757 = vst [vmem:[#allocation35_spill] sm:$0xff] %v5756_v41  ;;  %v5761_v39 = vmov 0  ;;  %v437_v1 = vrot.slane %v429_v43, %v2885_v53  ;;  %v537_v48 = vrot.slane %v2967_v57, %v2870_v46  ;;  %vm3055_vm1 = vcmp.ne.s32.totalorder %v333_v34, 0  ;;  %vm3084_vm4 = vmand %vm5604_vm7, %vm3015_vm15 }
  0x42   :  { %v5762_v39 = vsel %vm3015_vm15, 4294967295, %v5761_v39  ;;  %v5768_v60 = vmov 0  ;;  %vm3059_vm2 = vcmp.ne.s32.totalorder %v433_v2, 0  ;;  %v5771_v43 = vmov 0 }
  0x43   :  { %317 = vrot.lane.b32.xlu0 %v2688_v59, %s2592_s27  ;;  %5763 = vst [vmem:[#allocation37_spill] sm:$0xff] %v5762_v39  ;;  %v5769_v60 = vsel %vm3055_vm1, 4294967295, %v5768_v60  ;;  %v5772_v43 = vsel %vm3059_vm2, 4294967295, %v5771_v43  ;;  %vm3076_vm3 = vcmp.ne.s32.totalorder %v385_v58, 0  ;;  %v5775_v2 = vmov 0 }
  0x44   :  { %5770 = vst [vmem:[#allocation39_spill] sm:$0xff] %v5769_v60  ;;  %5773 = vst [vmem:[#allocation40_spill] sm:$0xff] %v5772_v43  ;;  %v5776_v2 = vsel %vm3076_vm3, 4294967295, %v5775_v2  ;;  %vm3088_vm5 = vcmp.ne.s32.totalorder %v485_v32, 0  ;;  %v5780_v41 = vmov 0  ;;  %vm3103_vm6 = vcmp.ne.s32.totalorder %v437_v1, 0 }
  0x45   :  { %319 = vrot.lane.b32.xlu1 %v2699_v3, %s2592_s27  ;;  %s2864_s27 = sld [smem:[#allocation7 + $0x32]]  ;;  %5777 = vst [vmem:[#allocation42_spill] sm:$0xff] %v5776_v2  ;;  %v5781_v41 = vsel %vm3088_vm5, 4294967295, %v5780_v41  ;;  %v5786_v32 = vmov 0  ;;  %v5793_v60 = vmov 0 }
  0x46   :  { %5782 = vst [vmem:[#allocation43_spill] sm:$0xff] %v5781_v41 }
  0x47   :  { %362 = vrot.lane.b32.xlu0 %v2684_v52, %s2593_s28 }
  0x49   :  { %364 = vrot.lane.b32.xlu1 %v2693_v0, %s2593_s28 }
  0x4b   :  { %369 = vrot.lane.b32.xlu0 %v2688_v59, %s2593_s28 }
  0x4d   :  { %371 = vrot.lane.b32.xlu1 %v2699_v3, %s2593_s28  ;;  %s2877_s28 = sld [smem:[#allocation7 + $0x33]] }
  0x4f   :  { %414 = vrot.lane.b32.xlu0 %v2684_v52, %s2594_s29 }
  0x51   :  { %416 = vrot.lane.b32.xlu1 %v2693_v0, %s2594_s29 }
  0x53   :  { %421 = vrot.lane.b32.xlu0 %v2688_v59, %s2594_s29 }
  0x55   :  { %423 = vrot.lane.b32.xlu1 %v2699_v3, %s2594_s29  ;;  %s2882_s29 = sld [smem:[#allocation7 + $0x3]] }
  0x57   :  { %466 = vrot.lane.b32.xlu0 %v2684_v52, %s2595_s30 }
  0x59   :  { %468 = vrot.lane.b32.xlu1 %v2693_v0, %s2595_s30 }
  0x5b   :  { %473 = vrot.lane.b32.xlu0 %v2688_v59, %s2595_s30 }
  0x5d   :  { %475 = vrot.lane.b32.xlu1 %v2699_v3, %s2595_s30  ;;  %s2892_s30 = sld [smem:[#allocation7 + $0x34]] }
  0x5f   :  { %518 = vrot.lane.b32.xlu0 %v2684_v52, %s2596_s5 }
  0x61   :  { %520 = vrot.lane.b32.xlu1 %v2693_v0, %s2596_s5 }
  0x63   :  { %525 = vrot.lane.b32.xlu0 %v2688_v59, %s2596_s5 }
  0x65   :  { %527 = vrot.lane.b32.xlu1 %v2699_v3, %s2596_s5  ;;  %s2614_s5 = smov 1  }
  0x67   :  { %570 = vrot.lane.b32.xlu0 %v2684_v52, %s2597_s6 }
  0x69   :  { %572 = vrot.lane.b32.xlu1 %v2693_v0, %s2597_s6 }
  0x6b   :  { %577 = vrot.lane.b32.xlu0 %v2688_v59, %s2597_s6 }
  0x6d   :  { %579 = vrot.lane.b32.xlu1 %v2699_v3, %s2597_s6  ;;  %s2903_s6 = sld [smem:[#allocation7 + $0x4]] }
  0x6f   :  { %611 = vrot.lane.b32.xlu0 %v2684_v52, %s2598_s7 }
  0x71   :  { %613 = vrot.lane.b32.xlu1 %v2693_v0, %s2598_s7 }
  0x73   :  { %618 = vrot.lane.b32.xlu0 %v2688_v59, %s2598_s7 }
  0x75   :  { %620 = vrot.lane.b32.xlu1 %v2699_v3, %s2598_s7  ;;  %s2911_s7 = sld [smem:[#allocation7 + $0x35]] }
  0x77   :  { %652 = vrot.lane.b32.xlu0 %v2684_v52, %s2599_s8 }
  0x79   :  { %654 = vrot.lane.b32.xlu1 %v2693_v0, %s2599_s8 }
  0x7b   :  { %659 = vrot.lane.b32.xlu0 %v2688_v59, %s2599_s8 }
  0x7d   :  { %661 = vrot.lane.b32.xlu1 %v2699_v3, %s2599_s8  ;;  %s2922_s8 = sld [smem:[#allocation7 + $0x5]] }
  0x7f   :  { %693 = vrot.lane.b32.xlu0 %v2684_v52, %s2600_s9 }
  0x81   :  { %695 = vrot.lane.b32.xlu1 %v2693_v0, %s2600_s9 }
  0x83   :  { %700 = vrot.lane.b32.xlu0 %v2688_v59, %s2600_s9 }
  0x85   :  { %702 = vrot.lane.b32.xlu1 %v2699_v3, %s2600_s9  ;;  %s2929_s9 = sld [smem:[#allocation7 + $0x36]] }
  0x87   :  { %734 = vrot.lane.b32.xlu0 %v2684_v52, %s2601_s10 }
  0x89   :  { %736 = vrot.lane.b32.xlu1 %v2693_v0, %s2601_s10 }
  0x8b   :  { %741 = vrot.lane.b32.xlu0 %v2688_v59, %s2601_s10 }
  0x8d   :  { %743 = vrot.lane.b32.xlu1 %v2699_v3, %s2601_s10  ;;  %s2947_s10 = sld [smem:[#allocation7 + $0x6]] }
  0x8f   :  { %775 = vrot.lane.b32.xlu0 %v2684_v52, %s2602_s11 }
  0x91   :  { %777 = vrot.lane.b32.xlu1 %v2693_v0, %s2602_s11 }
  0x93   :  { %782 = vrot.lane.b32.xlu0 %v2688_v59, %s2602_s11  ;;  %5741 = sst [smem:[#allocation29_spill]] %s2947_s10  ;;  %s5647_s10 = smov 125  }
  0x95   :  { %784 = vrot.lane.b32.xlu1 %v2699_v3, %s2602_s11  ;;  %s2953_s11 = sld [smem:[#allocation7 + $0x37]] }
  0x97   :  { %816 = vrot.lane.b32.xlu0 %v2684_v52, %s2603_s12 }
  0x99   :  { %818 = vrot.lane.b32.xlu1 %v2693_v0, %s2603_s12 }
  0x9b   :  { %823 = vrot.lane.b32.xlu0 %v2688_v59, %s2603_s12 }
  0x9d   :  { %825 = vrot.lane.b32.xlu1 %v2699_v3, %s2603_s12  ;;  %s2969_s12 = sld [smem:[#allocation7 + $0x7]] }
  0x9f   :  { %857 = vrot.lane.b32.xlu0 %v2684_v52, %s2604_s13 }
  0xa1   :  { %v2752_v4 = vpop.permute.xlu0 %198  ;;  %859 = vrot.lane.b32.xlu1 %v2693_v0, %s2604_s13 }
  0xa3   :  { %v2755_v5 = vpop.permute.xlu1 %213  ;;  %864 = vrot.lane.b32.xlu0 %v2688_v59, %s2604_s13  ;;  %5746 = sst [smem:[#allocation32_spill]] %s2969_s12 }
  0xa4   :  { %s3345_s12 = sld [smem:[#allocation7 + $0x40]] }
  0xa5   :  { %v2758_v6 = vpop.permute.xlu0 %258  ;;  %866 = vrot.lane.b32.xlu1 %v2699_v3, %s2604_s13  ;;  %s2990_s13 = sld [smem:[#allocation7 + $0x38]] }
  0xa7   :  { %v2761_v7 = vpop.permute.xlu1 %260  ;;  %898 = vrot.lane.b32.xlu0 %v2684_v52, %s2605_s14 }
  0xa9   :  { %v2764_v8 = vpop.permute.xlu0 %310  ;;  %900 = vrot.lane.b32.xlu1 %v2693_v0, %s2605_s14 }
  0xab   :  { %v2767_v9 = vpop.permute.xlu1 %312  ;;  %905 = vrot.lane.b32.xlu0 %v2688_v59, %s2605_s14 }
  0xad   :  { %907 = vrot.lane.b32.xlu1 %v2699_v3, %s2605_s14  ;;  %v2771_v10 = vpop.permute.xlu0 %200  ;;  %s2615_s14 = smov 127  }
  0xaf   :  { %v2773_v11 = vpop.permute.xlu1 %215  ;;  %939 = vrot.lane.b32.xlu0 %v2684_v52, %s2606_s15 }
  0xb1   :  { %941 = vrot.lane.b32.xlu1 %v2693_v0, %s2606_s15  ;;  %v2777_v12 = vpop.permute.xlu0 %265 }
  0xb3   :  { %v2779_v13 = vpop.permute.xlu1 %267  ;;  %946 = vrot.lane.b32.xlu0 %v2688_v59, %s2606_s15 }
  0xb5   :  { %948 = vrot.lane.b32.xlu1 %v2699_v3, %s2606_s15  ;;  %v2783_v14 = vpop.permute.xlu0 %317  ;;  %s3004_s15 = sld [smem:[#allocation7 + $0x8]] }
  0xb7   :  { %v2785_v15 = vpop.permute.xlu1 %319  ;;  %980 = vrot.lane.b32.xlu0 %v2684_v52, %s2607_s16 }
  0xb9   :  { %982 = vrot.lane.b32.xlu1 %v2693_v0, %s2607_s16  ;;  %v2789_v16 = vpop.permute.xlu0 %362 }
  0xbb   :  { %v2791_v17 = vpop.permute.xlu1 %364  ;;  %987 = vrot.lane.b32.xlu0 %v2688_v59, %s2607_s16  ;;  %5758 = sst [smem:[#allocation36_spill]] %s3004_s15  ;;  %s5836_s15 = smov 125  }
  0xbd   :  { %989 = vrot.lane.b32.xlu1 %v2699_v3, %s2607_s16  ;;  %v2795_v18 = vpop.permute.xlu0 %369  ;;  %s3022_s16 = sld [smem:[#allocation7 + $0x39]] }
  0xbf   :  { %v2797_v19 = vpop.permute.xlu1 %371  ;;  %1021 = vrot.lane.b32.xlu0 %v2684_v52, %s2608_s17 }
  0xc1   :  { %1023 = vrot.lane.b32.xlu1 %v2693_v0, %s2608_s17  ;;  %v2801_v20 = vpop.permute.xlu0 %414 }
  0xc3   :  { %v2803_v21 = vpop.permute.xlu1 %416  ;;  %1028 = vrot.lane.b32.xlu0 %v2688_v59, %s2608_s17 }
  0xc5   :  { %1030 = vrot.lane.b32.xlu1 %v2699_v3, %s2608_s17  ;;  %v2807_v22 = vpop.permute.xlu0 %421  ;;  %s3048_s17 = sld [smem:[#allocation7 + $0x9]] }
  0xc7   :  { %v2809_v23 = vpop.permute.xlu1 %423  ;;  %1062 = vrot.lane.b32.xlu0 %v2684_v52, %s2609_s18 }
  0xc9   :  { %1064 = vrot.lane.b32.xlu1 %v2693_v0, %s2609_s18  ;;  %v2813_v24 = vpop.permute.xlu0 %466 }
  0xcb   :  { %v2815_v25 = vpop.permute.xlu1 %468  ;;  %1069 = vrot.lane.b32.xlu0 %v2688_v59, %s2609_s18 }
  0xcd   :  { %1071 = vrot.lane.b32.xlu1 %v2699_v3, %s2609_s18  ;;  %v2819_v26 = vpop.permute.xlu0 %473  ;;  %s3065_s18 = sld [smem:[#allocation7 + $0x3a]] }
  0xcf   :  { %v2821_v27 = vpop.permute.xlu1 %475  ;;  %1103 = vrot.lane.b32.xlu0 %v2684_v52, %s2610_s19 }
  0xd1   :  { %1105 = vrot.lane.b32.xlu1 %v2693_v0, %s2610_s19  ;;  %v2825_v28 = vpop.permute.xlu0 %518 }
  0xd2   :  { %5714 = vst [vmem:[#allocation12_spill] sm:$0xff] %v2825_v28 }
  0xd3   :  { %v2827_v29 = vpop.permute.xlu1 %520  ;;  %1110 = vrot.lane.b32.xlu0 %v2688_v59, %s2610_s19 }
  0xd4   :  { %5715 = vst [vmem:[#allocation13_spill] sm:$0xff] %v2827_v29 }
  0xd5   :  { %1112 = vrot.lane.b32.xlu1 %v2699_v3, %s2610_s19  ;;  %v2831_v30 = vpop.permute.xlu0 %525  ;;  %s3094_s19 = sld [smem:[#allocation7 + $0xa]] }
  0xd6   :  { %5716 = vst [vmem:[#allocation14_spill] sm:$0xff] %v2831_v30 }
  0xd7   :  { %v2833_v31 = vpop.permute.xlu1 %527  ;;  %1144 = vrot.lane.b32.xlu0 %v2684_v52, %s2611_s20 }
  0xd8   :  { %5717 = vst [vmem:[#allocation15_spill] sm:$0xff] %v2833_v31 }
  0xd9   :  { %1146 = vrot.lane.b32.xlu1 %v2693_v0, %s2611_s20  ;;  %v2840_v33 = vpop.permute.xlu0 %570 }
  0xda   :  { %5718 = vst [vmem:[#allocation16_spill] sm:$0xff] %v2840_v33 }
  0xdb   :  { %v2842_v35 = vpop.permute.xlu1 %572  ;;  %1151 = vrot.lane.b32.xlu0 %v2688_v59, %s2611_s20 }
  0xdc   :  { %5719 = vst [vmem:[#allocation17_spill] sm:$0xff] %v2842_v35 }
  0xdd   :  { %1153 = vrot.lane.b32.xlu1 %v2699_v3, %s2611_s20  ;;  %v2846_v37 = vpop.permute.xlu0 %577  ;;  %s3113_s20 = sld [smem:[#allocation7 + $0x3b]] }
  0xde   :  { %5720 = vst [vmem:[#allocation18_spill] sm:$0xff] %v2846_v37 }
  0xdf   :  { %v2850_v40 = vpop.permute.xlu1 %579  ;;  %1185 = vrot.lane.b32.xlu0 %v2684_v52, %s2612_s3 }
  0xe0   :  { %5721 = vst [vmem:[#allocation19_spill] sm:$0xff] %v2850_v40 }
  0xe1   :  { %1187 = vrot.lane.b32.xlu1 %v2693_v0, %s2612_s3  ;;  %v2860_v42 = vpop.permute.xlu0 %611 }
  0xe2   :  { %5723 = vst [vmem:[#allocation21_spill] sm:$0xff] %v2860_v42 }
  0xe3   :  { %v2866_v45 = vpop.permute.xlu1 %613  ;;  %1192 = vrot.lane.b32.xlu0 %v2688_v59, %s2612_s3 }
  0xe4   :  { %5724 = vst [vmem:[#allocation22_spill] sm:$0xff] %v2866_v45  ;;  %v489_v45 = vrot.slane %v2951_v47, %v2885_v53 }
  0xe5   :  { %1194 = vrot.lane.b32.xlu1 %v2699_v3, %s2612_s3  ;;  %v2880_v51 = vpop.permute.xlu0 %618  ;;  %s3165_s3 = sld [smem:[#allocation7 + $0x3c]] }
  0xe6   :  { %5727 = vst [vmem:[#allocation23_spill] sm:$0xff] %v2880_v51  ;;  %v5783_v51 = vmov 0 }
  0xe7   :  { %v2894_v56 = vpop.permute.xlu1 %620  ;;  %1226 = vrot.lane.b32.xlu0 %v2684_v52, %s2614_s5  ;;  %v5784_v51 = vsel %vm3103_vm6, 4294967295, %v5783_v51 }
  0xe8   :  { %5731 = vst [vmem:[#allocation25_spill] sm:$0xff] %v2894_v56  ;;  %5785 = vst [vmem:[#allocation44_spill] sm:$0xff] %v5784_v51  ;;  %v5800_v56 = vmov 0 }
  0xe9   :  { %1228 = vrot.lane.b32.xlu1 %v2693_v0, %s2614_s5  ;;  %v2914_v61 = vpop.permute.xlu0 %652 }
  0xea   :  { %5734 = vst [vmem:[#allocation26_spill] sm:$0xff] %v2914_v61 }
  0xeb   :  { %v2935_v36 = vpop.permute.xlu1 %654  ;;  %1233 = vrot.lane.b32.xlu0 %v2688_v59, %s2614_s5 }
  0xec   :  { %5737 = vst [vmem:[#allocation27_spill] sm:$0xff] %v2935_v36  ;;  %v541_v36 = vrot.slane %v2967_v57, %v2885_v53 }
  0xed   :  { %1235 = vrot.lane.b32.xlu1 %v2699_v3, %s2614_s5  ;;  %v2956_v49 = vpop.permute.xlu0 %659  ;;  %s3187_s5 = sld [smem:[#allocation7 + $0xc]] }
  0xee   :  { %5742 = vst [vmem:[#allocation30_spill] sm:$0xff] %v2956_v49  ;;  %v5765_v49 = vmov 0  }
  0xef   :  { %v2992_v50 = vpop.permute.xlu1 %661  ;;  %1295 = vrot.lane.b32.xlu0 %v2684_v52, %s2615_s14  ;;  %v3036_v44 = vsel %vm2971_vm10, 1, %v5765_v49  ;;  %v3053_v63 = vsel %vm2997_vm13, 1, %v5765_v49  ;;  %v3074_v34 = vsel %vm3011_vm14, 1, %v5765_v49  ;;  %vm3130_vm14 = vmand %vm5604_vm7, %vm3059_vm2  ;;  %v3142_v1 = vsel %vm3084_vm4, 1, %v5765_v49 }
  0xf0   :  { %5754 = vst [vmem:[#allocation34_spill] sm:$0xff] %v2992_v50  ;;  %v3031_v50 = vsel %vm2979_vm11, 1, %v5765_v49  ;;  %vm3107_vm11 = vcmp.ne.s32.totalorder %v537_v48, 0  ;;  %v3124_v48 = vsel %vm3055_vm1, 1, %v5765_v49  ;;  %v3147_v53 = vsel %vm3076_vm3, 1, %v5765_v49 }
  0xf1   :  { %1297 = vrot.lane.b32.xlu1 %v2693_v0, %s2615_s14  ;;  %v3026_v61 = vpop.permute.xlu0 %693  ;;  %v5787_v32 = vsel %vm3107_vm11, 4294967295, %v5786_v32  ;;  %vm3149_vm7 = vcmp.ne.s32.totalorder %v489_v45, 0  ;;  %vm3175_vm4 = vcmp.ne.s32.totalorder %v541_v36, 0  ;;  %v3196_v36 = vsel %vm3130_vm14, 1, %v5765_v49 }
  0xf2   :  { %5764 = vst [vmem:[#allocation38_spill] sm:$0xff] %v3026_v61  ;;  %5788 = vst [vmem:[#allocation45_spill] sm:$0xff] %v5787_v32  ;;  %v5794_v60 = vsel %vm3149_vm7, 4294967295, %v5793_v60  ;;  %v5801_v56 = vsel %vm3175_vm4, 4294967295, %v5800_v56  ;;  %v3224_v2 = vsel %vm3149_vm7, 1, %v5765_v49  ;;  %v5846_v31 = vrot.slane %v3074_v34, %v2870_v46 }
  0xf3   :  { %v3067_v61 = vpop.permute.xlu1 %695  ;;  %1302 = vrot.lane.b32.xlu0 %v2688_v59, %s2615_s14  ;;  %5795 = vst [vmem:[#allocation48_spill] sm:$0xff] %v5794_v60  ;;  %5802 = vst [vmem:[#allocation50_spill] sm:$0xff] %v5801_v56  ;;  %v5853_v37 = vrot.slane %v3053_v63, %v2870_v46  ;;  %v5859_v63 = vrot.slane %v3031_v50, %v2870_v46  ;;  %vm5868_vm13 = vcmp.lt.s32.totalorder %v2916_v62, 50 }
  0xf4   :  { %5774 = vst [vmem:[#allocation41_spill] sm:$0xff] %v3067_v61  ;;  %v3101_v61 = vsel %vm3043_vm0, 1, %v5765_v49  ;;  %vm5796_vm0 = vcmp.ge.s32.totalorder %v2916_v62, 48 }
  0xf5   :  { %1304 = vrot.lane.b32.xlu1 %v2699_v3, %s2615_s14  ;;  %v3115_v57 = vpop.permute.xlu0 %700  ;;  %vm3157_vm1 = vmand %vm5796_vm0, %vm3088_vm5  ;;  %s3210_s14 = sld [smem:[#allocation7 + $0x3d]] }
  0xf6   :  { %5789 = vst [vmem:[#allocation46_spill] sm:$0xff] %v3115_v57  ;;  %v3173_v57 = vsel %vm3103_vm6, 1, %v5765_v49  ;;  %vm3183_vm3 = vmand %vm5796_vm0, %vm3107_vm11  ;;  %vm5805_vm0 = vcmp.ge.s32.totalorder %v2916_v62, 32  ;;  %v3219_v45 = vsel %vm3157_vm1, 1, %v5765_v49 }
  0xf7   :  { %v3161_v47 = vpop.permute.xlu1 %702  ;;  %1336 = vrot.lane.b32.xlu0 %v2684_v52, %s5634_s24  ;;  %vm3202_vm6 = vmand %vm5805_vm0, %vm2939_vm8  ;;  %v3242_v60 = vsel %vm3183_vm3, 1, %v5765_v49  ;;  %vm5664_vm3 = vcmp.ge.s32.totalorder %v2916_v62, 16 }
  0xf8   :  { %5799 = vst [vmem:[#allocation49_spill] sm:$0xff] %v3161_v47  ;;  %vm5809_vm14 = vmmov %vm5805_vm0  ;;  %v3271_v40 = vsel %vm3202_vm6, 1, %v5765_v49 }
  0xf9   :  { %1338 = vrot.lane.b32.xlu1 %v2693_v0, %s5634_s24  ;;  %v3208_v35 = vpop.permute.xlu0 %734  ;;  %vm3230_vm0 = vmand %vm5809_vm14, %vm2960_vm9  ;;  %5816 = vst [vmem:[#allocation53_spill] sm:$0xff] %v3271_v40 }
  0xfa   :  { %5808 = vst [vmem:[#allocation51_spill] sm:$0xff] %v3208_v35  ;;  %v3247_v35 = vsel %vm3175_vm4, 1, %v5765_v49  ;;  %vm5812_vm1 = vmmov %vm5809_vm14  ;;  %v3290_v56 = vsel %vm3230_vm0, 1, %v5765_v49 }
  0xfb   :  { %vm3253_vm14 = vmand %vm5812_vm1, %vm2985_vm12  ;;  %v3257_v51 = vpop.permute.xlu1 %736  ;;  %1343 = vrot.lane.b32.xlu0 %v2688_v59, %s5634_s24  ;;  %s3281_s24 = sld [smem:[#allocation7 + $0xe]]  ;;  %5820 = vst [vmem:[#allocation55_spill] sm:$0xff] %v3290_v56 }
  0xfc   :  { %5815 = vst [vmem:[#allocation52_spill] sm:$0xff] %v3257_v51  ;;  %vm3277_vm4 = vmand %vm5812_vm1, %vm3015_vm15  ;;  %v3331_v29 = vsel %vm3253_vm14, 1, %v5765_v49 }
  0xfd   :  { %1345 = vrot.lane.b32.xlu1 %v2699_v3, %s5821_s4  ;;  %vm5822_vm6 = vmmov %vm5812_vm1  ;;  %v3302_v42 = vpop.permute.xlu0 %741  ;;  %s3322_s4 = sld [smem:[#allocation7 + $0xf]]  ;;  %5829 = vst [vmem:[#allocation58_spill] sm:$0xff] %v3331_v29  ;;  %v6022_v43 = vld [vmem:[#allocation46_spill] sm:$0xff] }
  0xfe   :  { %vm3298_vm1 = vmand %vm5822_vm6, %vm3059_vm2  ;;  %5825 = vst [vmem:[#allocation56_spill] sm:$0xff] %v3302_v42 }
  0xff   :  { %vm3318_vm7 = vmand %vm5822_vm6, %vm3088_vm5  ;;  %v3333_v30 = vpop.permute.xlu1 %743  ;;  %1377 = vrot.lane.b32.xlu0 %v2684_v52, %s5647_s10  ;;  %s3365_s10 = sld [smem:[#allocation7 + $0x10]]  ;;  %v3372_v51 = vsel %vm3298_vm1, 1, %v5765_v49  ;;  %vm5849_vm1 = vcmp.lt.s32.totalorder %v2916_v62, 50 }
 0x100   :  { %5830 = vst [vmem:[#allocation59_spill] sm:$0xff] %v3333_v30  ;;  %vm3341_vm0 = vmand %vm5822_vm6, %vm3107_vm11  ;;  %v3355_v30 = vsel %vm3277_vm4, 1, %v5765_v49  ;;  %v3381_v56 = vsel %vm3318_vm7, 1, %v5765_v49  ;;  %vm3437_vm7 = vcmp.eq.s32.totalorder %v5846_v31, 1  ;;  %v270_v40 = vsel %vm5849_vm1, %v2779_v13, %v2777_v12 }
 0x101   :  { %5819 = sst [smem:[#allocation54_spill]] %s3281_s24  ;;  %vm3361_vm6 = vmand %vm5664_vm3, %vm2939_vm8  ;;  %5835 = vst [vmem:[#allocation60_spill] sm:$0xff] %v3372_v51  ;;  %1379 = vrot.lane.b32.xlu1 %v2693_v0, %s5836_s15  ;;  %v3376_v28 = vpop.permute.xlu0 %775  ;;  %v3390_v47 = vsel %vm3341_vm0, 1, %v5765_v49 }
 0x102   :  { %5837 = vst [vmem:[#allocation61_spill] sm:$0xff] %v3376_v28  ;;  %5838 = vst [vmem:[#allocation62_spill] sm:$0xff] %v3381_v56  ;;  %v3411_v58 = vsel %vm3361_vm6, 1, %v5765_v49  ;;  %s3479_s24 = sld [smem:[#allocation7 + $0x11]]  ;;  %v5869_v56 = vstv %s2864_s27 }
 0x103   :  { %5828 = sst [smem:[#allocation57_spill]] %s3322_s4  ;;  %5839 = vst [vmem:[#allocation63_spill] sm:$0xff] %v3390_v47  ;;  %vm3396_vm4 = vmand %vm5664_vm3, %vm2960_vm9  ;;  %v3404_v28 = vpop.permute.xlu1 %777  ;;  %1384 = vrot.lane.b32.xlu0 %v2688_v59, %s5836_s15  ;;  %s5870_s4 = smov 115  }
 0x104   :  { %5842 = vst [vmem:[#allocation64_spill] sm:$0xff] %v3404_v28  ;;  %5843 = vst [vmem:[#allocation65_spill] sm:$0xff] %v3411_v58  ;;  %v3432_v55 = vsel %vm3396_vm4, 1, %v5765_v49  ;;  %v5854_v28 = vmov 0  ;;  %s3589_s27 = sld [smem:[#allocation7 + $0x43]] }
 0x105   :  { %1386 = vrot.lane.b32.xlu1 %v2699_v3, %s5836_s15  ;;  %v3423_v38 = vpop.permute.xlu0 %782  ;;  %5845 = vst [vmem:[#allocation67_spill] sm:$0xff] %v3432_v55  ;;  %vm3454_vm6 = vmand %vm5664_vm3, %vm2985_vm12  ;;  %s5665_s15 = smov 115   ;;  %vm5866_vm3 = vcmp.lt.s32.totalorder %v2916_v62, 51  ;;  %v5874_v55 = vrot.slane %v3101_v61, %v2870_v46  ;;  %v5882_v61 = vstv %s2862_s26  ;;  %s3577_s26 = sld [smem:[#allocation7 + $0x12]]  ;;  %vm5908_vm12 = vcmp.lt.s32.totalorder %v2916_v62, 48 }
 0x106   :  { %5844 = vst [vmem:[#allocation66_spill] sm:$0xff] %v3423_v38  ;;  %vm5852_vm4 = vmmov %vm5849_vm1  ;;  %vm3465_vm1 = vcmp.eq.s32.totalorder %v5853_v37, 1  ;;  %v217_v58 = vsel %vm5866_vm3, %v2755_v5, %v2773_v11  ;;  %v3525_v47 = vsel %vm3454_vm6, 1, %v5765_v49  ;;  %vm5877_vm6 = vcmp.lt.s32.totalorder %v2916_v62, 49 }
 0x107   :  { %v264_v34 = vsel %vm5852_vm4, %v2761_v7, %v2758_v6  ;;  %v5855_v28 = vsel %vm3465_vm1, 4294967295, %v5854_v28  ;;  %vm5857_vm0 = vmmov %vm5852_vm4  ;;  %v3473_v29 = vpop.permute.xlu1 %784  ;;  %1418 = vrot.lane.b32.xlu0 %v2684_v52, %s5665_s15  ;;  %vm3484_vm4 = vcmp.eq.s32.totalorder %v5859_v63, 1  ;;  %s3506_s15 = sld [smem:[#allocation7 + $0x42]]  ;;  %v5872_v63 = vstv %s2848_s25 }
 0x108   :  { %5856 = vst [vmem:[#allocation68_spill] sm:$0xff] %v5855_v28  ;;  %v269_v42 = vsel %vm5857_vm0, %v2777_v12, %v2779_v13  ;;  %5858 = vst [vmem:[#allocation69_spill] sm:$0xff] %v3473_v29  ;;  %v5862_v12 = vrot.slane %v3036_v44, %v2870_v46  ;;  %v5863_v13 = vmov 0  ;;  %v263_v44 = vsel %vm5868_vm13, %v2758_v6, %v2761_v7 }
 0x109   :  { %vm5867_vm14 = vmmov %vm5866_vm3  ;;  %1420 = vrot.lane.b32.xlu1 %v2693_v0, %s5870_s4  ;;  %v287_v6 = vmul.f32 %v5872_v63, %v264_v34  ;;  %v322_v31 = vsel %vm5877_vm6, %v2785_v15, %v2783_v14  ;;  %v5884_v63 = vrot.slane %v3124_v48, %v2870_v46  ;;  %v5893_v29 = vstv %s2877_s28  ;;  %s2620_s28 = smov 113  }
 0x10a   :  { %vm3491_vm0 = vcmp.eq.s32.totalorder %v5862_v12, 1  ;;  %v218_v50 = vsel %vm5867_vm14, %v2773_v11, %v2755_v5  ;;  %v204_v12 = vsel %vm5866_vm3, %v2771_v10, %v2752_v4  ;;  %v290_v5 = vmul.f32 %v5869_v56, %v270_v40  ;;  %v3520_v11 = vpop.permute.xlu0 %816  ;;  %vm5873_vm13 = vmmov %vm5866_vm3 }
 0x10b   :  { %v5864_v13 = vsel %vm3491_vm0, 4294967295, %v5863_v13  ;;  %5871 = vst [vmem:[#allocation71_spill] sm:$0xff] %v3520_v11  ;;  %v203_v7 = vsel %vm5873_vm13, %v2752_v4, %v2771_v10  ;;  %v291_v40 = vmul.f32 %v5869_v56, %v269_v42  ;;  %vm3538_vm14 = vcmp.eq.s32.totalorder %v5874_v55, 1  ;;  %vm5881_vm10 = vmmov %vm5877_vm6  ;;  %v3573_v38 = vpop.permute.xlu1 %818  ;;  %1425 = vrot.lane.b32.xlu0 %v2688_v59, %s5870_s4 }
 0x10c   :  { %5865 = vst [vmem:[#allocation70_spill] sm:$0xff] %v5864_v13  ;;  %vm5878_vm3 = vcmp.ge.s32.totalorder %v2916_v62, 16  ;;  %v316_v10 = vsel %vm5881_vm10, %v2767_v9, %v2764_v8  ;;  %v238_v55 = vmul.f32 %v5882_v61, %v218_v50  ;;  %v5883_v42 = vmov %v5882_v61  ;;  %5888 = vst [vmem:[#allocation72_spill] sm:$0xff] %v3573_v38 }
 0x10d   :  { %vm3550_vm13 = vmand %vm5878_vm3, %vm3015_vm15  ;;  %v239_v34 = vmul.f32 %v5883_v42, %v217_v58  ;;  %vm3565_vm6 = vcmp.eq.s32.totalorder %v5884_v63, 1  ;;  %v5889_v58 = vstv %s2848_s25  ;;  %v5891_v61 = vstv %s2857_s0  ;;  %1427 = vrot.lane.b32.xlu1 %v2699_v3, %s5870_s4  ;;  %s2619_s25 = smov 114   ;;  %s3721_s0 = sld [smem:[#allocation7 + $0x44]]  ;;  %v6050_v28 = vld [vmem:[#allocation66_spill] sm:$0xff] }
 0x10e   :  { %vm5887_vm3 = vmmov %vm5881_vm10  ;;  %v288_v48 = vmul.f32 %v5889_v58, %v263_v44  ;;  %v235_v42 = vmul.f32 %v5891_v61, %v204_v12  ;;  %v292_v38 = vadd.f32 %v290_v5, %v287_v6  ;;  %v342_v51 = vmul.f32 %v5893_v29, %v322_v31  ;;  %v3597_v44 = vpop.permute.xlu0 %823  ;;  %s3875_s4 = sld [smem:[#allocation7 + $0x47]] }
 0x10f   :  { %v321_v39 = vsel %vm5887_vm3, %v2783_v14, %v2785_v15  ;;  %vm5890_vm10 = vmmov %vm5887_vm3  ;;  %v5892_v15 = vmov %v5891_v61  ;;  %vm5896_vm3 = vcmp.lt.s32.totalorder %v2916_v62, 48  ;;  %1459 = vrot.lane.b32.xlu0 %v2684_v52, %s2619_s25  ;;  %v5902_v61 = vrot.slane %v3147_v53, %v2870_v46  ;;  %v5999_v14 = vld [vmem:[#allocation22_spill] sm:$0xff] }
 0x110   :  { %v315_v50 = vsel %vm5890_vm10, %v2764_v8, %v2767_v9  ;;  %v236_v63 = vmul.f32 %v5892_v15, %v203_v7  ;;  %v3602_v8 = vsel %vm3550_vm13, 1, %v5765_v49  ;;  %v5894_v9 = vstv %s2853_s1  ;;  %vm5897_vm13 = vmmov %vm5896_vm3  ;;  %s3651_s1 = sld [smem:[#allocation7 + $0x13]] }
 0x111   :  { %v339_v12 = vmul.f32 %v5894_v9, %v316_v10  ;;  %v293_v58 = vadd.f32 %v291_v40, %v288_v48  ;;  %v5895_v7 = vmov %v5893_v29  ;;  %v240_v6 = vadd.f32 %v238_v55, %v235_v42  ;;  %v3619_v40 = vpop.permute.xlu1 %825  ;;  %vm5909_vm9 = vmmov %vm5908_vm12  ;;  %1461 = vrot.lane.b32.xlu1 %v2693_v0, %s2619_s25  ;;  %v6007_v29 = vld [vmem:[#allocation58_spill] sm:$0xff] }
 0x112   :  { %v343_v5 = vmul.f32 %v5895_v7, %v321_v39  ;;  %v241_v31 = vadd.f32 %v239_v34, %v236_v63  ;;  %v373_v4 = vsel %vm5896_vm3, %v2795_v18, %v2797_v19  ;;  %v374_v10 = vsel %vm5897_vm13, %v2797_v19, %v2795_v18  ;;  %v3665_v33 = vpop.permute.xlu0 %857  ;;  %v5953_v34 = vld [vmem:[#allocation15_spill] sm:$0xff] }
 0x113   :  { %v5898_v39 = vmov %v5894_v9  ;;  %v5899_v55 = vrot.slane %v3142_v1, %v2870_v46  ;;  %vm3635_vm3 = vcmp.eq.s32.totalorder %v5902_v61, 1  ;;  %vm5905_vm13 = vcmp.ge.s32.totalorder %v2916_v62, 16  ;;  %1466 = vrot.lane.b32.xlu0 %v2688_v59, %s2619_s25 }
 0x114   :  { %v340_v48 = vmul.f32 %v5898_v39, %v315_v50  ;;  %vm3647_vm15 = vmand %vm5905_vm13, %vm3059_vm2  ;;  %v306_v53 = vsel %vm3437_vm7, %v292_v38, 0.0  ;;  %v344_v15 = vadd.f32 %v342_v51, %v339_v12  ;;  %v367_v63 = vsel %vm5908_vm12, %v2789_v16, %v2791_v17 }
 0x115   :  { %vm3628_vm10 = vcmp.eq.s32.totalorder %v5899_v55, 1  ;;  %v368_v9 = vsel %vm5909_vm9, %v2791_v17, %v2789_v16  ;;  %v307_v38 = vsel %vm3465_vm1, %v293_v58, 0.0  ;;  %v5910_v12 = vstv %s2892_s30  ;;  %v3678_v61 = vpop.permute.xlu1 %859  ;;  %1468 = vrot.lane.b32.xlu1 %v2699_v3, %s2619_s25  ;;  %s3776_s30 = sld [smem:[#allocation7 + $0x45]]  ;;  %s2621_s25 = smov 112  }
 0x116   :  { %v345_v51 = vadd.f32 %v343_v5, %v340_v48  ;;  %v394_v7 = vmul.f32 %v5910_v12, %v374_v10  ;;  %v5911_v39 = vmov %v5910_v12  ;;  %v254_v16 = vsel %vm3484_vm4, %v240_v6, 0.0  ;;  %v5961_v6 = vld [vmem:[#allocation12_spill] sm:$0xff] }
 0x117   :  { %v395_v55 = vmul.f32 %v5911_v39, %v373_v4  ;;  %v255_v17 = vsel %vm3491_vm0, %v241_v31, 0.0  ;;  %v3686_v58 = vsel %vm3647_vm15, 1, %v5765_v49  ;;  %v308_v5 = vadd.f32 %v306_v53, %v254_v16  ;;  %1500 = vrot.lane.b32.xlu0 %v2684_v52, %s2620_s28 }
 0x118   :  { %5912 = vst [vmem:[#allocation73_spill] sm:$0xff] %v3686_v58  ;;  %v5913_v4 = vstv %s2882_s29  ;;  %v309_v12 = vadd.f32 %v307_v38, %v255_v17  ;;  %v358_v31 = vsel %vm3538_vm14, %v344_v15, 0.0  ;;  %v5915_v39 = vrot.slane %v3196_v36, %v2870_v46  ;;  %v3719_v15 = vpop.permute.xlu0 %864  ;;  %vm5923_vm14 = vmmov %vm5905_vm13  ;;  %s3769_s29 = sld [smem:[#allocation7 + $0x14]] }
 0x119   :  { %v391_v10 = vmul.f32 %v5913_v4, %v368_v9  ;;  %v5914_v48 = vmov %v5913_v4  ;;  %v5918_v1 = vrot.slane %v3173_v57, %v2870_v46  ;;  %vm5921_vm7 = vcmp.lt.s32.totalorder %v2916_v62, 47  ;;  %vm3731_vm13 = vmand %vm5923_vm14, %vm3088_vm5  ;;  %1502 = vrot.lane.b32.xlu1 %v2693_v0, %s2620_s28 }
 0x11a   :  { %v392_v37 = vmul.f32 %v5914_v48, %v367_v63  ;;  %vm3698_vm9 = vcmp.eq.s32.totalorder %v5915_v39, 1  ;;  %v425_v11 = vsel %vm5921_vm7, %v2807_v22, %v2809_v23  ;;  %vm5922_vm4 = vmmov %vm5921_vm7  ;;  %v359_v57 = vsel %vm3565_vm6, %v345_v51, 0.0  ;;  %v5960_v39 = vld [vmem:[#allocation13_spill] sm:$0xff] }
 0x11b   :  { %vm3705_vm15 = vcmp.eq.s32.totalorder %v5918_v1, 1  ;;  %v426_v36 = vsel %vm5922_vm4, %v2809_v23, %v2807_v22  ;;  %v396_v63 = vadd.f32 %v394_v7, %v391_v10  ;;  %vm5926_vm7 = vmmov %vm5922_vm4  ;;  %v420_v51 = vsel %vm5922_vm4, %v2803_v21, %v2801_v20  ;;  %1507 = vrot.lane.b32.xlu0 %v2688_v59, %s2620_s28 }
 0x11c   :  { %v397_v9 = vadd.f32 %v395_v55, %v392_v37  ;;  %v419_v23 = vsel %vm5926_vm7, %v2801_v20, %v2803_v21  ;;  %v5927_v7 = vrot.slane %v3219_v45, %v2870_v46  ;;  %v5930_v16 = vrot.slane %v3224_v2, %v2870_v46  ;;  %v3765_v21 = vpop.permute.xlu1 %866  ;;  %v5974_v55 = vld [vmem:[#allocation19_spill] sm:$0xff] }
 0x11d   :  { %vm5933_vm7 = vcmp.lt.s32.totalorder %v2916_v62, 46  ;;  %v360_v2 = vadd.f32 %v358_v31, %v308_v5  ;;  %v5935_v45 = vstv %s2911_s7  ;;  %v3788_v5 = vpop.permute.xlu0 %898  ;;  %v3793_v31 = vsel %vm3731_vm13, 1, %v5765_v49  ;;  %s3795_s7 = sld [smem:[#allocation7 + $0x15]]  ;;  %1509 = vrot.lane.b32.xlu1 %v2699_v3, %s2620_s28 }
 0x11e   :  { %vm3746_vm12 = vcmp.eq.s32.totalorder %v5927_v7, 1  ;;  %vm3753_vm14 = vcmp.eq.s32.totalorder %v5930_v16, 1  ;;  %v477_v4 = vsel %vm5933_vm7, %v2819_v26, %v2821_v27  ;;  %vm5934_vm4 = vmmov %vm5933_vm7  ;;  %v446_v10 = vmul.f32 %v5935_v45, %v426_v36  ;;  %5938 = vst [vmem:[#allocation74_spill] sm:$0xff] %v3793_v31  ;;  %s3922_s28 = sld [smem:[#allocation7 + $0x48]]  ;;  %v6026_v31 = vld [vmem:[#allocation38_spill] sm:$0xff] }
 0x11f   :  { %v478_v20 = vsel %vm5934_vm4, %v2821_v27, %v2819_v26  ;;  %v5936_v48 = vmov %v5935_v45  ;;  %v361_v26 = vadd.f32 %v359_v57, %v309_v12  ;;  %vm5937_vm7 = vmmov %vm5934_vm4  ;;  %v472_v1 = vsel %vm5934_vm4, %v2815_v25, %v2813_v24  ;;  %1541 = vrot.lane.b32.xlu0 %v2684_v52, %s2621_s25 }
 0x120   :  { %v447_v37 = vmul.f32 %v5936_v48, %v425_v11  ;;  %v471_v27 = vsel %vm5937_vm7, %v2813_v24, %v2815_v25  ;;  %v5940_v12 = vstv %s2903_s6  ;;  %v5942_v7 = vstv %s2929_s9  ;;  %s3844_s6 = sld [smem:[#allocation7 + $0x46]] }
 0x121   :  { %v443_v11 = vmul.f32 %v5940_v12, %v420_v51  ;;  %v5941_v36 = vmov %v5940_v12  ;;  %v498_v16 = vmul.f32 %v5942_v7, %v478_v20  ;;  %v5943_v24 = vmov %v5942_v7  ;;  %v3840_v12 = vpop.permute.xlu1 %900  ;;  %s3850_s9 = sld [smem:[#allocation7 + $0x16]]  ;;  %1543 = vrot.lane.b32.xlu1 %v2693_v0, %s2621_s25 }
 0x122   :  { %v444_v57 = vmul.f32 %v5941_v36, %v419_v23  ;;  %v499_v25 = vmul.f32 %v5943_v24, %v477_v4  ;;  %vm5944_vm4 = vcmp.ge.s32.totalorder %v2916_v62, 16  ;;  %v410_v51 = vsel %vm3628_vm10, %v396_v63, 0.0  ;;  %v5954_v63 = vld [vmem:[#allocation14_spill] sm:$0xff] }
 0x123   :  { %5939 = sst [smem:[#allocation75_spill]] %s3795_s7  ;;  %vm3810_vm13 = vmand %vm5944_vm4, %vm3107_vm11  ;;  %v411_v23 = vsel %vm3635_vm3, %v397_v9, 0.0  ;;  %v5947_v20 = vrot.slane %v3242_v60, %v2870_v46  ;;  %v5950_v45 = vrot.slane %v3247_v35, %v2870_v46  ;;  %vm5955_vm10 = vcmp.lt.s32.totalorder %v2916_v62, 45  ;;  %1548 = vrot.lane.b32.xlu0 %v2688_v59, %s2621_s25 }
 0x124   :  { %v529_v9 = vsel %vm5955_vm10, %v5954_v63, %v5953_v34  ;;  %vm5956_vm7 = vmmov %vm5955_vm10  ;;  %v448_v35 = vadd.f32 %v446_v10, %v443_v11  ;;  %v449_v36 = vadd.f32 %v447_v37, %v444_v57  ;;  %v5957_v7 = vstv %s2922_s8  ;;  %v3862_v10 = vpop.permute.xlu0 %905  ;;  %s5964_s8 = sld [smem:[#allocation29_spill]] }
 0x125   :  { %vm3821_vm5 = vcmp.eq.s32.totalorder %v5947_v20, 1  ;;  %vm3828_vm4 = vcmp.eq.s32.totalorder %v5950_v45, 1  ;;  %v530_v60 = vsel %vm5956_vm7, %v5953_v34, %v5954_v63  ;;  %v495_v24 = vmul.f32 %v5957_v7, %v472_v1  ;;  %vm5962_vm10 = vmmov %vm5956_vm7  ;;  %v3877_v38 = vpop.permute.xlu1 %907  ;;  %1550 = vrot.lane.b32.xlu1 %v2699_v3, %s2621_s25  ;;  %s3948_s7 = sld [smem:[#allocation7 + $0x18]] }
 0x126   :  { %v5958_v20 = vmov %v5957_v7  ;;  %v523_v34 = vsel %vm5956_vm7, %v5961_v6, %v5960_v39  ;;  %v524_v63 = vsel %vm5962_vm10, %v5960_v39, %v5961_v6  ;;  %v5965_v57 = vstv %s2953_s11  ;;  %s3892_s11 = sld [smem:[#allocation7 + $0x17]] }
 0x127   :  { %v496_v45 = vmul.f32 %v5958_v20, %v471_v27  ;;  %5959 = sst [smem:[#allocation76_spill]] %s3850_s9  ;;  %v3868_v27 = vsel %vm3810_vm13, 1, %v5765_v49  ;;  %v500_v1 = vadd.f32 %v498_v16, %v495_v24  ;;  %v550_v7 = vmul.f32 %v5965_v57, %v530_v60  ;;  %s2622_s9 = smov 111  }
 0x128   :  { %5963 = vst [vmem:[#allocation15_spill] sm:$0xff] %v3868_v27  ;;  %v5966_v20 = vmov %v5965_v57  ;;  %vm615_vm7 = vcmp.lt.s32.totalorder %v2916_v62, 34  ;;  %v412_v39 = vadd.f32 %v410_v51, %v360_v2  ;;  %v413_v37 = vadd.f32 %v411_v23, %v361_v26  ;;  %v3897_v23 = vpop.permute.xlu0 %939  ;;  %s3964_s25 = sld [smem:[#allocation7 + $0x49]]  ;;  %1582 = vrot.lane.b32.xlu0 %v2684_v52, %s2622_s9  ;;  %v6025_v27 = vld [vmem:[#allocation41_spill] sm:$0xff] }
 0x129   :  { %v501_v11 = vadd.f32 %v499_v25, %v496_v45  ;;  %v551_v6 = vmul.f32 %v5966_v20, %v529_v9  ;;  %v462_v22 = vsel %vm3698_vm9, %v448_v35, 0.0  ;;  %v463_v9 = vsel %vm3705_vm15, %v449_v36, 0.0  ;;  %v3912_v25 = vpop.permute.xlu1 %941  ;;  %v5971_v36 = vld [vmem:[#allocation31_spill] sm:$0xff]  ;;  %1584 = vrot.lane.b32.xlu1 %v2693_v0, %s2622_s9 }
 0x12a   :  { %v5967_v60 = vstv %s5964_s8  ;;  %vm656_vm13 = vcmp.lt.s32.totalorder %v2916_v62, 33  ;;  %v3906_v45 = vsel %vm2939_vm8, 1, %v5765_v49  ;;  %vm5972_vm8 = vnez %v5971_v36  ;;  %s5982_s8 = sld [smem:[#allocation32_spill]] }
 0x12b   :  { %v547_v2 = vmul.f32 %v5967_v60, %v524_v63  ;;  %v5968_v26 = vmov %v5967_v60  ;;  %5970 = vst [vmem:[#allocation14_spill] sm:$0xff] %v3906_v45  ;;  %v515_v63 = vsel %vm3753_vm14, %v501_v11, 0.0  ;;  %v464_v60 = vadd.f32 %v462_v22, %v412_v39 }
 0x12c   :  { %v548_v51 = vmul.f32 %v5968_v26, %v523_v34  ;;  %v514_v34 = vsel %vm3746_vm12, %v500_v1, 0.0  ;;  %v465_v26 = vadd.f32 %v463_v9, %v413_v37  ;;  %v3920_v24 = vsel %vm5972_vm8, 1, %v5765_v49  ;;  %v5975_v1 = vld [vmem:[#allocation18_spill] sm:$0xff]  ;;  %v5978_v9 = vld [vmem:[#allocation17_spill] sm:$0xff]  ;;  %1589 = vrot.lane.b32.xlu0 %v2688_v59, %s2622_s9 }
 0x12d   :  { %v552_v57 = vadd.f32 %v550_v7, %v547_v2  ;;  %5973 = vst [vmem:[#allocation13_spill] sm:$0xff] %v3920_v24  ;;  %vm5976_vm12 = vcmp.lt.s32.totalorder %v2916_v62, 35  ;;  %vm697_vm10 = vcmp.lt.s32.totalorder %v2916_v62, 32  ;;  %v516_v39 = vadd.f32 %v514_v34, %v464_v60  ;;  %v5979_v2 = vld [vmem:[#allocation16_spill] sm:$0xff]  ;;  %v5983_v60 = vld [vmem:[#allocation53_spill] sm:$0xff]  ;;  %1591 = vrot.lane.b32.xlu1 %v2699_v3, %s2622_s9  ;;  %s4801_s9 = sld [smem:[#allocation7 + $0x4e]] }
 0x12e   :  { %v553_v20 = vadd.f32 %v551_v6, %v548_v51  ;;  %v581_v11 = vsel %vm5976_vm12, %v5975_v1, %v5974_v55  ;;  %vm5977_vm9 = vmmov %vm5976_vm12  ;;  %v517_v22 = vadd.f32 %v515_v63, %v465_v26  ;;  %v5984_v26 = vrot.slane %v5983_v60, %v2870_v46  ;;  %v5989_v7 = vld [vmem:[#allocation25_spill] sm:$0xff] }
 0x12f   :  { %v582_v37 = vsel %vm5977_vm9, %v5974_v55, %v5975_v1  ;;  %vm5980_vm8 = vmmov %vm5977_vm9  ;;  %v3946_v55 = vpop.permute.xlu0 %946  ;;  %v566_v34 = vsel %vm3821_vm5, %v552_v57, 0.0  ;;  %v5987_v4 = vstv %s2990_s13  ;;  %s6001_s13 = sld [smem:[#allocation36_spill]]  ;;  %v6008_v32 = vrot.slane %v6007_v29, %v2870_v46  ;;  %v6041_v1 = vld [vmem:[#allocation52_spill] sm:$0xff] }
 0x130   :  { %v575_v51 = vsel %vm5980_vm8, %v5979_v2, %v5978_v9  ;;  %vm5981_vm12 = vmmov %vm5980_vm8  ;;  %v567_v63 = vsel %vm3828_vm4, %v553_v20, 0.0  ;;  %vm3957_vm9 = vcmp.eq.s32.totalorder %v5984_v26, 1  ;;  %v591_v6 = vmul.f32 %v5987_v4, %v582_v37  ;;  %v5990_v20 = vld [vmem:[#allocation23_spill] sm:$0xff] }
 0x131   :  { %v576_v36 = vsel %vm5981_vm12, %v5978_v9, %v5979_v2  ;;  %v5988_v57 = vmov %v5987_v4  ;;  %v622_v60 = vsel %vm615_vm7, %v5990_v20, %v5989_v7  ;;  %v623_v26 = vsel %vm615_vm7, %v5989_v7, %v5990_v20  ;;  %v3979_v9 = vpop.permute.xlu1 %948  ;;  %v5993_v2 = vld [vmem:[#allocation55_spill] sm:$0xff] }
 0x132   :  { %v592_v35 = vmul.f32 %v5988_v57, %v581_v11  ;;  %v5991_v11 = vstv %s5982_s8  ;;  %v5994_v19 = vrot.slane %v5993_v2, %v2870_v46  ;;  %vm5997_vm12 = vnez %v5753_v54  ;;  %s2634_s8 = smov 81  }
 0x133   :  { %v588_v37 = vmul.f32 %v5991_v11, %v576_v36  ;;  %v5992_v4 = vmov %v5991_v11  ;;  %v3998_v20 = vsel %vm5997_vm12, 1, %v5765_v49  ;;  %v568_v42 = vadd.f32 %v566_v34, %v516_v39  ;;  %v6000_v36 = vld [vmem:[#allocation21_spill] sm:$0xff]  ;;  %v4010_v54 = vpop.permute.xlu0 %980 }
 0x134   :  { %v589_v57 = vmul.f32 %v5992_v4, %v575_v51  ;;  %vm3990_vm8 = vcmp.eq.s32.totalorder %v5994_v19, 1  ;;  %5998 = vst [vmem:[#allocation12_spill] sm:$0xff] %v3998_v20  ;;  %v569_v50 = vadd.f32 %v567_v63, %v517_v22  ;;  %v616_v51 = vsel %vm615_vm7, %v6000_v36, %v5999_v14  ;;  %6002 = vst [vmem:[#allocation28_spill] sm:$0xff] %v4010_v54  ;;  %v6005_v63 = vld [vmem:[#allocation34_spill] sm:$0xff]  ;;  %v6006_v11 = vld [vmem:[#allocation30_spill] sm:$0xff] }
 0x135   :  { %v617_v19 = vsel %vm615_vm7, %v5999_v14, %v6000_v36  ;;  %v6003_v2 = vstv %s3022_s16  ;;  %v663_v4 = vsel %vm656_vm13, %v6006_v11, %v6005_v63  ;;  %v664_v14 = vsel %vm656_vm13, %v6005_v63, %v6006_v11  ;;  %s2623_s16 = smov 110  }
 0x136   :  { %v632_v39 = vmul.f32 %v6003_v2, %v623_v26  ;;  %v6004_v22 = vmov %v6003_v2  ;;  %v593_v36 = vadd.f32 %v591_v6, %v588_v37  ;;  %v594_v7 = vadd.f32 %v592_v35, %v589_v57  ;;  %v6015_v37 = vld [vmem:[#allocation26_spill] sm:$0xff]  ;;  %1623 = vrot.lane.b32.xlu0 %v2684_v52, %s2623_s16  ;;  %1625 = vrot.lane.b32.xlu1 %v2693_v0, %s2623_s16 }
 0x137   :  { %v633_v34 = vmul.f32 %v6004_v22, %v622_v60  ;;  %vm4027_vm7 = vcmp.eq.s32.totalorder %v6008_v32, 1  ;;  %v4031_v60 = vpop.permute.xlu1 %982  ;;  %v6012_v63 = vstv %s6001_s13  ;;  %v6014_v32 = vld [vmem:[#allocation27_spill] sm:$0xff]  ;;  %v6016_v2 = vstv %s3065_s18  ;;  %s2624_s18 = smov 109   ;;  %s4855_s13 = sld [smem:[#allocation7 + $0x50]] }
 0x138   :  { %6011 = vst [vmem:[#allocation31_spill] sm:$0xff] %v4031_v60  ;;  %v629_v35 = vmul.f32 %v6012_v63, %v617_v19  ;;  %v6013_v6 = vmov %v6012_v63  ;;  %v657_v57 = vsel %vm656_vm13, %v6015_v37, %v6014_v32  ;;  %v658_v11 = vsel %vm656_vm13, %v6014_v32, %v6015_v37 }
 0x139   :  { %v630_v29 = vmul.f32 %v6013_v6, %v616_v51  ;;  %v673_v22 = vmul.f32 %v6016_v2, %v664_v14  ;;  %v6017_v41 = vmov %v6016_v2  ;;  %v6018_v51 = vrot.slane %v3355_v30, %v2870_v46  ;;  %v6021_v6 = vld [vmem:[#allocation49_spill] sm:$0xff]  ;;  %v4072_v30 = vpop.permute.xlu0 %987 }
 0x13a   :  { %v674_v19 = vmul.f32 %v6017_v41, %v663_v4  ;;  %v704_v20 = vsel %vm697_vm10, %v6022_v43, %v6021_v6  ;;  %v705_v14 = vsel %vm697_vm10, %v6021_v6, %v6022_v43  ;;  %v634_v41 = vadd.f32 %v632_v39, %v629_v35  ;;  %1630 = vrot.lane.b32.xlu0 %v2688_v59, %s2623_s16 }
 0x13b   :  { %vm4058_vm5 = vcmp.eq.s32.totalorder %v6018_v51, 1  ;;  %v635_v4 = vadd.f32 %v633_v34, %v630_v29  ;;  %v6023_v37 = vstv %s3048_s17  ;;  %v698_v58 = vsel %vm697_vm10, %v6026_v31, %v6025_v27  ;;  %v4088_v6 = vpop.permute.xlu1 %989  ;;  %v6029_v29 = vld [vmem:[#allocation60_spill] sm:$0xff]  ;;  %s6039_s17 = sld [smem:[#allocation47_spill]]  ;;  %1632 = vrot.lane.b32.xlu1 %v2699_v3, %s2623_s16  ;;  %s2635_s16 = smov 80  }
 0x13c   :  { %v670_v51 = vmul.f32 %v6023_v37, %v658_v11  ;;  %v6024_v24 = vmov %v6023_v37  ;;  %v699_v43 = vsel %vm697_vm10, %v6025_v27, %v6026_v31  ;;  %v6027_v39 = vstv %s3113_s20  ;;  %v6033_v31 = vld [vmem:[#allocation59_spill] sm:$0xff]  ;;  %v6034_v27 = vld [vmem:[#allocation56_spill] sm:$0xff]  ;;  %s2628_s20 = smov 96  }
 0x13d   :  { %v671_v45 = vmul.f32 %v6024_v24, %v657_v57  ;;  %v714_v24 = vmul.f32 %v6027_v39, %v705_v14  ;;  %v6028_v34 = vmov %v6027_v39  ;;  %v6030_v57 = vrot.slane %v6029_v29, %v2870_v46 }
 0x13e   :  { %v715_v35 = vmul.f32 %v6028_v34, %v704_v20  ;;  %vm6035_vm10 = vcmp.lt.s32.totalorder %v2916_v62, 31  ;;  %v607_v20 = vsel %vm3957_vm9, %v593_v36, 0.0  ;;  %v608_v39 = vsel %vm3491_vm0, %v594_v7, 0.0  ;;  %v6042_v36 = vld [vmem:[#allocation51_spill] sm:$0xff]  ;;  %1664 = vrot.lane.b32.xlu0 %v2684_v52, %s2624_s18 }
 0x13f   :  { %vm4099_vm13 = vcmp.eq.s32.totalorder %v6030_v57, 1  ;;  %v745_v37 = vsel %vm6035_vm10, %v6034_v27, %v6033_v31  ;;  %vm6036_vm12 = vmmov %vm6035_vm10  ;;  %v675_v34 = vadd.f32 %v673_v22, %v670_v51  ;;  %v676_v29 = vadd.f32 %v674_v19, %v671_v45  ;;  %v4118_v57 = vpop.permute.xlu0 %1021  ;;  %1666 = vrot.lane.b32.xlu1 %v2693_v0, %s2624_s18 }
 0x140   :  { %v746_v14 = vsel %vm6036_vm12, %v6033_v31, %v6034_v27  ;;  %vm820_vm11 = vcmp.lt.s32.totalorder %v2916_v62, 29  ;;  %6037 = vst [vmem:[#allocation19_spill] sm:$0xff] %v4118_v57  ;;  %v6038_v32 = vstv %s3094_s19  ;;  %vm6043_vm9 = vmmov %vm6035_vm10  ;;  %v648_v22 = vsel %vm3990_vm8, %v634_v41, 0.0  ;;  %s2625_s19 = smov 99  }
 0x141   :  { %v711_v2 = vmul.f32 %v6038_v32, %v699_v43  ;;  %v6040_v54 = vmov %v6038_v32  ;;  %v739_v7 = vsel %vm6043_vm9, %v6042_v36, %v6041_v1  ;;  %vm6044_vm12 = vmmov %vm6043_vm9  ;;  %v649_v19 = vsel %vm3465_vm1, %v635_v4, 0.0  ;;  %v6049_v4 = vld [vmem:[#allocation69_spill] sm:$0xff] }
 0x142   :  { %v712_v31 = vmul.f32 %v6040_v54, %v698_v58  ;;  %v740_v45 = vsel %vm6044_vm12, %v6041_v1, %v6042_v36  ;;  %v6045_v32 = vstv %s3165_s3  ;;  %v4140_v54 = vpop.permute.xlu1 %1023  ;;  %v609_v27 = vadd.f32 %v607_v20, %v568_v42  ;;  %v6053_v20 = vld [vmem:[#allocation62_spill] sm:$0xff]  ;;  %1671 = vrot.lane.b32.xlu0 %v2688_v59, %s2624_s18  ;;  %s4647_s3 = sld [smem:[#allocation7 + $0x4a]] }
 0x143   :  { %v755_v51 = vmul.f32 %v6045_v32, %v746_v14  ;;  %v6046_v43 = vmov %v6045_v32  ;;  %v610_v57 = vadd.f32 %v608_v39, %v569_v50  ;;  %v716_v13 = vadd.f32 %v714_v24, %v711_v2  ;;  %v4159_v42 = vpop.permute.xlu0 %1028  ;;  %1673 = vrot.lane.b32.xlu1 %v2699_v3, %s2624_s18  ;;  %s4882_s18 = sld [smem:[#allocation7 + $0x51]] }
 0x144   :  { %v756_v58 = vmul.f32 %v6046_v43, %v745_v37  ;;  %v717_v60 = vadd.f32 %v715_v35, %v712_v31  ;;  %vm861_vm10 = vcmp.lt.s32.totalorder %v2916_v62, 19  ;;  %v6047_v16 = vstv %s6039_s17  ;;  %s4878_s17 = sld [smem:[#allocation7 + $0x20]] }
 0x145   :  { %v752_v41 = vmul.f32 %v6047_v16, %v740_v45  ;;  %v6048_v1 = vmov %v6047_v16  ;;  %vm6051_vm8 = vcmp.lt.s32.totalorder %v2916_v62, 30  ;;  %v650_v50 = vadd.f32 %v648_v22, %v609_v27  ;;  %v6057_v45 = vld [vmem:[#allocation64_spill] sm:$0xff]  ;;  %v6058_v22 = vld [vmem:[#allocation61_spill] sm:$0xff] }
 0x146   :  { %v753_v36 = vmul.f32 %v6048_v1, %v739_v7  ;;  %v786_v37 = vsel %vm6051_vm8, %v6050_v28, %v6049_v4  ;;  %vm6052_vm9 = vmmov %vm6051_vm8  ;;  %v651_v2 = vadd.f32 %v649_v19, %v610_v57  ;;  %v689_v24 = vsel %vm4027_vm7, %v675_v34, 0.0  ;;  %1705 = vrot.lane.b32.xlu0 %v2684_v52, %s2625_s19 }
 0x147   :  { %v787_v14 = vsel %vm6052_vm9, %v6049_v4, %v6050_v28  ;;  %v690_v35 = vsel %vm3565_vm6, %v676_v29, 0.0  ;;  %v6054_v39 = vrot.slane %v6053_v20, %v2870_v46  ;;  %v757_v31 = vadd.f32 %v755_v51, %v752_v41  ;;  %vm6059_vm7 = vmmov %vm6051_vm8  ;;  %v4181_v29 = vpop.permute.xlu1 %1030  ;;  %v4195_v41 = vpop.permute.xlu0 %1062  ;;  %1707 = vrot.lane.b32.xlu1 %v2693_v0, %s2625_s19 }
 0x148   :  { %v758_v7 = vadd.f32 %v756_v58, %v753_v36  ;;  %v780_v26 = vsel %vm6051_vm8, %v6058_v22, %v6057_v45  ;;  %v781_v34 = vsel %vm6059_vm7, %v6057_v45, %v6058_v22  ;;  %vm902_vm9 = vcmp.lt.s32.totalorder %v2916_v62, 18 }
 0x149   :  { %vm4168_vm12 = vcmp.eq.s32.totalorder %v6054_v39, 1  ;;  %v730_v57 = vsel %vm4058_vm5, %v716_v13, 0.0  ;;  %v731_v19 = vsel %vm3635_vm3, %v717_v60, 0.0  ;;  %v6060_v32 = vstv %s3210_s14  ;;  %s4692_s14 = sld [smem:[#allocation7 + $0x1a]] }
 0x14a   :  { %v796_v51 = vmul.f32 %v6060_v32, %v787_v14  ;;  %v6061_v43 = vmov %v6060_v32  ;;  %v691_v27 = vadd.f32 %v689_v24, %v650_v50  ;;  %v692_v16 = vadd.f32 %v690_v35, %v651_v2  ;;  %1712 = vrot.lane.b32.xlu0 %v2688_v59, %s2625_s19 }
 0x14b   :  { %v797_v58 = vmul.f32 %v6061_v43, %v786_v37  ;;  %v6062_v1 = vstv %s3948_s7  ;;  %v6063_v13 = vstv %s3964_s25  ;;  %v6064_v60 = vstv %s3187_s5  ;;  %v4224_v45 = vpop.permute.xlu1 %1064  ;;  %1714 = vrot.lane.b32.xlu1 %v2699_v3, %s2625_s19  ;;  %s2629_s5 = smov 95   ;;  %s4905_s19 = sld [smem:[#allocation7 + $0x21]] }
 0x14c   :  { %v4200_v36 = vmul.f32 %v6062_v1, %v2684_v52  ;;  %v4205_v63 = vmul.f32 %v6063_v13, %v2688_v59  ;;  %v793_v4 = vmul.f32 %v6064_v60, %v781_v34  ;;  %v6065_v14 = vmov %v6064_v60  ;;  %v6066_v34 = vld [vmem:[#allocation72_spill] sm:$0xff]  ;;  %v6074_v60 = vld [vmem:[#allocation65_spill] sm:$0xff] }
 0x14d   :  { %v794_v37 = vmul.f32 %v6065_v14, %v780_v26  ;;  %v827_v50 = vsel %vm820_vm11, %v3597_v44, %v3619_v40  ;;  %v828_v2 = vsel %vm820_vm11, %v3619_v40, %v3597_v44  ;;  %vm943_vm5 = vcmp.lt.s32.totalorder %v2916_v62, 17  ;;  %v6067_v44 = vld [vmem:[#allocation71_spill] sm:$0xff] }
 0x14e   :  { %v732_v24 = vadd.f32 %v730_v57, %v691_v27  ;;  %v733_v35 = vadd.f32 %v731_v19, %v692_v16  ;;  %v771_v20 = vsel %vm4099_vm13, %v757_v31, 0.0  ;;  %v772_v39 = vsel %vm3705_vm15, %v758_v7, 0.0  ;;  %v6068_v31 = vld [vmem:[#allocation63_spill] sm:$0xff]  ;;  %v4258_v16 = vpop.permute.xlu0 %1069  ;;  %v6108_v57 = vld [vmem:[#allocation28_spill] sm:$0xff] }
 0x14f   :  { %v798_v22 = vadd.f32 %v796_v51, %v793_v4  ;;  %v799_v26 = vadd.f32 %v797_v58, %v794_v37  ;;  %v821_v40 = vsel %vm820_vm11, %v6067_v44, %v6066_v34  ;;  %v822_v11 = vsel %vm820_vm11, %v6066_v34, %v6067_v44  ;;  %v6079_v37 = vld [vmem:[#allocation37_spill] sm:$0xff]  ;;  %v4289_v44 = vpop.permute.xlu1 %1071 }
 0x150   :  { %v6069_v7 = vrot.slane %v6068_v31, %v2870_v46  ;;  %v6072_v19 = vstv %s3261_s22  ;;  %v868_v58 = vsel %vm861_vm10, %v3719_v15, %v3765_v21  ;;  %v869_v27 = vsel %vm861_vm10, %v3765_v21, %v3719_v15  ;;  %s6083_s22 = sld [smem:[#allocation54_spill]] }
 0x151   :  { %v837_v32 = vmul.f32 %v6072_v19, %v828_v2  ;;  %v6073_v51 = vmov %v6072_v19  ;;  %vm984_vm11 = vcmp.lt.s32.totalorder %v2916_v62, 16  ;;  %v773_v1 = vadd.f32 %v771_v20, %v732_v24 }
 0x152   :  { %vm4239_vm13 = vcmp.eq.s32.totalorder %v6069_v7, 1  ;;  %v838_v43 = vmul.f32 %v6073_v51, %v827_v50  ;;  %v774_v13 = vadd.f32 %v772_v39, %v733_v35  ;;  %v6075_v4 = vrot.slane %v6074_v60, %v2870_v46 }
 0x153   :  { %v6078_v15 = vstv %s3964_s25  ;;  %vm6080_vm7 = vnez %v6079_v37  ;;  %v6081_v2 = vstv %s3234_s21  ;;  %v862_v20 = vsel %vm861_vm10, %v3665_v33, %v3678_v61  ;;  %v4318_v37 = vpop.permute.xlu0 %1103  ;;  %s2626_s21 = smov 98   ;;  %s4851_s25 = sld [smem:[#allocation7 + $0x1f]] }
 0x154   :  { %vm4263_vm8 = vcmp.eq.s32.totalorder %v6075_v4, 1  ;;  %v4270_v21 = vmul.f32 %v6078_v15, %v2699_v3  ;;  %v4275_v50 = vsel %vm6080_vm7, 1, %v5765_v49  ;;  %v834_v34 = vmul.f32 %v6081_v2, %v822_v11  ;;  %1746 = vrot.lane.b32.xlu0 %v2684_v52, %s2626_s21  ;;  %1748 = vrot.lane.b32.xlu1 %v2693_v0, %s2626_s21 }
 0x155   :  { %v6082_v24 = vmov %v6081_v2  ;;  %v863_v39 = vsel %vm861_vm10, %v3678_v61, %v3665_v33  ;;  %v6084_v11 = vstv %s3305_s2  ;;  %v909_v19 = vsel %vm902_vm9, %v3862_v10, %v3877_v38  ;;  %s6092_s2 = sld [smem:[#allocation57_spill]] }
 0x156   :  { %v835_v35 = vmul.f32 %v6082_v24, %v821_v40  ;;  %v878_v40 = vmul.f32 %v6084_v11, %v869_v27  ;;  %v6085_v31 = vmov %v6084_v11  ;;  %v910_v33 = vsel %vm902_vm9, %v3877_v38, %v3862_v10 }
 0x157   :  { %v879_v7 = vmul.f32 %v6085_v31, %v868_v58  ;;  %v812_v61 = vsel %vm4168_vm12, %v798_v22, 0.0  ;;  %v813_v51 = vsel %vm3753_vm14, %v799_v26, 0.0  ;;  %v839_v27 = vadd.f32 %v837_v32, %v834_v34  ;;  %v6086_v58 = vld [vmem:[#allocation67_spill] sm:$0xff] }
 0x158   :  { %v840_v60 = vadd.f32 %v838_v43, %v835_v35  ;;  %v6087_v4 = vrot.slane %v6086_v58, %v2870_v46  ;;  %v6090_v38 = vstv %s6083_s22  ;;  %v903_v26 = vsel %vm902_vm9, %v3788_v5, %v3840_v12  ;;  %1753 = vrot.lane.b32.xlu0 %v2688_v59, %s2626_s21  ;;  %1755 = vrot.lane.b32.xlu1 %v2699_v3, %s2626_s21  ;;  %s2636_s22 = smov 79   ;;  %s2637_s21 = smov 78  }
 0x159   :  { %v875_v10 = vmul.f32 %v6090_v38, %v863_v39  ;;  %v6091_v28 = vmov %v6090_v38  ;;  %v904_v32 = vsel %vm902_vm9, %v3840_v12, %v3788_v5  ;;  %v6093_v43 = vstv %s3345_s12  ;;  %v4345_v39 = vpop.permute.xlu1 %1105  ;;  %s6149_s12 = sld [smem:[#allocation75_spill]] }
 0x15a   :  { %vm4312_vm10 = vcmp.eq.s32.totalorder %v6087_v4, 1  ;;  %v876_v22 = vmul.f32 %v6091_v28, %v862_v20  ;;  %v919_v2 = vmul.f32 %v6093_v43, %v910_v33  ;;  %v6094_v34 = vmov %v6093_v43 }
 0x15b   :  { %v920_v24 = vmul.f32 %v6094_v34, %v909_v19  ;;  %v950_v35 = vsel %vm943_vm5, %v3946_v55, %v3979_v9  ;;  %v951_v20 = vsel %vm943_vm5, %v3979_v9, %v3946_v55  ;;  %v814_v5 = vadd.f32 %v812_v61, %v773_v1 }
 0x15c   :  { %v815_v12 = vadd.f32 %v813_v51, %v774_v13  ;;  %v880_v11 = vadd.f32 %v878_v40, %v875_v10  ;;  %v881_v31 = vadd.f32 %v879_v7, %v876_v22  ;;  %v6095_v19 = vrot.slane %v3525_v47, %v2870_v46  ;;  %v4371_v47 = vpop.permute.xlu0 %1110 }
 0x15d   :  { %v6098_v58 = vstv %s6092_s2  ;;  %v944_v38 = vsel %vm943_vm5, %v3897_v23, %v3912_v25  ;;  %v945_v1 = vsel %vm943_vm5, %v3912_v25, %v3897_v23  ;;  %vm1066_vm7 = vcmp.lt.s32.totalorder %v2916_v62, 14  ;;  %s4909_s2 = sld [smem:[#allocation7 + $0x52]] }
 0x15e   :  { %vm4352_vm9 = vcmp.eq.s32.totalorder %v6095_v19, 1  ;;  %v916_v4 = vmul.f32 %v6098_v58, %v904_v32  ;;  %v6099_v55 = vmov %v6098_v58  ;;  %v6100_v13 = vstv %s3419_s23  ;;  %v4396_v32 = vpop.permute.xlu1 %1112  ;;  %s6159_s23 = sld [smem:[#allocation76_spill]] }
 0x15f   :  { %v917_v9 = vmul.f32 %v6099_v55, %v903_v26  ;;  %v960_v40 = vmul.f32 %v6100_v13, %v951_v20  ;;  %v6101_v7 = vmov %v6100_v13  ;;  %v6102_v51 = vrot.slane %v3602_v8, %v2870_v46 }
 0x160   :  { %v961_v61 = vmul.f32 %v6101_v7, %v950_v35  ;;  %v991_v25 = vsel %vm984_vm11, %v4072_v30, %v4088_v6  ;;  %v992_v23 = vsel %vm984_vm11, %v4088_v6, %v4072_v30  ;;  %v853_v28 = vsel %vm4239_vm13, %v839_v27, 0.0  ;;  %v6107_v6 = vld [vmem:[#allocation31_spill] sm:$0xff] }
 0x161   :  { %vm4380_vm12 = vcmp.eq.s32.totalorder %v6102_v51, 1  ;;  %v854_v8 = vsel %vm3828_vm4, %v840_v60, 0.0  ;;  %v921_v22 = vadd.f32 %v919_v2, %v916_v4  ;;  %v922_v26 = vadd.f32 %v920_v24, %v917_v9  ;;  %v4422_v9 = vpop.permute.xlu0 %1144 }
 0x162   :  { %v6105_v43 = vstv %s3365_s10  ;;  %v985_v27 = vsel %vm984_vm11, %v6108_v57, %v6107_v6  ;;  %v986_v60 = vsel %vm984_vm11, %v6107_v6, %v6108_v57  ;;  %v894_v2 = vsel %vm4263_vm8, %v880_v11, 0.0  ;;  %s2627_s10 = smov 97  }
 0x163   :  { %v957_v34 = vmul.f32 %v6105_v43, %v945_v1  ;;  %v6106_v35 = vmov %v6105_v43  ;;  %v895_v20 = vsel %vm3491_vm0, %v881_v31, 0.0  ;;  %v6110_v19 = vstv %s3506_s15  ;;  %1787 = vrot.lane.b32.xlu0 %v2684_v52, %s2627_s10  ;;  %1789 = vrot.lane.b32.xlu1 %v2693_v0, %s2627_s10  ;;  %s4697_s15 = sld [smem:[#allocation7 + $0x4b]] }
 0x164   :  { %v958_v30 = vmul.f32 %v6106_v35, %v944_v38  ;;  %v1001_v58 = vmul.f32 %v6110_v19, %v992_v23  ;;  %v6111_v4 = vmov %v6110_v19  ;;  %v855_v38 = vadd.f32 %v853_v28, %v814_v5  ;;  %v6114_v35 = vld [vmem:[#allocation73_spill] sm:$0xff] }
 0x165   :  { %v1002_v55 = vmul.f32 %v6111_v4, %v991_v25  ;;  %v856_v1 = vadd.f32 %v854_v8, %v815_v12  ;;  %v962_v13 = vadd.f32 %v960_v40, %v957_v34  ;;  %v6112_v51 = vstv %s3479_s24  ;;  %v4444_v12 = vpop.permute.xlu1 %1146  ;;  %v1152_v15 = vpop.permute.xlu0 %1151  ;;  %s4634_s24 = sld [smem:[#allocation7 + $0x19]] }
 0x166   :  { %v963_v7 = vadd.f32 %v961_v61, %v958_v30  ;;  %v998_v43 = vmul.f32 %v6112_v51, %v986_v60  ;;  %v6113_v14 = vmov %v6112_v51  ;;  %v6115_v31 = vrot.slane %v6114_v35, %v2870_v46 }
 0x167   :  { %v999_v11 = vmul.f32 %v6113_v14, %v985_v27  ;;  %vm6118_vm13 = vcmp.lt.s32.totalorder %v2916_v62, 15  ;;  %v896_v40 = vadd.f32 %v894_v2, %v855_v38  ;;  %v897_v61 = vadd.f32 %v895_v20, %v856_v1  ;;  %v6125_v2 = vld [vmem:[#allocation74_spill] sm:$0xff]  ;;  %1794 = vrot.lane.b32.xlu0 %v2688_v59, %s2627_s10  ;;  %1796 = vrot.lane.b32.xlu1 %v2699_v3, %s2627_s10  ;;  %s4932_s10 = sld [smem:[#allocation7 + $0x22]] }
 0x168   :  { %vm4431_vm5 = vcmp.eq.s32.totalorder %v6115_v31, 1  ;;  %v1032_v25 = vsel %vm6118_vm13, %v4159_v42, %v4181_v29  ;;  %vm6119_vm11 = vmmov %vm6118_vm13  ;;  %v935_v28 = vsel %vm4312_vm10, %v921_v22, 0.0  ;;  %v936_v34 = vsel %vm3465_vm1, %v922_v26, 0.0 }
 0x169   :  { %v1033_v5 = vsel %vm6119_vm11, %v4181_v29, %v4159_v42  ;;  %vm1148_vm13 = vcmp.lt.s32.totalorder %v2916_v62, 3  ;;  %v1003_v30 = vadd.f32 %v1001_v58, %v998_v43  ;;  %v1004_v42 = vadd.f32 %v1002_v55, %v999_v11  ;;  %v6121_v29 = vld [vmem:[#allocation19_spill] sm:$0xff]  ;;  %vm6122_vm8 = vmmov %vm6119_vm11  ;;  %v1154_v51 = vpop.permute.xlu1 %1153 }
 0x16a   :  { %v1026_v6 = vsel %vm6119_vm11, %v6121_v29, %v4140_v54  ;;  %v1027_v57 = vsel %vm6122_vm8, %v4140_v54, %v6121_v29  ;;  %v6123_v22 = vstv %s3589_s27  ;;  %v6126_v20 = vrot.slane %v6125_v2, %v2870_v46  ;;  %s4729_s27 = sld [smem:[#allocation7 + $0x1b]] }
 0x16b   :  { %v1042_v26 = vmul.f32 %v6123_v22, %v1033_v5  ;;  %v6124_v27 = vmov %v6123_v22  ;;  %v1073_v54 = vsel %vm1066_vm7, %v4258_v16, %v4289_v44  ;;  %v1074_v58 = vsel %vm1066_vm7, %v4289_v44, %v4258_v16  ;;  %1828 = vrot.lane.b32.xlu0 %v2684_v52, %s2628_s20  ;;  %1830 = vrot.lane.b32.xlu1 %v2693_v0, %s2628_s20 }
 0x16c   :  { %v1043_v60 = vmul.f32 %v6124_v27, %v1032_v25  ;;  %vm4470_vm10 = vcmp.eq.s32.totalorder %v6126_v20, 1  ;;  %v937_v4 = vadd.f32 %v935_v28, %v896_v40  ;;  %v938_v55 = vadd.f32 %v936_v34, %v897_v61  ;;  %v1186_v40 = vpop.permute.xlu0 %1185 }
 0x16d   :  { %v976_v38 = vsel %vm4352_vm9, %v962_v13, 0.0  ;;  %v977_v1 = vsel %vm3565_vm6, %v963_v7, 0.0  ;;  %vm1189_vm8 = vcmp.lt.s32.totalorder %v2916_v62, 2  ;;  %v6129_v43 = vstv %s3577_s26  ;;  %s2630_s26 = smov 94  }
 0x16e   :  { %v1039_v16 = vmul.f32 %v6129_v43, %v1027_v57  ;;  %v6130_v44 = vmov %v6129_v43  ;;  %v1067_v33 = vsel %vm1066_vm7, %v4195_v41, %v4224_v45  ;;  %v1068_v13 = vsel %vm1066_vm7, %v4224_v45, %v4195_v41 }
 0x16f   :  { %v1040_v14 = vmul.f32 %v6130_v44, %v1026_v6  ;;  %v1017_v7 = vsel %vm4380_vm12, %v1003_v30, 0.0  ;;  %v1018_v11 = vsel %vm3635_vm3, %v1004_v42, 0.0  ;;  %v6131_v35 = vstv %s3721_s0  ;;  %v1188_v6 = vpop.permute.xlu1 %1187  ;;  %1835 = vrot.lane.b32.xlu0 %v2688_v59, %s2628_s20  ;;  %1837 = vrot.lane.b32.xlu1 %v2699_v3, %s2628_s20  ;;  %s2631_s0 = smov 93   ;;  %s2638_s20 = smov 77  }
 0x170   :  { %v1083_v31 = vmul.f32 %v6131_v35, %v1074_v58  ;;  %v6132_v25 = vmov %v6131_v35  ;;  %v978_v61 = vadd.f32 %v976_v38, %v937_v4  ;;  %v979_v28 = vadd.f32 %v977_v1, %v938_v55  ;;  %v6142_v4 = vld [vmem:[#allocation14_spill] sm:$0xff] }
 0x171   :  { %v1084_v5 = vmul.f32 %v6132_v25, %v1073_v54  ;;  %v1044_v34 = vadd.f32 %v1042_v26, %v1039_v16  ;;  %v1045_v29 = vadd.f32 %v1043_v60, %v1040_v14  ;;  %v6133_v41 = vstv %s3651_s1  ;;  %v6136_v60 = vld [vmem:[#allocation15_spill] sm:$0xff]  ;;  %v6152_v25 = vld [vmem:[#allocation13_spill] sm:$0xff]  ;;  %s4733_s1 = sld [smem:[#allocation7 + $0x4c]] }
 0x172   :  { %v1080_v45 = vmul.f32 %v6133_v41, %v1068_v13  ;;  %v6134_v10 = vmov %v6133_v41  ;;  %v4520_v42 = vadd.f32 %v4205_v63, %v4200_v36  ;;  %v6135_v57 = vstv %s3948_s7  ;;  %s2632_s7 = smov 83  }
 0x173   :  { %v1081_v30 = vmul.f32 %v6134_v10, %v1067_v33  ;;  %v4525_v22 = vmul.f32 %v6135_v57, %v2693_v0  ;;  %v1019_v26 = vadd.f32 %v1017_v7, %v978_v61  ;;  %v1020_v27 = vadd.f32 %v1018_v11, %v979_v28  ;;  %v1195_v11 = vpop.permute.xlu1 %1194  ;;  %1869 = vrot.lane.b32.xlu0 %v2684_v52, %s2629_s5 }
 0x174   :  { %v6137_v2 = vrot.slane %v6136_v60, %v2870_v46  ;;  %vm6140_vm7 = vcmp.lt.s32.totalorder %v2916_v62, 13  ;;  %v1085_v54 = vadd.f32 %v1083_v31, %v1080_v45  ;;  %v6143_v55 = vrot.slane %v6142_v4, %v2870_v46  ;;  %1871 = vrot.lane.b32.xlu1 %v2693_v0, %s2629_s5 }
 0x175   :  { %v1114_v36 = vsel %vm6140_vm7, %v4371_v47, %v4396_v32  ;;  %vm6141_vm11 = vmmov %vm6140_vm7  ;;  %v1086_v58 = vadd.f32 %v1084_v5, %v1081_v30  ;;  %v1155_v1 = vsel %vm1148_vm13, %v1152_v15, %v1154_v51  ;;  %v1156_v43 = vsel %vm1148_vm13, %v1154_v51, %v1152_v15 }
 0x176   :  { %vm4530_vm9 = vcmp.eq.s32.totalorder %v6137_v2, 1  ;;  %v1115_v63 = vsel %vm6141_vm11, %v4396_v32, %v4371_v47  ;;  %vm4545_vm12 = vcmp.eq.s32.totalorder %v6143_v55, 1  ;;  %v1193_v47 = vpop.permute.xlu0 %1192  ;;  %v1058_v32 = vsel %vm4431_vm5, %v1044_v34, 0.0  ;;  %vm6146_vm11 = vmmov %vm6140_vm7 }
 0x177   :  { %v1059_v16 = vsel %vm3705_vm15, %v1045_v29, 0.0  ;;  %v1108_v44 = vsel %vm6140_vm7, %v4318_v37, %v4345_v39  ;;  %v1109_v15 = vsel %vm6146_vm11, %v4345_v39, %v4318_v37  ;;  %v6147_v51 = vstv %s3776_s30  ;;  %1876 = vrot.lane.b32.xlu0 %v2688_v59, %s2629_s5  ;;  %s4768_s30 = sld [smem:[#allocation7 + $0x4d]] }
 0x178   :  { %v1124_v14 = vmul.f32 %v6147_v51, %v1115_v63  ;;  %v6148_v33 = vmov %v6147_v51  ;;  %v1149_v13 = vsel %vm1148_vm13, %v4422_v9, %v4444_v12  ;;  %v1150_v7 = vsel %vm1148_vm13, %v4444_v12, %v4422_v9  ;;  %v1229_v51 = vpop.permute.xlu1 %1228  ;;  %1878 = vrot.lane.b32.xlu1 %v2699_v3, %s2629_s5  ;;  %s4993_s5 = sld [smem:[#allocation7 + $0x55]] }
 0x179   :  { %v1125_v23 = vmul.f32 %v6148_v33, %v1114_v36  ;;  %v6150_v37 = vstv %s3844_s6  ;;  %v6153_v5 = vrot.slane %v6152_v25, %v2870_v46  ;;  %v6154_v61 = vmov 0  ;;  %s4797_s6 = sld [smem:[#allocation7 + $0x1d]] }
 0x17a   :  { %v1165_v39 = vmul.f32 %v6150_v37, %v1156_v43  ;;  %v6151_v35 = vmov %v6150_v37  ;;  %v1196_v9 = vsel %vm1189_vm8, %v1193_v47, %v1195_v11  ;;  %v1197_v12 = vsel %vm1189_vm8, %v1195_v11, %v1193_v47  ;;  %v1227_v30 = vpop.permute.xlu0 %1226 }
 0x17b   :  { %v1166_v31 = vmul.f32 %v6151_v35, %v1155_v1  ;;  %vm4588_vm5 = vcmp.eq.s32.totalorder %v6153_v5, 1  ;;  %v1099_v28 = vsel %vm4470_vm10, %v1085_v54, 0.0  ;;  %v1100_v34 = vsel %vm3753_vm14, %v1086_v58, 0.0  ;;  %v6161_v54 = vld [vmem:[#allocation12_spill] sm:$0xff]  ;;  %1910 = vrot.lane.b32.xlu0 %v2684_v52, %s2630_s26 }
 0x17c   :  { %v6155_v61 = vsel %vm4588_vm5, 4294967295, %v6154_v61  ;;  %v6156_v29 = vstv %s3769_s29  ;;  %vm1299_vm13 = vcmp.lt.s32.totalorder %v2916_v62, 127  ;;  %v6158_v57 = vstv %s6149_s12  ;;  %1912 = vrot.lane.b32.xlu1 %v2693_v0, %s2630_s26  ;;  %s4763_s29 = sld [smem:[#allocation7 + $0x1c]] }
 0x17d   :  { %v1121_v41 = vmul.f32 %v6156_v29, %v1109_v15  ;;  %v6157_v45 = vmov %v6156_v29  ;;  %v1162_v60 = vmul.f32 %v6158_v57, %v1150_v7  ;;  %v6160_v2 = vmov %v6158_v57  ;;  %s4936_s12 = sld [smem:[#allocation7 + $0x53]] }
 0x17e   :  { %v1122_v10 = vmul.f32 %v6157_v45, %v1108_v44  ;;  %v1163_v19 = vmul.f32 %v6160_v2, %v1149_v13  ;;  %v1190_v36 = vsel %vm1189_vm8, %v1186_v40, %v1188_v6  ;;  %v1191_v63 = vsel %vm1189_vm8, %v1188_v6, %v1186_v40 }
 0x17f   :  { %v6162_v58 = vrot.slane %v6161_v54, %v2870_v46  ;;  %v6163_v4 = vmov 0  ;;  %v1126_v55 = vadd.f32 %v1124_v14, %v1121_v41  ;;  %v6165_v43 = vstv %s3875_s4  ;;  %v1234_v14 = vpop.permute.xlu0 %1233  ;;  %1917 = vrot.lane.b32.xlu0 %v2688_v59, %s2630_s26  ;;  %s2633_s4 = smov 82  }
 0x180   :  { %v1127_v1 = vadd.f32 %v1125_v23, %v1122_v10  ;;  %v1206_v47 = vmul.f32 %v6165_v43, %v1197_v12  ;;  %v6166_v44 = vmov %v6165_v43  ;;  %v1060_v33 = vadd.f32 %v1058_v32, %v1019_v26  ;;  %v1236_v12 = vpop.permute.xlu1 %1235  ;;  %1919 = vrot.lane.b32.xlu1 %v2699_v3, %s2630_s26  ;;  %s5035_s26 = sld [smem:[#allocation7 + $0x26]] }
 0x181   :  { %vm4618_vm10 = vcmp.eq.s32.totalorder %v6162_v58, 1  ;;  %v1207_v15 = vmul.f32 %v6166_v44, %v1196_v9  ;;  %v1061_v13 = vadd.f32 %v1059_v16, %v1020_v27  ;;  %v1167_v40 = vadd.f32 %v1165_v39, %v1162_v60 }
 0x182   :  { %v6164_v4 = vsel %vm4618_vm10, 4294967295, %v6163_v4  ;;  %v1168_v6 = vadd.f32 %v1166_v31, %v1163_v19  ;;  %v6167_v7 = vstv %s6159_s23  ;;  %v1284_v23 = vrot.slane %v4275_v50, %v2870_v46  ;;  %s4965_s23 = sld [smem:[#allocation7 + $0x23]] }
 0x183   :  { %v1203_v11 = vmul.f32 %v6167_v7, %v1191_v63  ;;  %v6168_v37 = vmov %v6167_v7  ;;  %v4641_v26 = vsel %vm3059_vm2, 1, %v5765_v49  ;;  %v1101_v27 = vadd.f32 %v1099_v28, %v1060_v33  ;;  %1951 = vrot.lane.b32.xlu0 %v2684_v52, %s2631_s0 }
 0x184   :  { %v1204_v35 = vmul.f32 %v6168_v37, %v1190_v36  ;;  %v1102_v32 = vadd.f32 %v1100_v34, %v1061_v13  ;;  %vm6170_vm8 = vcmp.lt.s32.totalorder %v2916_v62, 1  ;;  %v1140_v50 = vsel %vm4530_vm9, %v1126_v55, 0.0  ;;  %v1296_v36 = vpop.permute.xlu0 %1295  ;;  %v1298_v44 = vpop.permute.xlu1 %1297  ;;  %1953 = vrot.lane.b32.xlu1 %v2693_v0, %s2631_s0 }
 0x185   :  { %v1231_v16 = vsel %vm6170_vm8, %v1227_v30, %v1229_v51  ;;  %vm6171_vm7 = vmmov %vm6170_vm8  ;;  %v1141_v31 = vsel %vm3828_vm4, %v1127_v1, 0.0  ;;  %v1208_v5 = vadd.f32 %v1206_v47, %v1203_v11  ;;  %v1181_v28 = vsel %vm4545_vm12, %v1167_v40, 0.0 }
 0x186   :  { %v1232_v39 = vsel %vm6171_vm7, %v1229_v51, %v1227_v30  ;;  %v1209_v9 = vadd.f32 %v1207_v15, %v1204_v35  ;;  %v1182_v34 = vsel %vm3491_vm0, %v1168_v6, 0.0  ;;  %vm6172_vm2 = vmmov %vm6171_vm7  ;;  %v6174_v41 = vstv %s3892_s11  ;;  %s4824_s11 = sld [smem:[#allocation7 + $0x1e]] }
 0x187   :  { %v1237_v29 = vsel %vm6172_vm2, %v1234_v14, %v1236_v12  ;;  %vm6173_vm9 = vmmov %vm6172_vm2  ;;  %v1244_v45 = vmul.f32 %v6174_v41, %v1232_v39  ;;  %v6175_v10 = vmov %v6174_v41  ;;  %v6176_v57 = vstv %s3922_s28  ;;  %1958 = vrot.lane.b32.xlu0 %v2688_v59, %s2631_s0  ;;  %s4828_s28 = sld [smem:[#allocation7 + $0x4f]] }
 0x188   :  { %v1238_v20 = vsel %vm6173_vm9, %v1236_v12, %v1234_v14  ;;  %v1245_v30 = vmul.f32 %v6175_v10, %v1231_v16  ;;  %v6177_v2 = vmov %v6176_v57  ;;  %v1142_v63 = vadd.f32 %v1140_v50, %v1101_v27  ;;  %v1303_v40 = vpop.permute.xlu0 %1302  ;;  %v1305_v35 = vpop.permute.xlu1 %1304  ;;  %v6182_v12 = vld [vmem:[#allocation43_spill] sm:$0xff]  ;;  %1960 = vrot.lane.b32.xlu1 %v2699_v3, %s2631_s0  ;;  %s5096_s0 = sld [smem:[#allocation7 + $0x58]] }
 0x189   :  { %v1247_v60 = vmul.f32 %v6176_v57, %v1238_v20  ;;  %v1248_v19 = vmul.f32 %v6177_v2, %v1237_v29  ;;  %v1143_v24 = vadd.f32 %v1141_v31, %v1102_v32  ;;  %vm4671_vm0 = vcmp.eq.s32.totalorder %v1284_v23, 1 }
 0x18a   :  { %v6178_v54 = vmov 0  ;;  %v1278_v58 = vadd.f32 %v4270_v21, %v4525_v22  ;;  %v1222_v55 = vsel %vm4588_vm5, %v1208_v5, 0.0  ;;  %v1223_v1 = vsel %vm3465_vm1, %v1209_v9, 0.0 }
 0x18b   :  { %v6179_v54 = vsel %vm4671_vm0, 4294967295, %v6178_v54  ;;  %v1249_v43 = vadd.f32 %v1247_v60, %v1244_v45  ;;  %v1250_v47 = vadd.f32 %v1248_v19, %v1245_v30  ;;  %v1183_v15 = vadd.f32 %v1181_v28, %v1142_v63  ;;  %1992 = vrot.lane.b32.xlu0 %v2684_v52, %s2632_s7 }
 0x18c   :  { %v1184_v51 = vadd.f32 %v1182_v34, %v1143_v24  ;;  %v1300_v33 = vsel %vm1299_vm13, %v1296_v36, %v1298_v44  ;;  %v1301_v21 = vsel %vm1299_vm13, %v1298_v44, %v1296_v36  ;;  %v1312_v13 = vstv %s4634_s24  ;;  %v1337_v18 = vpop.permute.xlu0 %1336  ;;  %v1339_v9 = vpop.permute.xlu1 %1338  ;;  %1994 = vrot.lane.b32.xlu1 %v2693_v0, %s2632_s7  ;;  %s4970_s24 = sld [smem:[#allocation7 + $0x54]] }
 0x18d   :  { %v1263_v22 = vsel %vm4618_vm10, %v1249_v43, 0.0  ;;  %v1264_v8 = vsel %vm3565_vm6, %v1250_v47, 0.0  ;;  %v1224_v6 = vadd.f32 %v1222_v55, %v1183_v15  ;;  %v1315_v11 = vstv %s4647_s3  ;;  %s4989_s3 = sld [smem:[#allocation7 + $0x24]] }
 0x18e   :  { %v1225_v7 = vadd.f32 %v1223_v1, %v1184_v51  ;;  %v1325_v37 = vrot.slane %v4641_v26, %v2870_v46  ;;  %v1291_v56 = vsel %vm4671_vm0, %v4520_v42, 0.0  ;;  %v1292_v14 = vsel %vm3635_vm3, %v1278_v58, 0.0 }
 0x18f   :  { %vm1340_vm1 = vcmp.lt.s32.totalorder %v2916_v62, 126  ;;  %v1265_v23 = vadd.f32 %v1263_v22, %v1224_v6  ;;  %v1306_v26 = vsel %vm1299_vm13, %v1303_v40, %v1305_v35  ;;  %v1307_v27 = vsel %vm1299_vm13, %v1305_v35, %v1303_v40  ;;  %v6186_v22 = vld [vmem:[#allocation45_spill] sm:$0xff]  ;;  %1999 = vrot.lane.b32.xlu0 %v2688_v59, %s2632_s7 }
 0x190   :  { %v1266_v25 = vadd.f32 %v1264_v8, %v1225_v7  ;;  %v1313_v32 = vmul.f32 %v1312_v13, %v1300_v33  ;;  %v1314_v16 = vmul.f32 %v1312_v13, %v1301_v21  ;;  %v1316_v39 = vmul.f32 %v1315_v11, %v1306_v26  ;;  %v1344_v57 = vpop.permute.xlu0 %1343  ;;  %v1346_v63 = vpop.permute.xlu1 %1345  ;;  %2001 = vrot.lane.b32.xlu1 %v2699_v3, %s2632_s7  ;;  %s5106_s7 = sld [smem:[#allocation7 + $0x29]] }
 0x191   :  { %v1317_v42 = vmul.f32 %v1315_v11, %v1307_v27  ;;  %vm4711_vm6 = vcmp.eq.s32.totalorder %v1325_v37, 1  ;;  %v6180_v50 = vmov 0  ;;  %vm6183_vm3 = vnez %v6182_v12  ;;  %v6188_v27 = vld [vmem:[#allocation33_spill] sm:$0xff] }
 0x192   :  { %v6181_v50 = vsel %vm4711_vm6, 4294967295, %v6180_v50  ;;  %v1318_v31 = vadd.f32 %v1316_v39, %v1313_v32  ;;  %v1361_v28 = vsel %vm6183_vm3, 1, %v5765_v49  ;;  %v1293_v34 = vadd.f32 %v1291_v56, %v1265_v23 }
 0x193   :  { %v1319_v5 = vadd.f32 %v1317_v42, %v1314_v16  ;;  %v1294_v29 = vadd.f32 %v1292_v14, %v1266_v25  ;;  %v1341_v20 = vsel %vm1340_vm1, %v1337_v18, %v1339_v9  ;;  %v1342_v41 = vsel %vm1340_vm1, %v1339_v9, %v1337_v18  ;;  %2033 = vrot.lane.b32.xlu0 %v2684_v52, %s2633_s4 }
 0x194   :  { %v1332_v45 = vsel %vm4711_vm6, %v1318_v31, 0.0  ;;  %v1353_v30 = vstv %s4692_s14  ;;  %v1356_v19 = vstv %s4697_s15  ;;  %v1366_v36 = vrot.slane %v1361_v28, %v2870_v46  ;;  %v1378_v44 = vpop.permute.xlu0 %1377  ;;  %v1380_v21 = vpop.permute.xlu1 %1379  ;;  %2035 = vrot.lane.b32.xlu1 %v2693_v0, %s2633_s4  ;;  %s5012_s14 = sld [smem:[#allocation7 + $0x25]] }
 0x195   :  { %v1333_v10 = vsel %vm3705_vm15, %v1319_v5, 0.0  ;;  %v1334_v60 = vadd.f32 %v1332_v45, %v1293_v34  ;;  %v1347_v53 = vsel %vm1340_vm1, %v1344_v57, %v1346_v63  ;;  %v1348_v24 = vsel %vm1340_vm1, %v1346_v63, %v1344_v57  ;;  %v6192_v63 = vld [vmem:[#allocation35_spill] sm:$0xff]  ;;  %s5016_s15 = sld [smem:[#allocation7 + $0x56]] }
 0x196   :  { %v1335_v2 = vadd.f32 %v1333_v10, %v1294_v29  ;;  %vm1381_vm15 = vcmp.lt.s32.totalorder %v2916_v62, 125  ;;  %v4742_v58 = vadd.s32 128, %v2916_v62  ;;  %v1354_v55 = vmul.f32 %v1353_v30, %v1341_v20 }
 0x197   :  { %v1355_v1 = vmul.f32 %v1353_v30, %v1342_v41  ;;  %v1357_v43 = vmul.f32 %v1356_v19, %v1347_v53  ;;  %v1358_v47 = vmul.f32 %v1356_v19, %v1348_v24  ;;  %vm4745_vm11 = vcmp.eq.s32.totalorder %v1366_v36, 1  ;;  %2040 = vrot.lane.b32.xlu0 %v2688_v59, %s2633_s4 }
 0x198   :  { %vm6187_vm13 = vnez %v6186_v22  ;;  %v1382_v13 = vsel %vm1381_vm15, %v1378_v44, %v1380_v21  ;;  %v1383_v40 = vsel %vm1381_vm15, %v1380_v21, %v1378_v44  ;;  %v1394_v11 = vstv %s4729_s27  ;;  %v1385_v37 = vpop.permute.xlu0 %1384  ;;  %v1387_v25 = vpop.permute.xlu1 %1386  ;;  %2042 = vrot.lane.b32.xlu1 %v2699_v3, %s2633_s4  ;;  %s5039_s27 = sld [smem:[#allocation7 + $0x57]] }
 0x199   :  { %v1359_v51 = vadd.f32 %v1357_v43, %v1354_v55  ;;  %v1360_v33 = vadd.f32 %v1358_v47, %v1355_v1  ;;  %v1402_v8 = vsel %vm6187_vm13, 1, %v5765_v49  ;;  %vm162_vm8 = vcmp.lt.s32.totalorder %v4742_v58, 240  ;;  %s5114_s4 = sld [smem:[#allocation7 + $0x5b]] }
 0x19a   :  { %v1397_v14 = vstv %s4733_s1  ;;  %v1407_v23 = vrot.slane %v1402_v8, %v2870_v46  ;;  %v1388_v17 = vsel %vm1381_vm15, %v1385_v37, %v1387_v25  ;;  %v1389_v26 = vsel %vm1381_vm15, %v1387_v25, %v1385_v37  ;;  %v6194_v25 = vld [vmem:[#allocation39_spill] sm:$0xff]  ;;  %s5094_s1 = sld [smem:[#allocation7 + $0x27]] }
 0x19b   :  { %v1373_v6 = vsel %vm4745_vm11, %v1359_v51, 0.0  ;;  %v1374_v7 = vsel %vm3753_vm14, %v1360_v33, 0.0  ;;  %vm1422_vm14 = vcmp.lt.s32.totalorder %v2916_v62, 115  ;;  %vm6189_vm7 = vnez %v6188_v27  ;;  %2074 = vrot.lane.b32.xlu0 %v2684_v52, %s2634_s8 }
 0x19c   :  { %v1375_v35 = vadd.f32 %v1373_v6, %v1334_v60  ;;  %v1376_v56 = vadd.f32 %v1374_v7, %v1335_v2  ;;  %vm1434_vm2 = vmand %vm162_vm8, %vm6189_vm7  ;;  %v1395_v32 = vmul.f32 %v1394_v11, %v1382_v13  ;;  %v1396_v16 = vmul.f32 %v1394_v11, %v1383_v40  ;;  %v1419_v18 = vpop.permute.xlu0 %1418  ;;  %v1421_v12 = vpop.permute.xlu1 %1420  ;;  %2076 = vrot.lane.b32.xlu1 %v2693_v0, %s2634_s8 }
 0x19d   :  { %v1398_v39 = vmul.f32 %v1397_v14, %v1388_v17  ;;  %v1399_v42 = vmul.f32 %v1397_v14, %v1389_v26  ;;  %vm4781_vm9 = vcmp.eq.s32.totalorder %v1407_v23, 1  ;;  %v1444_v28 = vsel %vm1434_vm2, 1, %v5765_v49 }
 0x19e   :  { %v1423_v34 = vsel %vm1422_vm14, %v1419_v18, %v1421_v12  ;;  %v1424_v29 = vsel %vm1422_vm14, %v1421_v12, %v1419_v18  ;;  %v1435_v45 = vstv %s4763_s29  ;;  %v1438_v60 = vstv %s4768_s30  ;;  %s5100_s29 = sld [smem:[#allocation7 + $0x28]] }
 0x19f   :  { %v1400_v5 = vadd.f32 %v1398_v39, %v1395_v32  ;;  %v1401_v9 = vadd.f32 %v1399_v42, %v1396_v16  ;;  %v1452_v2 = vrot.slane %v1444_v28, %v2870_v46  ;;  %vm6193_vm1 = vnez %v6192_v63  ;;  %2081 = vrot.lane.b32.xlu0 %v2688_v59, %s2634_s8  ;;  %s5102_s30 = sld [smem:[#allocation7 + $0x59]] }
 0x1a0   :  { %v1426_v10 = vpop.permute.xlu0 %1425  ;;  %v1428_v19 = vpop.permute.xlu1 %1427  ;;  %vm1475_vm3 = vmand %vm162_vm8, %vm6193_vm1  ;;  %v1436_v53 = vmul.f32 %v1435_v45, %v1423_v34  ;;  %v1437_v24 = vmul.f32 %v1435_v45, %v1424_v29  ;;  %v1476_v40 = vstv %s4797_s6  ;;  %v1479_v37 = vstv %s4801_s9  ;;  %2083 = vrot.lane.b32.xlu1 %v2699_v3, %s2634_s8  ;;  %s5108_s6 = sld [smem:[#allocation7 + $0x5a]] }
 0x1a1   :  { %v1414_v20 = vsel %vm4781_vm9, %v1400_v5, 0.0  ;;  %v1415_v41 = vsel %vm3828_vm4, %v1401_v9, 0.0  ;;  %v1429_v48 = vsel %vm1422_vm14, %v1426_v10, %v1428_v19  ;;  %v1430_v36 = vsel %vm1422_vm14, %v1428_v19, %v1426_v10  ;;  %s5112_s9 = sld [smem:[#allocation7 + $0x2a]] }
 0x1a2   :  { %v1416_v30 = vadd.f32 %v1414_v20, %v1375_v35  ;;  %v1417_v57 = vadd.f32 %v1415_v41, %v1376_v56  ;;  %vm1463_vm4 = vcmp.lt.s32.totalorder %v2916_v62, 114  ;;  %v1439_v55 = vmul.f32 %v1438_v60, %v1429_v48  ;;  %v6196_v48 = vld [vmem:[#allocation42_spill] sm:$0xff]  ;;  %s5137_s8 = sld [smem:[#allocation7 + $0x2c]] }
 0x1a3   :  { %v1440_v1 = vmul.f32 %v1438_v60, %v1430_v36  ;;  %vm1454_vm15 = vcmp.eq.s32.totalorder %v1452_v2, 1  ;;  %v1485_v33 = vsel %vm1475_vm3, 1, %v5765_v49  ;;  %vm1504_vm13 = vcmp.lt.s32.totalorder %v2916_v62, 113  ;;  %2115 = vrot.lane.b32.xlu0 %v2684_v52, %s2635_s16 }
 0x1a4   :  { %v1460_v43 = vpop.permute.xlu0 %1459  ;;  %v1441_v47 = vadd.f32 %v1439_v55, %v1436_v53  ;;  %v1462_v51 = vpop.permute.xlu1 %1461  ;;  %v1493_v35 = vrot.slane %v1485_v33, %v2870_v46  ;;  %vm6195_vm14 = vnez %v6194_v25  ;;  %v1517_v20 = vstv %s4824_s11  ;;  %2117 = vrot.lane.b32.xlu1 %v2693_v0, %s2635_s16  ;;  %s5123_s11 = sld [smem:[#allocation7 + $0x2b]] }
 0x1a5   :  { %v1442_v44 = vadd.f32 %v1440_v1, %v1437_v24  ;;  %v1464_v21 = vsel %vm1463_vm4, %v1460_v43, %v1462_v51  ;;  %v1465_v22 = vsel %vm1463_vm4, %v1462_v51, %v1460_v43  ;;  %vm1516_vm2 = vmand %vm162_vm8, %vm6195_vm14  ;;  %v1886_v27 = vstv %s5094_s1 }
 0x1a6   :  { %v1455_v8 = vsel %vm4545_vm12, %v1441_v47, 0.0  ;;  %v1477_v17 = vmul.f32 %v1476_v40, %v1464_v21  ;;  %v1478_v26 = vmul.f32 %v1476_v40, %v1465_v22  ;;  %vm1495_vm3 = vcmp.eq.s32.totalorder %v1493_v35, 1 }
 0x1a7   :  { %v1456_v13 = vsel %vm1454_vm15, %v1442_v44, 0.0  ;;  %v1457_v7 = vadd.f32 %v1455_v8, %v1416_v30  ;;  %v1526_v9 = vsel %vm1516_vm2, 1, %v5765_v49  ;;  %v1520_v30 = vstv %s4828_s28  ;;  %2122 = vrot.lane.b32.xlu0 %v2688_v59, %s2635_s16  ;;  %s5131_s28 = sld [smem:[#allocation7 + $0x5c]] }
 0x1a8   :  { %v1467_v6 = vpop.permute.xlu0 %1466  ;;  %v1458_v11 = vadd.f32 %v1456_v13, %v1417_v57  ;;  %v1469_v56 = vpop.permute.xlu1 %1468  ;;  %v1534_v57 = vrot.slane %v1526_v9, %v2870_v46  ;;  %vm6197_vm15 = vnez %v6196_v48  ;;  %v1558_v13 = vstv %s4851_s25  ;;  %2124 = vrot.lane.b32.xlu1 %v2699_v3, %s2635_s16  ;;  %s5146_s25 = sld [smem:[#allocation7 + $0x5d]] }
 0x1a9   :  { %v1470_v14 = vsel %vm1463_vm4, %v1467_v6, %v1469_v56  ;;  %v1471_v23 = vsel %vm1463_vm4, %v1469_v56, %v1467_v6  ;;  %vm1545_vm4 = vcmp.lt.s32.totalorder %v2916_v62, 112  ;;  %vm1557_vm2 = vmand %vm162_vm8, %vm6197_vm15  ;;  %s5161_s16 = sld [smem:[#allocation7 + $0x5e]] }
 0x1aa   :  { %v1480_v32 = vmul.f32 %v1479_v37, %v1470_v14  ;;  %v1481_v16 = vmul.f32 %v1479_v37, %v1471_v23  ;;  %v1567_v51 = vsel %vm1557_vm2, 1, %v5765_v49  ;;  %v6198_v23 = vld [vmem:[#allocation44_spill] sm:$0xff] }
 0x1ab   :  { %v1575_v37 = vrot.slane %v1567_v51, %v2870_v46  ;;  %2156 = vrot.lane.b32.xlu0 %v2684_v52, %s2636_s22  ;;  %vm6199_vm2 = vnez %v6198_v23 }
 0x1ac   :  { %v1501_v39 = vpop.permute.xlu0 %1500  ;;  %v1482_v42 = vadd.f32 %v1480_v32, %v1477_v17  ;;  %v1483_v18 = vadd.f32 %v1481_v16, %v1478_v26  ;;  %v1503_v5 = vpop.permute.xlu1 %1502  ;;  %2158 = vrot.lane.b32.xlu1 %v2693_v0, %s2636_s22 }
 0x1ad   :  { %v1505_v12 = vsel %vm1504_vm13, %v1501_v39, %v1503_v5  ;;  %v1506_v28 = vsel %vm1504_vm13, %v1503_v5, %v1501_v39 }
 0x1ae   :  { %v1496_v34 = vsel %vm4588_vm5, %v1482_v42, 0.0  ;;  %v1497_v29 = vsel %vm1495_vm3, %v1483_v18, 0.0  ;;  %v1518_v36 = vmul.f32 %v1517_v20, %v1505_v12  ;;  %v1519_v53 = vmul.f32 %v1517_v20, %v1506_v28 }
 0x1af   :  { %v1498_v45 = vadd.f32 %v1496_v34, %v1457_v7  ;;  %v1499_v10 = vadd.f32 %v1497_v29, %v1458_v11  ;;  %vm1536_vm3 = vcmp.eq.s32.totalorder %v1534_v57, 1  ;;  %v1561_v11 = vstv %s4855_s13  ;;  %2163 = vrot.lane.b32.xlu0 %v2688_v59, %s2636_s22  ;;  %s5153_s13 = sld [smem:[#allocation7 + $0x2d]] }
 0x1b0   :  { %v1508_v41 = vpop.permute.xlu0 %1507  ;;  %v1510_v60 = vpop.permute.xlu1 %1509  ;;  %v1599_v20 = vstv %s4878_s17  ;;  %2165 = vrot.lane.b32.xlu1 %v2699_v3, %s2636_s22  ;;  %s5189_s17 = sld [smem:[#allocation7 + $0x2e]] }
 0x1b1   :  { %v1511_v2 = vsel %vm1504_vm13, %v1508_v41, %v1510_v60  ;;  %v1512_v19 = vsel %vm1504_vm13, %v1510_v60, %v1508_v41  ;;  %vm1586_vm13 = vcmp.lt.s32.totalorder %v2916_v62, 111  ;;  %s5270_s22 = sld [smem:[#allocation7 + $0x2f]] }
 0x1b2   :  { %v1521_v24 = vmul.f32 %v1520_v30, %v1511_v2  ;;  %v1522_v55 = vmul.f32 %v1520_v30, %v1512_v19  ;;  %v1602_v30 = vstv %s4882_s18  ;;  %s5236_s18 = sld [smem:[#allocation7 + $0x5f]] }
 0x1b3   :  { %2197 = vrot.lane.b32.xlu0 %v2684_v52, %s2637_s21 }
 0x1b4   :  { %v1542_v1 = vpop.permute.xlu0 %1541  ;;  %v1523_v43 = vadd.f32 %v1521_v24, %v1518_v36  ;;  %v1524_v47 = vadd.f32 %v1522_v55, %v1519_v53  ;;  %v1544_v44 = vpop.permute.xlu1 %1543  ;;  %v6200_v36 = vld [vmem:[#allocation48_spill] sm:$0xff]  ;;  %2199 = vrot.lane.b32.xlu1 %v2693_v0, %s2637_s21 }
 0x1b5   :  { %v1546_v33 = vsel %vm1545_vm4, %v1542_v1, %v1544_v44  ;;  %v1547_v21 = vsel %vm1545_vm4, %v1544_v44, %v1542_v1 }
 0x1b6   :  { %v1537_v22 = vsel %vm4618_vm10, %v1523_v43, 0.0  ;;  %v1538_v8 = vsel %vm1536_vm3, %v1524_v47, 0.0  ;;  %vm1598_vm3 = vmand %vm162_vm8, %vm6199_vm2  ;;  %v1559_v17 = vmul.f32 %v1558_v13, %v1546_v33  ;;  %v1560_v26 = vmul.f32 %v1558_v13, %v1547_v21 }
 0x1b7   :  { %v1539_v6 = vadd.f32 %v1537_v22, %v1498_v45  ;;  %v1540_v7 = vadd.f32 %v1538_v8, %v1499_v10  ;;  %vm1577_vm10 = vcmp.eq.s32.totalorder %v1575_v37, 1  ;;  %v1608_v9 = vsel %vm1598_vm3, 1, %v5765_v49  ;;  %2204 = vrot.lane.b32.xlu0 %v2688_v59, %s2637_s21 }
 0x1b8   :  { %v1549_v40 = vpop.permute.xlu0 %1548  ;;  %v1551_v35 = vpop.permute.xlu1 %1550  ;;  %v1616_v57 = vrot.slane %v1608_v9, %v2870_v46  ;;  %2206 = vrot.lane.b32.xlu1 %v2699_v3, %s2637_s21  ;;  %v1643_v37 = vstv %s4909_s2  ;;  %s5499_s2 = sld [smem:[#allocation7 + $0x30]] }
 0x1b9   :  { %v1552_v56 = vsel %vm1545_vm4, %v1549_v40, %v1551_v35  ;;  %v1553_v14 = vsel %vm1545_vm4, %v1551_v35, %v1549_v40  ;;  %vm6201_vm4 = vnez %v6200_v36  ;;  %v1640_v40 = vstv %s4905_s19  ;;  %s5328_s19 = sld [smem:[#allocation7 + $0x60]] }
 0x1ba   :  { %v1562_v32 = vmul.f32 %v1561_v11, %v1552_v56  ;;  %v1563_v16 = vmul.f32 %v1561_v11, %v1553_v14  ;;  %vm1639_vm3 = vmand %vm162_vm8, %vm6201_vm4  ;;  %vm1618_vm2 = vcmp.eq.s32.totalorder %v1616_v57, 1  ;;  %s5511_s21 = sld [smem:[#allocation7 + $0x61]] }
 0x1bb   :  { %v1649_v33 = vsel %vm1639_vm3, 1, %v5765_v49  ;;  %2238 = vrot.lane.b32.xlu0 %v2684_v52, %s2638_s20 }
 0x1bc   :  { %v1583_v39 = vpop.permute.xlu0 %1582  ;;  %v1564_v42 = vadd.f32 %v1562_v32, %v1559_v17  ;;  %v1565_v18 = vadd.f32 %v1563_v16, %v1560_v26  ;;  %v1585_v5 = vpop.permute.xlu1 %1584  ;;  %v1657_v35 = vrot.slane %v1649_v33, %v2870_v46  ;;  %v6202_v26 = vld [vmem:[#allocation50_spill] sm:$0xff]  ;;  %2240 = vrot.lane.b32.xlu1 %v2693_v0, %s2638_s20 }
 0x1bd   :  { %v1587_v12 = vsel %vm1586_vm13, %v1583_v39, %v1585_v5  ;;  %v1588_v28 = vsel %vm1586_vm13, %v1585_v5, %v1583_v39 }
 0x1be   :  { %v1578_v34 = vsel %vm4671_vm0, %v1564_v42, 0.0  ;;  %v1579_v29 = vsel %vm1577_vm10, %v1565_v18, 0.0  ;;  %vm1627_vm10 = vcmp.lt.s32.totalorder %v2916_v62, 110  ;;  %v1600_v53 = vmul.f32 %v1599_v20, %v1587_v12 }
 0x1bf   :  { %v1580_v45 = vadd.f32 %v1578_v34, %v1539_v6  ;;  %v1581_v10 = vadd.f32 %v1579_v29, %v1540_v7  ;;  %v1601_v24 = vmul.f32 %v1599_v20, %v1588_v28  ;;  %2245 = vrot.lane.b32.xlu0 %v2688_v59, %s2638_s20 }
 0x1c0   :  { %v1590_v41 = vpop.permute.xlu0 %1589  ;;  %v1592_v60 = vpop.permute.xlu1 %1591  ;;  %2247 = vrot.lane.b32.xlu1 %v2699_v3, %s2638_s20  ;;  %s6250_s20 = sld [smem:[#allocation77_spill]] }
 0x1c1   :  { %v1593_v2 = vsel %vm1586_vm13, %v1590_v41, %v1592_v60  ;;  %v1594_v19 = vsel %vm1586_vm13, %v1592_v60, %v1590_v41  ;;  %vm1668_vm13 = vcmp.lt.s32.totalorder %v2916_v62, 109  ;;  %v1681_v41 = vstv %s4932_s10 }
 0x1c2   :  { %v1603_v55 = vmul.f32 %v1602_v30, %v1593_v2  ;;  %v1604_v1 = vmul.f32 %v1602_v30, %v1594_v19  ;;  %v1684_v30 = vstv %s4936_s12 }
 0x1c4   :  { %v1624_v43 = vpop.permute.xlu0 %1623  ;;  %v1605_v47 = vadd.f32 %v1603_v55, %v1600_v53  ;;  %v1606_v44 = vadd.f32 %v1604_v1, %v1601_v24  ;;  %v1626_v51 = vpop.permute.xlu1 %1625 }
 0x1c5   :  { %v1628_v21 = vsel %vm1627_vm10, %v1624_v43, %v1626_v51  ;;  %v1629_v22 = vsel %vm1627_vm10, %v1626_v51, %v1624_v43 }
 0x1c6   :  { %v1619_v8 = vsel %vm4711_vm6, %v1605_v47, 0.0  ;;  %v1620_v13 = vsel %vm1618_vm2, %v1606_v44, 0.0  ;;  %vm6203_vm2 = vnez %v6202_v26  ;;  %v1641_v32 = vmul.f32 %v1640_v40, %v1628_v21 }
 0x1c7   :  { %v1621_v7 = vadd.f32 %v1619_v8, %v1580_v45  ;;  %v1622_v11 = vadd.f32 %v1620_v13, %v1581_v10  ;;  %vm1680_vm3 = vmand %vm162_vm8, %vm6203_vm2  ;;  %v1642_v16 = vmul.f32 %v1640_v40, %v1629_v22  ;;  %vm4949_vm6 = vcmp.eq.s32.totalorder %v1657_v35, 1 }
 0x1c8   :  { %v1631_v6 = vpop.permute.xlu0 %1630  ;;  %v1633_v56 = vpop.permute.xlu1 %1632  ;;  %v1690_v28 = vsel %vm1680_vm3, 1, %v5765_v49  ;;  %vm172_vm8 = vcmp.lt.s32.totalorder %v4742_v58, 224  ;;  %v1722_v13 = vstv %s4965_s23  ;;  %s2640_s23 = smov [#allocation8]  }
 0x1c9   :  { %v1634_v14 = vsel %vm1627_vm10, %v1631_v6, %v1633_v56  ;;  %v1635_v17 = vsel %vm1627_vm10, %v1633_v56, %v1631_v6  ;;  %v1698_v57 = vrot.slane %v1690_v28, %v2870_v46  ;;  %vm1721_vm10 = vmand %vm172_vm8, %vm6189_vm7 }
 0x1ca   :  { %v1644_v39 = vmul.f32 %v1643_v37, %v1634_v14  ;;  %v1645_v42 = vmul.f32 %v1643_v37, %v1635_v17  ;;  %v1731_v51 = vsel %vm1721_vm10, 1, %v5765_v49  ;;  %vm1762_vm10 = vmand %vm172_vm8, %vm6193_vm1 }
 0x1cb   :  { %vm1700_vm3 = vcmp.eq.s32.totalorder %v1698_v57, 1  ;;  %v1739_v37 = vrot.slane %v1731_v51, %v2870_v46 }
 0x1cc   :  { %v1665_v52 = vpop.permute.xlu0 %1664  ;;  %v1646_v5 = vadd.f32 %v1644_v39, %v1641_v32  ;;  %v1647_v9 = vadd.f32 %v1645_v42, %v1642_v16  ;;  %v1667_v12 = vpop.permute.xlu1 %1666 }
 0x1cd   :  { %v1669_v34 = vsel %vm1668_vm13, %v1665_v52, %v1667_v12  ;;  %v1670_v29 = vsel %vm1668_vm13, %v1667_v12, %v1665_v52 }
 0x1ce   :  { %v1660_v0 = vsel %vm4745_vm11, %v1646_v5, 0.0  ;;  %v1661_v20 = vsel %vm4949_vm6, %v1647_v9, 0.0  ;;  %vm1709_vm6 = vcmp.lt.s32.totalorder %v2916_v62, 99  ;;  %v1682_v3 = vmul.f32 %v1681_v41, %v1669_v34 }
 0x1cf   :  { %v1662_v59 = vadd.f32 %v1660_v0, %v1621_v7  ;;  %v1663_v10 = vadd.f32 %v1661_v20, %v1622_v11  ;;  %v1683_v53 = vmul.f32 %v1681_v41, %v1670_v29  ;;  %v1725_v11 = vstv %s4970_s24  ;;  %s2349_s24 = sshll.u32 %s2640_s23, 4  ;;  %s2350_s24 = int_to_ptr.vmem [resolvable:$true] %s2349_s24 }
 0x1d0   :  { %v1672_v45 = vpop.permute.xlu0 %1671  ;;  %v1674_v60 = vpop.permute.xlu1 %1673  ;;  %v1772_v9 = vsel %vm1762_vm10, 1, %v5765_v49  ;;  %v1763_v0 = vstv %s4989_s3  ;;  %vm1803_vm10 = vmand %vm172_vm8, %vm6195_vm14  ;;  %s2560_s3 = scalar_lea.vmem %s2350_s24, 256  ;;  %p2565_p11 = scmp.lt.s32.totalorder %s2350_s24, %s2350_s24 }
 0x1d1   :  { %v1675_v2 = vsel %vm1668_vm13, %v1672_v45, %v1674_v60  ;;  %v1676_v19 = vsel %vm1668_vm13, %v1674_v60, %v1672_v45  ;;  %vm1750_vm13 = vcmp.lt.s32.totalorder %v2916_v62, 98  ;;  %p2561_p10 = scmp.ne.s32.totalorder %s2350_s24, %s2560_s3  ;;  %p2566_p12 = scmp.lt.s32.totalorder %s2560_s3, %s2560_s3 }
 0x1d2   :  { %v1685_v24 = vmul.f32 %v1684_v30, %v1675_v2  ;;  %v1686_v55 = vmul.f32 %v1684_v30, %v1676_v19 }
 0x1d3   :  { %p2567_p13 = por %p2566_p12, %p2565_p11 }
 0x1d4   :  { %v1706_v1 = vpop.permute.xlu0 %1705  ;;  %v1687_v43 = vadd.f32 %v1685_v24, %v1682_v3  ;;  %v1688_v47 = vadd.f32 %v1686_v55, %v1683_v53  ;;  %v1708_v44 = vpop.permute.xlu1 %1707 }
 0x1d5   :  { %v1710_v33 = vsel %vm1709_vm6, %v1706_v1, %v1708_v44  ;;  %v1711_v21 = vsel %vm1709_vm6, %v1708_v44, %v1706_v1  ;;  %p2568_p0 = pnand %p2567_p13, %p2561_p10 }
 0x1d6   :  { %v1701_v22 = vsel %vm4781_vm9, %v1687_v43, 0.0  ;;  %v1702_v8 = vsel %vm1700_vm3, %v1688_v47, 0.0  ;;  %v1723_v17 = vmul.f32 %v1722_v13, %v1710_v33  ;;  %v1724_v32 = vmul.f32 %v1722_v13, %v1711_v21 }
 0x1d7   :  { %v1703_v6 = vadd.f32 %v1701_v22, %v1662_v59  ;;  %v1704_v7 = vadd.f32 %v1702_v8, %v1663_v10  ;;  %vm1741_vm3 = vcmp.eq.s32.totalorder %v1739_v37, 1  ;;  %v1766_v59 = vstv %s4993_s5 }
 0x1d8   :  { %v1713_v40 = vpop.permute.xlu0 %1712  ;;  %v1715_v35 = vpop.permute.xlu1 %1714  ;;  %v1780_v10 = vrot.slane %v1772_v9, %v2870_v46  ;;  %v1813_v47 = vsel %vm1803_vm10, 1, %v5765_v49  ;;  %v1804_v22 = vstv %s5012_s14  ;;  %vm1844_vm10 = vmand %vm172_vm8, %vm6197_vm15 }
 0x1d9   :  { %v1716_v56 = vsel %vm1709_vm6, %v1713_v40, %v1715_v35  ;;  %v1717_v14 = vsel %vm1709_vm6, %v1715_v35, %v1713_v40  ;;  %vm1791_vm6 = vcmp.lt.s32.totalorder %v2916_v62, 97 }
 0x1da   :  { %v1726_v16 = vmul.f32 %v1725_v11, %v1716_v56  ;;  %v1727_v39 = vmul.f32 %v1725_v11, %v1717_v14 }
 0x1dc   :  { %v1747_v42 = vpop.permute.xlu0 %1746  ;;  %v1728_v52 = vadd.f32 %v1726_v16, %v1723_v17  ;;  %v1729_v18 = vadd.f32 %v1727_v39, %v1724_v32  ;;  %v1749_v5 = vpop.permute.xlu1 %1748 }
 0x1dd   :  { %v1751_v12 = vsel %vm1750_vm13, %v1747_v42, %v1749_v5  ;;  %v1752_v28 = vsel %vm1750_vm13, %v1749_v5, %v1747_v42 }
 0x1de   :  { %v1742_v34 = vsel %vm4545_vm12, %v1728_v52, 0.0  ;;  %v1743_v29 = vsel %vm1741_vm3, %v1729_v18, 0.0  ;;  %v1764_v2 = vmul.f32 %v1763_v0, %v1751_v12  ;;  %v1765_v19 = vmul.f32 %v1763_v0, %v1752_v28 }
 0x1df   :  { %v1744_v41 = vadd.f32 %v1742_v34, %v1703_v6  ;;  %v1745_v45 = vadd.f32 %v1743_v29, %v1704_v7  ;;  %vm1782_vm3 = vcmp.eq.s32.totalorder %v1780_v10, 1  ;;  %v1807_v6 = vstv %s5016_s15 }
 0x1e0   :  { %v1754_v20 = vpop.permute.xlu0 %1753  ;;  %v1756_v30 = vpop.permute.xlu1 %1755  ;;  %v1821_v7 = vrot.slane %v1813_v47, %v2870_v46  ;;  %v1854_v18 = vsel %vm1844_vm10, 1, %v5765_v49  ;;  %v1845_v34 = vstv %s5035_s26 }
 0x1e1   :  { %v1757_v57 = vsel %vm1750_vm13, %v1754_v20, %v1756_v30  ;;  %v1758_v60 = vsel %vm1750_vm13, %v1756_v30, %v1754_v20  ;;  %vm1832_vm13 = vcmp.lt.s32.totalorder %v2916_v62, 96 }
 0x1e2   :  { %v1767_v3 = vmul.f32 %v1766_v59, %v1757_v57  ;;  %v1768_v53 = vmul.f32 %v1766_v59, %v1758_v60 }
 0x1e4   :  { %v1788_v24 = vpop.permute.xlu0 %1787  ;;  %v1769_v55 = vadd.f32 %v1767_v3, %v1764_v2  ;;  %v1770_v1 = vadd.f32 %v1768_v53, %v1765_v19  ;;  %v1790_v43 = vpop.permute.xlu1 %1789 }
 0x1e5   :  { %v1792_v44 = vsel %vm1791_vm6, %v1788_v24, %v1790_v43  ;;  %v1793_v51 = vsel %vm1791_vm6, %v1790_v43, %v1788_v24 }
 0x1e6   :  { %v1783_v33 = vsel %vm4588_vm5, %v1769_v55, 0.0  ;;  %v1784_v21 = vsel %vm1782_vm3, %v1770_v1, 0.0  ;;  %v1805_v56 = vmul.f32 %v1804_v22, %v1792_v44  ;;  %v1806_v14 = vmul.f32 %v1804_v22, %v1793_v51 }
 0x1e7   :  { %v1785_v13 = vadd.f32 %v1783_v33, %v1744_v41  ;;  %v1786_v40 = vadd.f32 %v1784_v21, %v1745_v45  ;;  %vm1823_vm3 = vcmp.eq.s32.totalorder %v1821_v7, 1  ;;  %v1848_v41 = vstv %s5039_s27 }
 0x1e8   :  { %v1795_v8 = vpop.permute.xlu0 %1794  ;;  %v1797_v11 = vpop.permute.xlu1 %1796  ;;  %v1862_v45 = vrot.slane %v1854_v18, %v2870_v46 }
 0x1e9   :  { %v1798_v37 = vsel %vm1791_vm6, %v1795_v8, %v1797_v11  ;;  %v1799_v35 = vsel %vm1791_vm6, %v1797_v11, %v1795_v8  ;;  %vm6206_vm6 = vnez %v6164_v4 }
 0x1ea   :  { %v1808_v17 = vmul.f32 %v1807_v6, %v1798_v37  ;;  %v1809_v32 = vmul.f32 %v1807_v6, %v1799_v35  ;;  %vm1864_vm10 = vcmp.eq.s32.totalorder %v1862_v45, 1  ;;  %v1971_v45 = vstv %s5108_s6 }
 0x1ec   :  { %v1829_v16 = vpop.permute.xlu0 %1828  ;;  %v1810_v39 = vadd.f32 %v1808_v17, %v1805_v56  ;;  %v1811_v42 = vadd.f32 %v1809_v32, %v1806_v14  ;;  %v1831_v52 = vpop.permute.xlu1 %1830 }
 0x1ed   :  { %v1833_v5 = vsel %vm1832_vm13, %v1829_v16, %v1831_v52  ;;  %v1834_v9 = vsel %vm1832_vm13, %v1831_v52, %v1829_v16  ;;  %v1889_v52 = vstv %s5096_s0 }
 0x1ee   :  { %v1824_v12 = vsel %vm6206_vm6, %v1810_v39, 0.0  ;;  %v1825_v28 = vsel %vm1823_vm3, %v1811_v42, 0.0  ;;  %v1846_v57 = vmul.f32 %v1845_v34, %v1833_v5  ;;  %v1847_v60 = vmul.f32 %v1845_v34, %v1834_v9  ;;  %vm1967_vm6 = vmand %vm172_vm8, %vm6203_vm2 }
 0x1ef   :  { %v1826_v0 = vadd.f32 %v1824_v12, %v1785_v13  ;;  %v1827_v20 = vadd.f32 %v1825_v28, %v1786_v40  ;;  %v1977_v18 = vsel %vm1967_vm6, 1, %v5765_v49  ;;  %v1927_v9 = vstv %s5100_s29 }
 0x1f0   :  { %v1836_v29 = vpop.permute.xlu0 %1835  ;;  %v1838_v59 = vpop.permute.xlu1 %1837  ;;  %v1930_v28 = vstv %s5102_s30 }
 0x1f1   :  { %v1839_v10 = vsel %vm1832_vm13, %v1836_v29, %v1838_v59  ;;  %v1840_v30 = vsel %vm1832_vm13, %v1838_v59, %v1836_v29  ;;  %vm6207_vm13 = vnez %v6198_v23  ;;  %v1985_v59 = vrot.slane %v1977_v18, %v2870_v46 }
 0x1f2   :  { %v1849_v2 = vmul.f32 %v1848_v41, %v1839_v10  ;;  %v1850_v19 = vmul.f32 %v1848_v41, %v1840_v30  ;;  %vm1885_vm3 = vmand %vm172_vm8, %vm6207_vm13  ;;  %v1968_v41 = vstv %s5106_s7  ;;  %v2009_v10 = vstv %s5112_s9 }
 0x1f3   :  { %v1895_v16 = vsel %vm1885_vm3, 1, %v5765_v49  ;;  %vm1873_vm3 = vcmp.lt.s32.totalorder %v2916_v62, 95 }
 0x1f4   :  { %v5064_v3 = vpop.permute.xlu0 %1869  ;;  %v1851_v53 = vadd.f32 %v1849_v2, %v1846_v57  ;;  %v1852_v24 = vadd.f32 %v1850_v19, %v1847_v60  ;;  %v5066_v55 = vpop.permute.xlu1 %1871  ;;  %v1903_v63 = vrot.slane %v1895_v16, %v2870_v46  ;;  %v2012_v57 = vstv %s5114_s4 }
 0x1f5   :  { %v1875_v16 = vsel %vm1873_vm3, %v5066_v55, %v5064_v3 }
 0x1f6   :  { %v1865_v1 = vsel %vm4671_vm0, %v1851_v53, 0.0  ;;  %v1866_v43 = vsel %vm1864_vm10, %v1852_v24, 0.0  ;;  %vm182_vm10 = vcmp.lt.s32.totalorder %v4742_v58, 208  ;;  %vm1926_vm0 = vmand %vm172_vm8, %vm6201_vm4  ;;  %v1888_v24 = vmul.f32 %v1886_v27, %v1875_v16 }
 0x1f7   :  { %v5072_v44 = vadd.f32 %v1865_v1, %v1826_v0  ;;  %v5074_v51 = vadd.f32 %v1866_v43, %v1827_v20  ;;  %vm2008_vm5 = vmand %vm182_vm10, %vm6189_vm7  ;;  %v1936_v42 = vsel %vm1926_vm0, 1, %v5765_v49  ;;  %vm1914_vm0 = vcmp.lt.s32.totalorder %v2916_v62, 94 }
 0x1f8   :  { %v5070_v47 = vpop.permute.xlu0 %1876  ;;  %v1879_v33 = vpop.permute.xlu1 %1878  ;;  %vm2049_vm8 = vmand %vm182_vm10, %vm6193_vm1  ;;  %v5167_v12 = vsel %vm2008_vm5, 1, %v5765_v49  ;;  %v1944_v34 = vrot.slane %v1936_v42, %v2870_v46  ;;  %vm1955_vm7 = vcmp.lt.s32.totalorder %v2916_v62, 93  ;;  %vm1996_vm5 = vcmp.lt.s32.totalorder %v2916_v62, 83 }
 0x1f9   :  { %v5173_v29 = vsel %vm2049_vm8, 1, %v5765_v49  ;;  %vm5181_vm1 = vmand %vm182_vm10, %vm6195_vm14  ;;  %v1880_v30 = vsel %vm1873_vm3, %v5070_v47, %v1879_v33  ;;  %v1881_v25 = vsel %vm1873_vm3, %v1879_v33, %v5070_v47  ;;  %v2026_v60 = vrot.slane %v5167_v12, %v2870_v46 }
 0x1fa   :  { %vm5203_vm14 = vcmp.eq.s32.totalorder %v1903_v63, 1  ;;  %v2067_v1 = vrot.slane %v5173_v29, %v2870_v46  ;;  %v5214_v43 = vsel %vm5181_vm1, 1, %v5765_v49  ;;  %vm5220_vm6 = vmand %vm182_vm10, %vm6197_vm15  ;;  %v1874_v33 = vsel %vm1873_vm3, %v5064_v3, %v5066_v55 }
 0x1fb   :  { %v1890_v63 = vmul.f32 %v1889_v52, %v1880_v30  ;;  %v1891_v12 = vmul.f32 %v1889_v52, %v1881_v25  ;;  %vm5246_vm15 = vcmp.eq.s32.totalorder %v1944_v34, 1  ;;  %v2108_v30 = vrot.slane %v5214_v43, %v2870_v46 }
 0x1fc   :  { %v5076_v21 = vpop.permute.xlu0 %1910  ;;  %v5078_v22 = vpop.permute.xlu1 %1912  ;;  %v5259_v42 = vsel %vm5220_vm6, 1, %v5765_v49  ;;  %v1887_v18 = vmul.f32 %v1886_v27, %v1874_v33  ;;  %vm2037_vm8 = vcmp.lt.s32.totalorder %v2916_v62, 82  ;;  %vm5272_vm3 = vcmp.eq.s32.totalorder %v1985_v59, 1 }
 0x1fd   :  { %v1893_v16 = vadd.f32 %v1891_v12, %v1888_v24  ;;  %v2173_v59 = vstv %s5189_s17  ;;  %vm6222_vm1 = vnez %v6181_v50  ;;  %vm2119_vm6 = vcmp.lt.s32.totalorder %v2916_v62, 80 }
 0x1fe   :  { %v1892_v33 = vadd.f32 %v1890_v63, %v1887_v18 }
 0x200   :  { %v5080_v8 = vpop.permute.xlu0 %1917  ;;  %v5082_v13 = vpop.permute.xlu1 %1919 }
 0x201   :  { %v1921_v20 = vsel %vm1914_vm0, %v5080_v8, %v5082_v13  ;;  %v1922_v53 = vsel %vm1914_vm0, %v5082_v13, %v5080_v8  ;;  %v1915_v8 = vsel %vm1914_vm0, %v5076_v21, %v5078_v22  ;;  %v1916_v13 = vsel %vm1914_vm0, %v5078_v22, %v5076_v21  ;;  %vm5293_vm0 = vmand %vm182_vm10, %vm6207_vm13 }
 0x202   :  { %v1931_v34 = vmul.f32 %v1930_v28, %v1921_v20  ;;  %v1932_v47 = vmul.f32 %v1930_v28, %v1922_v53  ;;  %v2149_v28 = vrot.slane %v5259_v42, %v2870_v46  ;;  %v1928_v20 = vmul.f32 %v1927_v9, %v1915_v8 }
 0x203   :  { %v1929_v25 = vmul.f32 %v1927_v9, %v1916_v13  ;;  %vm5307_vm13 = vcmp.eq.s32.totalorder %v2026_v60, 1  ;;  %v2176_v60 = vstv %s5236_s18  ;;  %v5326_v8 = vsel %vm5293_vm0, 1, %v5765_v49 }
 0x204   :  { %v5084_v40 = vpop.permute.xlu0 %1951  ;;  %v5086_v6 = vpop.permute.xlu1 %1953  ;;  %vm6243_vm0 = vnez %v6155_v61 }
 0x205   :  { %v1957_v23 = vsel %vm1955_vm7, %v5086_v6, %v5084_v40  ;;  %v1934_v12 = vadd.f32 %v1932_v47, %v1929_v25  ;;  %v1907_v47 = vsel %vm5203_vm14, %v1893_v16, 0.0  ;;  %vm5385_vm14 = vmand %vm182_vm10, %vm6201_vm4  ;;  %vm2160_vm4 = vcmp.lt.s32.totalorder %v2916_v62, 79 }
 0x208   :  { %v5088_v7 = vpop.permute.xlu0 %1958  ;;  %v5090_v11 = vpop.permute.xlu1 %1960 }
 0x209   :  { %v1962_v27 = vsel %vm1955_vm7, %v5088_v7, %v5090_v11  ;;  %v1963_v21 = vsel %vm1955_vm7, %v5090_v11, %v5088_v7  ;;  %v1956_v7 = vsel %vm1955_vm7, %v5084_v40, %v5086_v6  ;;  %v1933_v6 = vadd.f32 %v1931_v34, %v1928_v20 }
 0x20a   :  { %v1972_v24 = vmul.f32 %v1971_v45, %v1962_v27  ;;  %v1973_v18 = vmul.f32 %v1971_v45, %v1963_v21  ;;  %vm2078_vm7 = vcmp.lt.s32.totalorder %v2916_v62, 81  ;;  %v1969_v13 = vmul.f32 %v1968_v41, %v1956_v7 }
 0x20b   :  { %v1906_v34 = vsel %vm6222_vm1, %v1892_v33, 0.0  ;;  %v2190_v7 = vrot.slane %v5326_v8, %v2870_v46 }
 0x20c   :  { %v5092_v37 = vpop.permute.xlu0 %1992  ;;  %v5098_v35 = vpop.permute.xlu1 %1994  ;;  %v1974_v53 = vadd.f32 %v1972_v24, %v1969_v13  ;;  %v1908_v16 = vadd.f32 %v1906_v34, %v5072_v44  ;;  %v1909_v24 = vadd.f32 %v1907_v47, %v5074_v51 }
 0x20d   :  { %v1998_v25 = vsel %vm1996_vm5, %v5098_v35, %v5092_v37 }
 0x210   :  { %v5104_v56 = vpop.permute.xlu0 %1999  ;;  %v5110_v14 = vpop.permute.xlu1 %2001 }
 0x211   :  { %v2003_v9 = vsel %vm1996_vm5, %v5104_v56, %v5110_v14  ;;  %v2004_v40 = vsel %vm1996_vm5, %v5110_v14, %v5104_v56  ;;  %v1970_v56 = vmul.f32 %v1968_v41, %v1957_v23  ;;  %v1997_v14 = vsel %vm1996_vm5, %v5092_v37, %v5098_v35 }
 0x212   :  { %v2013_v27 = vmul.f32 %v2012_v57, %v2003_v9  ;;  %v2014_v41 = vmul.f32 %v2012_v57, %v2004_v40  ;;  %v2214_v23 = vstv %s5270_s22  ;;  %v2010_v37 = vmul.f32 %v2009_v10, %v1997_v14 }
 0x213   :  { %v1975_v20 = vadd.f32 %v1973_v18, %v1970_v56  ;;  %v2011_v35 = vmul.f32 %v2009_v10, %v1998_v25  ;;  %v1947_v10 = vsel %vm4745_vm11, %v1933_v6, 0.0  ;;  %v1948_v18 = vsel %vm5246_vm15, %v1934_v12, 0.0 }
 0x214   :  { %v5116_v17 = vpop.permute.xlu0 %2033  ;;  %v5129_v32 = vpop.permute.xlu1 %2035  ;;  %vm5377_vm5 = vcmp.eq.s32.totalorder %v2067_v1, 1  ;;  %v2015_v51 = vadd.f32 %v2013_v27, %v2010_v37  ;;  %v1988_v1 = vsel %vm4781_vm9, %v1974_v53, 0.0  ;;  %v6227_v40 = vstv %s5131_s28 }
 0x215   :  { %v2039_v36 = vsel %vm2037_vm8, %v5129_v32, %v5116_v17  ;;  %v1989_v3 = vsel %vm5272_vm3, %v1975_v20, 0.0  ;;  %v6228_v12 = vmov %v6227_v40  ;;  %vm2201_vm15 = vcmp.lt.s32.totalorder %v2916_v62, 78  ;;  %vm2254_vm3 = vmand %vm182_vm10, %vm6203_vm2 }
 0x216   :  { %v1949_v13 = vadd.f32 %v1947_v10, %v1908_v16  ;;  %v1950_v56 = vadd.f32 %v1948_v18, %v1909_v24  ;;  %v2217_v25 = vstv %s5328_s19  ;;  %v2029_v37 = vsel %vm4545_vm12, %v2015_v51, 0.0 }
 0x217   :  { %vm5455_vm12 = vcmp.eq.s32.totalorder %v2149_v28, 1  ;;  %v5468_v42 = vsel %vm2254_vm3, 1, %v5765_v49  ;;  %v6237_v28 = vstv %s5137_s8  ;;  %vm2242_vm2 = vcmp.lt.s32.totalorder %v2916_v62, 77 }
 0x218   :  { %v5144_v39 = vpop.permute.xlu0 %2040  ;;  %v5159_v5 = vpop.permute.xlu1 %2042  ;;  %v1990_v53 = vadd.f32 %v1988_v1, %v1949_v13  ;;  %v1991_v20 = vadd.f32 %v1989_v3, %v1950_v56  ;;  %vm5487_vm10 = vcmp.eq.s32.totalorder %v2190_v7, 1  ;;  %v6244_v7 = vstv %s5153_s13 }
 0x219   :  { %v2044_v19 = vsel %vm2037_vm8, %v5144_v39, %v5159_v5  ;;  %v2045_v57 = vsel %vm2037_vm8, %v5159_v5, %v5144_v39  ;;  %v2016_v39 = vadd.f32 %v2014_v41, %v2011_v35  ;;  %v2038_v5 = vsel %vm2037_vm8, %v5116_v17, %v5129_v32 }
 0x21a   :  { %v2054_v6 = vmul.f32 %v6227_v40, %v2044_v19  ;;  %v2055_v8 = vmul.f32 %v6228_v12, %v2045_v57  ;;  %v5411_v17 = vsel %vm5385_vm14, 1, %v5765_v49  ;;  %v6229_v32 = vstv %s5123_s11 }
 0x21b   :  { %v2051_v34 = vmul.f32 %v6229_v32, %v2038_v5  ;;  %v6230_v52 = vmov %v6229_v32  ;;  %v2030_v35 = vsel %vm5307_vm13, %v2016_v39, 0.0  ;;  %vm5432_vm8 = vcmp.eq.s32.totalorder %v2108_v30, 1 }
 0x21c   :  { %v5175_v0 = vpop.permute.xlu0 %2074  ;;  %v5201_v2 = vpop.permute.xlu1 %2076  ;;  %v2052_v47 = vmul.f32 %v6230_v52, %v2039_v36  ;;  %v6233_v30 = vstv %s5146_s25  ;;  %v2031_v10 = vadd.f32 %v2029_v37, %v1990_v53  ;;  %v2032_v18 = vadd.f32 %v2030_v35, %v1991_v20 }
 0x21d   :  { %v2056_v38 = vadd.f32 %v2054_v6, %v2051_v34  ;;  %v2080_v43 = vsel %vm2078_vm7, %v5201_v2, %v5175_v0  ;;  %v6234_v26 = vmov %v6233_v30  ;;  %v2231_v44 = vrot.slane %v5411_v17, %v2870_v46 }
 0x21e   :  { %v6238_v39 = vmov %v6237_v28  ;;  %v6239_v49 = vstv %s5161_s16  ;;  %v6245_v34 = vmov %v6244_v7  ;;  %vm6246_vm13 = vnez %v6164_v4 }
 0x21f   :  { %v2093_v5 = vmul.f32 %v6238_v39, %v2080_v43  ;;  %v6240_v3 = vmov %v6239_v49  ;;  %v2272_v16 = vrot.slane %v5468_v42, %v2870_v46 }
 0x220   :  { %v5234_v48 = vpop.permute.xlu0 %2081  ;;  %v5250_v55 = vpop.permute.xlu1 %2083 }
 0x221   :  { %v2085_v27 = vsel %vm2078_vm7, %v5234_v48, %v5250_v55  ;;  %v2086_v41 = vsel %vm2078_vm7, %v5250_v55, %v5234_v48  ;;  %v2057_v48 = vadd.f32 %v2055_v8, %v2052_v47  ;;  %v2079_v55 = vsel %vm2078_vm7, %v5175_v0, %v5201_v2 }
 0x222   :  { %v2095_v63 = vmul.f32 %v6233_v30, %v2085_v27  ;;  %v2096_v58 = vmul.f32 %v6234_v26, %v2086_v41  ;;  %v2092_v51 = vmul.f32 %v6237_v28, %v2079_v55  ;;  %vm6247_vm7 = vnez %v6179_v54 }
 0x224   :  { %v5284_v22 = vpop.permute.xlu0 %2115  ;;  %v5305_v11 = vpop.permute.xlu1 %2117  ;;  %v2097_v13 = vadd.f32 %v2095_v63, %v2092_v51  ;;  %v2098_v56 = vadd.f32 %v2096_v58, %v2093_v5  ;;  %v2258_v5 = vstv %s5511_s21 }
 0x225   :  { %v2120_v36 = vsel %vm2119_vm6, %v5284_v22, %v5305_v11 }
 0x226   :  { %v2133_v32 = vmul.f32 %v6244_v7, %v2120_v36  ;;  %v2111_v55 = vsel %vm6246_vm13, %v2097_v13, 0.0  ;;  %v2112_v43 = vsel %vm5432_vm8, %v2098_v56, 0.0  ;;  %v2280_v7 = vstv %s6250_s20 }
 0x228   :  { %v5320_v45 = vpop.permute.xlu0 %2122  ;;  %v2125_v21 = vpop.permute.xlu1 %2124 }
 0x229   :  { %v2126_v24 = vsel %vm2119_vm6, %v5320_v45, %v2125_v21  ;;  %v2127_v0 = vsel %vm2119_vm6, %v2125_v21, %v5320_v45  ;;  %v2121_v45 = vsel %vm2119_vm6, %v5305_v11, %v5284_v22  ;;  %v2070_v22 = vsel %vm6243_vm0, %v2056_v38, 0.0 }
 0x22a   :  { %v2136_v1 = vmul.f32 %v6239_v49, %v2126_v24  ;;  %v2137_v40 = vmul.f32 %v6240_v3, %v2127_v0  ;;  %v2071_v11 = vsel %vm5377_vm5, %v2057_v48, 0.0  ;;  %v2134_v52 = vmul.f32 %v6245_v34, %v2121_v45 }
 0x22b   :  { %v2072_v26 = vadd.f32 %v2070_v22, %v2031_v10  ;;  %v2073_v58 = vadd.f32 %v2071_v11, %v2032_v18  ;;  %vm5541_vm6 = vcmp.eq.s32.totalorder %v2231_v44, 1 }
 0x22c   :  { %v5366_v33 = vpop.permute.xlu0 %2156  ;;  %v2159_v29 = vpop.permute.xlu1 %2158  ;;  %v2138_v20 = vadd.f32 %v2136_v1, %v2133_v32  ;;  %v2139_v37 = vadd.f32 %v2137_v40, %v2134_v52 }
 0x22d   :  { %v2162_v61 = vsel %vm2160_vm4, %v2159_v29, %v5366_v33  ;;  %v2113_v28 = vadd.f32 %v2111_v55, %v2072_v26  ;;  %v2114_v51 = vadd.f32 %v2112_v43, %v2073_v58  ;;  %v6252_v26 = vld [vmem:[#allocation24_spill] sm:$0xff] }
 0x22e   :  { %v2153_v4 = vsel %vm5455_vm12, %v2139_v37, 0.0  ;;  %v2639_v37 = vmov 1966171168  }
 0x22f   :  { %v2155_v45 = vadd.f32 %v2153_v4, %v2114_v51  ;;  %v2526_v4 = vld [vmem:[#allocation3] sm:$0xff] }
 0x230   :  { %v2164_v14 = vpop.permute.xlu0 %2163  ;;  %v2166_v57 = vpop.permute.xlu1 %2165 }
 0x231   :  { %v2167_v12 = vsel %vm2160_vm4, %v2164_v14, %v2166_v57  ;;  %v2168_v8 = vsel %vm2160_vm4, %v2166_v57, %v2164_v14  ;;  %v2161_v14 = vsel %vm2160_vm4, %v5366_v33, %v2159_v29 }
 0x232   :  { %v2177_v9 = vmul.f32 %v2176_v60, %v2167_v12  ;;  %v2178_v47 = vmul.f32 %v2176_v60, %v2168_v8  ;;  %v2174_v35 = vmul.f32 %v2173_v59, %v2161_v14  ;;  %v2175_v60 = vmul.f32 %v2173_v59, %v2162_v61 }
 0x234   :  { %v2198_v2 = vpop.permute.xlu0 %2197  ;;  %v2200_v21 = vpop.permute.xlu1 %2199  ;;  %v2179_v24 = vadd.f32 %v2177_v9, %v2174_v35  ;;  %v2180_v0 = vadd.f32 %v2178_v47, %v2175_v60  ;;  %v6251_v35 = vld [vmem:[#allocation20_spill] sm:$0xff] }
 0x235   :  { %v2202_v27 = vsel %vm2201_vm15, %v2198_v2, %v2200_v21  ;;  %v2203_v41 = vsel %vm2201_vm15, %v2200_v21, %v2198_v2 }
 0x236   :  { %v2215_v30 = vmul.f32 %v2214_v23, %v2202_v27  ;;  %v2216_v63 = vmul.f32 %v2214_v23, %v2203_v41  ;;  %v2255_v23 = vstv %s5499_s2  ;;  %v2193_v44 = vsel %vm6222_vm1, %v2179_v24, 0.0 }
 0x237   :  { %v2194_v21 = vsel %vm5487_vm10, %v2180_v0, 0.0  ;;  %vm2274_vm1 = vcmp.eq.s32.totalorder %v2272_v16, 1 }
 0x238   :  { %v2205_v17 = vpop.permute.xlu0 %2204  ;;  %v2207_v53 = vpop.permute.xlu1 %2206  ;;  %v2196_v6 = vadd.f32 %v2194_v21, %v2155_v45 }
 0x239   :  { %v2208_v33 = vsel %vm2201_vm15, %v2205_v17, %v2207_v53  ;;  %v2209_v29 = vsel %vm2201_vm15, %v2207_v53, %v2205_v17 }
 0x23a   :  { %v2218_v57 = vmul.f32 %v2217_v25, %v2208_v33  ;;  %v2219_v38 = vmul.f32 %v2217_v25, %v2209_v29  ;;  %v2152_v25 = vsel %vm6247_vm7, %v2138_v20, 0.0  ;;  %v2299_v33 = vunpack.c.l.s4 %v2639_v37 }
 0x23b   :  { %v2154_v36 = vadd.f32 %v2152_v25, %v2113_v28 }
 0x23c   :  { %v2239_v48 = vpop.permute.xlu0 %2238  ;;  %v2241_v59 = vpop.permute.xlu1 %2240  ;;  %v2220_v2 = vadd.f32 %v2218_v57, %v2215_v30  ;;  %v2221_v19 = vadd.f32 %v2219_v38, %v2216_v63  ;;  %v2300_v29 = vunpack.c.0.s8 %v2299_v33 }
 0x23d   :  { %v2243_v18 = vsel %vm2242_vm2, %v2239_v48, %v2241_v59  ;;  %v2244_v54 = vsel %vm2242_vm2, %v2241_v59, %v2239_v48  ;;  %v2195_v11 = vadd.f32 %v2193_v44, %v2154_v36 }
 0x23e   :  { %v2234_v1 = vsel %vm4745_vm11, %v2220_v2, 0.0  ;;  %v2235_v3 = vsel %vm5541_vm6, %v2221_v19, 0.0  ;;  %v2256_v12 = vmul.f32 %v2255_v23, %v2243_v18  ;;  %v2257_v8 = vmul.f32 %v2255_v23, %v2244_v54  ;;  %v2527_v19 = vld [vmem:[#allocation3 + $0x8] sm:$0xff] }
 0x23f   :  { %v2236_v15 = vadd.f32 %v2234_v1, %v2195_v11  ;;  %v2237_v17 = vadd.f32 %v2235_v3, %v2196_v6  ;;  %v2303_v60 = vsub.s32 %v2300_v29, %v6251_v35 }
 0x240   :  { %v2246_v10 = vpop.permute.xlu0 %2245  ;;  %v2248_v49 = vpop.permute.xlu1 %2247 }
 0x241   :  { %v2249_v40 = vsel %vm2242_vm2, %v2246_v10, %v2248_v49  ;;  %v2250_v42 = vsel %vm2242_vm2, %v2248_v49, %v2246_v10 }
 0x242   :  { %v2259_v50 = vmul.f32 %v2258_v5, %v2249_v40  ;;  %v2260_v22 = vmul.f32 %v2258_v5, %v2250_v42 }
 0x244   :  { %v2261_v13 = vadd.f32 %v2259_v50, %v2256_v12  ;;  %v2262_v56 = vadd.f32 %v2260_v22, %v2257_v8 }
 0x246   :  { %v2275_v32 = vsel %vm4781_vm9, %v2261_v13, 0.0  ;;  %v2276_v62 = vsel %vm2274_vm1, %v2262_v56, 0.0 }
 0x247   :  { %v2277_v34 = vadd.f32 %v2275_v32, %v2236_v15  ;;  %v2278_v52 = vadd.f32 %v2276_v62, %v2237_v17 }
 0x249   :  { %v2281_v14 = vadd.f32 %v2280_v7, %v2277_v34  ;;  %v2282_v61 = vadd.f32 %v2280_v7, %v2278_v52 }
 0x24b   :  { %v2459_v9 = vmul.f32 -1.442695, %v2281_v14  ;;  %v2460_v47 = vmul.f32 -1.442695, %v2282_v61 }
 0x24d   :  { %2518 = vpow2.f32 %v2459_v9 }
 0x24e   :  { %2520 = vpow2.f32 %v2460_v47 }
 0x25a   :  { %v2519_v27 = vpop.eup %2518 }
 0x25b   :  { %v2521_v41 = vpop.eup %2520  ;;  %v2289_v53 = vadd.f32 1.0, %v2519_v27 }
 0x25c   :  { %v2290_v20 = vadd.f32 1.0, %v2521_v41 }
 0x25d   :  { %2522 = vrcp.f32 %v2289_v53 }
 0x25e   :  { %2524 = vrcp.f32 %v2290_v20 }
 0x26a   :  { %v2523_v31 = vpop.eup %2522 }
 0x26b   :  { %v2525_v57 = vpop.eup %2524 }
 0x26c   :  { %v2297_v38 = vcombine.low %v2523_v31, %v2525_v57 }
 0x26e   :  { %v2304_v48 = vrot.slane %v2297_v38, %v2303_v60 }
 0x270   :  { %v2305_v55 = vcombine.high %v2304_v48, %v2304_v48  ;;  %v2312_v43 = vrot.slane %v2304_v48, %v2303_v60 }
 0x272   :  { %v2319_v30 = vrot.slane %v2305_v55, %v2303_v60  ;;  %v2323_v63 = vrot.slane %v2312_v43, %v2870_v46  ;;  %v2327_v58 = vrot.slane %v2312_v43, %v6252_v26 }
 0x274   :  { %v2331_v24 = vrot.slane %v2319_v30, %v2870_v46  ;;  %v2335_v0 = vrot.slane %v2319_v30, %v6252_v26  ;;  %v2336_v59 = vcombine.low %v2323_v63, %v2327_v58 }
 0x276   :  { %v2337_v25 = vcombine.low %v2331_v24, %v2335_v0  ;;  %v2340_v2 = vmul.f32 %v2526_v4, %v2336_v59 }
 0x278   :  { %v2341_v28 = vmul.f32 %v2527_v19, %v2337_v25  ;;  %2342 = vst [vmem:[#allocation8] sm:$0xff] %v2340_v2 }
 0x27a   :  { %2343 = vst [vmem:[#allocation8 + $0x8] sm:$0xff] %v2341_v28 }
 0x27b   :  { %2571 = shalt.err (!%p2568_p0)
}
 0x27c   :  { %s6253_s5 = smov 8   ;;  %s6254_s14 = smov 128  }
 0x27d   :  { %s6255_s27 = sld [smem:[#allocation78_spill]] }
 0x283   :  { %2355 = dma.vmem_to_hbm [thread:$0]  %s2350_s24, 256, %s6255_s27, [#allocation5], %s6254_s14, %s6254_s14, %s6253_s5  }
 0x284   :  { %2584 = dma.done.wait [#allocation5], 256  }
 0x285   :  { %2585 = vsyncadd [#allocation5], 4294967040 }
 0x286   :  { %2359 = vsyncpa [#allocation4], 1 }
 0x287   :  { %2360 = vsyncpa [#allocation5], 1 }
 0x288   :  { %2361 = vsyncpa [#allocation6], 1 }

</bundles_post_ra>
